<compile_context>
chip_gen: v7x
topology: tpu7x:2x2x1
jax: 0.10.0
libtpu: 0.0.40
codegen_flags: <defaults>
</compile_context>

<pallas_src>
import functools
import numpy as np
import jax
import jax.numpy as jnp
from jax.experimental import pallas as pl
from jax.experimental.pallas import tpu as pltpu

# ---------------- synthetic (small) configuration ----------------
NUM_OBJ_CLASSES = 16      # len(obj_classes)
EMBED_DIM = 32            # cfg.MODEL.ROI_RELATION_HEAD.EMBED_DIM
IN_CHANNELS = 64          # obj_dim (roi feature dim)
HIDDEN_DIM = 32           # CONTEXT_HIDDEN_DIM   (4H = 128 = one lane width)
POS_DIM = 128             # hard-coded Linear(32, 128) in pos_embed
CPAD = 128                # classifier output padded to a full lane width
FEATW = 512               # fused feature projection padded (8H + 6H = 448 -> 512, lane dense)
NROWS = 32                # decoder embedding rows padded ('start' + classes = 17 -> 32)
VMEM_LIMIT = 48 * 1024 * 1024   # safe on v5e/v6e (128 MiB) and v7x (64 MiB physical)

VMEM = pl.BlockSpec(memory_space=pltpu.MemorySpace.VMEM)


def _vmem(n):
    return [pl.BlockSpec(memory_space=pltpu.MemorySpace.VMEM) for _ in range(n)]


def _single_tensorcore():
    """v5e/v6e have 1 TC/chip -> fuse biLSTM directions; v7x (2 TCs) keeps the grid=(2,) split."""
    try:
        kind = jax.devices()[0].device_kind.lower()
    except Exception:
        return True
    return not any(tag in kind for tag in ("v7", "7x"))


def _choose_row_tile(n, max_tile=256):
    if n <= max_tile:
        return n
    t = max_tile - (max_tile % 8)
    while t >= 8 and n % t != 0:
        t -= 8
    return t if t >= 8 else n


def _row_spec(ncols, tile):
    return pl.BlockSpec((tile, ncols), lambda i: (i, 0))


def _const_spec(arr):
    nd = arr.ndim
    return pl.BlockSpec(arr.shape, lambda i: (0,) * nd)


def _cparams():
    return pltpu.CompilerParams(dimension_semantics=("parallel",),
                                vmem_limit_bytes=VMEM_LIMIT)


# ============================ Pallas kernels ============================

def _feat_kernel(x_ref, logit_ref, box_ref, emb1_ref, pw1_ref, pb1_ref, pw2_ref, pb2_ref,
                 wx_ref, we_ref, wp_ref, b_ref, o_ref):
    """Fused feature prep (bf16 weights, f32 accumulate):
       obj_embed = softmax(predict_logits) @ obj_embed1.weight
       pos_embed = ReLU(Linear(BN-folded-Linear(box_info)))
       Then the split-weight projection of the (never materialized) concat [x | obj_embed | pos]:
         cols 0:4H        obj fwd-LSTM input projection (+ b_ih + b_hh)
         cols 4H:8H       obj bwd-LSTM input projection
         cols 8H:8H+6H    static part of DecoderRNN.input_linearity (+ b_in)
         cols 8H+6H:512   zero pad (lane-dense output store)
    """
    l = logit_ref[...]
    m = jnp.max(l, axis=-1, keepdims=True)
    e = jnp.exp(l - m)
    sm = (e / jnp.sum(e, axis=-1, keepdims=True)).astype(jnp.bfloat16)
    emb = jnp.dot(sm, emb1_ref[...], preferred_element_type=jnp.float32)
    h1 = (jnp.dot(box_ref[...].astype(jnp.bfloat16), pw1_ref[...],
                  preferred_element_type=jnp.float32) + pb1_ref[...])
    pos = jnp.maximum(
        jnp.dot(h1.astype(jnp.bfloat16), pw2_ref[...],
                preferred_element_type=jnp.float32) + pb2_ref[...], 0.0)
    o_ref[...] = (
        jnp.dot(x_ref[...].astype(jnp.bfloat16), wx_ref[...], preferred_element_type=jnp.float32)
        + jnp.dot(emb.astype(jnp.bfloat16), we_ref[...], preferred_element_type=jnp.float32)
        + jnp.dot(pos.astype(jnp.bfloat16), wp_ref[...], preferred_element_type=jnp.float32)
        + b_ref[...])


def _lstm_kernel(xproj_ref, whh_ref, hs_ref):
    """torch.nn.LSTM recurrence over a padded (T, B, 4W) input projection (biases folded in).
    W = H when the two directions are split over the grid (v7x), W = 2H when both directions are
    fused with a block-diagonal Whh (v5e/v6e).  Gate columns are grouped (i | f | g | o), each W
    wide.  h is carried and stored padded to 128 lanes (lane-dense stores; zero Whh rows make the
    padding free on the MXU); sigmoid/tanh each run once over the whole gate vector per step."""
    T, B, G = xproj_ref.shape
    W = G // 4
    LANE = hs_ref.shape[2]            # 128
    whh = whh_ref[...]
    zero_tail = jnp.zeros((B, LANE - W), jnp.float32)

    def step(t, carry):
        h_pad, c = carry
        gates = xproj_ref[t] + jnp.dot(h_pad, whh, preferred_element_type=jnp.float32)
        sg = jax.nn.sigmoid(gates)    # one EUP pass over all gates
        th = jnp.tanh(gates)
        i = sg[:, 0:W]
        f = sg[:, W:2 * W]
        g = th[:, 2 * W:3 * W]
        o = sg[:, 3 * W:4 * W]
        c = f * c + i * g
        h = o * jnp.tanh(c)
        h_pad = jnp.concatenate([h, zero_tail], axis=1)     # (B, 128) lane-dense store
        hs_ref[t] = h_pad
        return h_pad, c

    jax.lax.fori_loop(
        0, T, step,
        (jnp.zeros((B, LANE), jnp.float32), jnp.zeros((B, W), jnp.float32)),
        unroll=True)


def _decoder_kernel(pin_ref, wcomb_ref, wout_ref, bout_ref, dist_ref, *, num_classes):
    """Whole DecoderRNN eval loop fused.  Per step only TWO matmuls run on the serial path:
       proj = pin[t] + [onehot | h] @ W_comb   (embedding-table @ W_emb and b_st folded in)
       dist = hy @ W_out + b_out               (CPAD=128 lane-dense store)
    followed by the highway-LSTM element-wise math (sigmoid/tanh once over the whole 6H vector),
    the argmax over dist[:, 1:num_classes] and the next-step one-hot."""
    T, B, G6 = pin_ref.shape
    H = G6 // 6
    NR = wcomb_ref.shape[0] - H
    Cp = wout_ref.shape[1]

    w_comb = wcomb_ref[...]           # (NR + H, 6H)
    w_out = wout_ref[...]
    b_out = bout_ref[...]

    lane = jax.lax.broadcasted_iota(jnp.int32, (B, Cp), 1)
    valid = (lane >= 1) & (lane < num_classes)        # reference: argmax over dist[:, 1:]
    emb_lane = jax.lax.broadcasted_iota(jnp.int32, (B, NR), 1)

    def step(t, carry):
        comb, c = carry               # comb = [onehot(prev embedding row) | h]   (B, NR + H)
        proj = pin_ref[t] + jnp.dot(comb, w_comb, preferred_element_type=jnp.float32)   # (B, 6H)
        sg = jax.nn.sigmoid(proj)
        th = jnp.tanh(proj)
        ig = sg[:, 0:H]
        fg = sg[:, H:2 * H]
        mi = th[:, 2 * H:3 * H]
        og = sg[:, 3 * H:4 * H]
        hg = sg[:, 4 * H:5 * H]
        mem = ig * mi + fg * c
        hy = og * jnp.tanh(mem)
        hy = hg * hy + (1.0 - hg) * proj[:, 5 * H:6 * H]          # highway
        dist = jnp.dot(hy, w_out, preferred_element_type=jnp.float32) + b_out    # (B, CPAD)
        dist_ref[t] = dist
        masked = jnp.where(valid, dist, -1e30)
        mx = jnp.max(masked, axis=-1, keepdims=True)
        best = jnp.min(jnp.where(masked >= mx, lane, Cp), axis=-1, keepdims=True)   # (B, 1)
        # previous_obj_embed = obj_embed(best + 1): table row 0 = 'start', class k -> row k + 1
        # (matches the reference DecoderRNN indexing of its ['start'] + obj_classes table).
        onehot = (emb_lane == best + 1).astype(jnp.float32)
        comb = jnp.concatenate([onehot, hy], axis=1)
        return comb, mem

    comb0 = jnp.concatenate([(emb_lane == 0).astype(jnp.float32),     # 'start' row
                             jnp.zeros((B, H), jnp.float32)], axis=1)
    jax.lax.fori_loop(0, T, step, (comb0, jnp.zeros((B, H), jnp.float32)), unroll=True)


def _obj_proj_kernel(hf_ref, hb_ref, pina_ref, wf_ref, wb_ref, b_ref, wenc_ref,
                     enc_ref, pin_ref):
    """lin_obj_h on the (never materialized) [fwd|bwd] biLSTM output (output padded to 128 lanes
    for a dense store), fused with the encoder-rep part of the decoder static input projection."""
    enc = (jnp.dot(hf_ref[...].astype(jnp.bfloat16), wf_ref[...], preferred_element_type=jnp.float32)
           + jnp.dot(hb_ref[...].astype(jnp.bfloat16), wb_ref[...], preferred_element_type=jnp.float32)
           + b_ref[...])                                             # (rows, 128), lanes H: = 0
    enc_ref[...] = enc
    pin_ref[...] = pina_ref[...] + jnp.dot(enc.astype(jnp.bfloat16), wenc_ref[...],
                                           preferred_element_type=jnp.float32)


def _edge_proj_kernel(e2_ref, x_ref, ctx_ref, we_ref, wx_ref, wc_ref, b_ref, o_ref):
    """Edge biLSTM input projection for both directions (cols 0:4H fwd, 4H:8H bwd) of the
    never-materialized concat [obj_embed2 | x | obj_ctx]."""
    o_ref[...] = (
        jnp.dot(e2_ref[...].astype(jnp.bfloat16), we_ref[...], preferred_element_type=jnp.float32)
        + jnp.dot(x_ref[...].astype(jnp.bfloat16), wx_ref[...], preferred_element_type=jnp.float32)
        + jnp.dot(ctx_ref[...].astype(jnp.bfloat16), wc_ref[...], preferred_element_type=jnp.float32)
        + b_ref[...])


def _lin2_kernel(hf_ref, hb_ref, wf_ref, wb_ref, b_ref, o_ref):
    """lin_edge_h on split [fwd|bwd] inputs (output padded to 128 lanes)."""
    o_ref[...] = (
        jnp.dot(hf_ref[...].astype(jnp.bfloat16), wf_ref[...], preferred_element_type=jnp.float32)
        + jnp.dot(hb_ref[...].astype(jnp.bfloat16), wb_ref[...], preferred_element_type=jnp.float32)
        + b_ref[...])


# ============================ Pallas wrappers ============================

def feat_forward(x_p, logits_p, box_p, p):
    n = x_p.shape[0]
    tile = _choose_row_tile(n)
    out_w = p['feat_b'].shape[1]
    return pl.pallas_call(
        _feat_kernel,
        out_shape=jax.ShapeDtypeStruct((n, out_w), jnp.float32),
        grid=(pl.cdiv(n, tile),),
        in_specs=[_row_spec(x_p.shape[1], tile), _row_spec(logits_p.shape[1], tile),
                  _row_spec(box_p.shape[1], tile),
                  _const_spec(p['obj_embed1']), _const_spec(p['pos_w1']),
                  _const_spec(p['pos_b1']), _const_spec(p['pos_w2']), _const_spec(p['pos_b2']),
                  _const_spec(p['feat_wx']), _const_spec(p['feat_we']),
                  _const_spec(p['feat_wp']), _const_spec(p['feat_b'])],
        out_specs=_row_spec(out_w, tile),
        compiler_params=_cparams(),
    )(x_p, logits_p, box_p, p['obj_embed1'], p['pos_w1'], p['pos_b1'],
      p['pos_w2'], p['pos_b2'], p['feat_wx'], p['feat_we'], p['feat_wp'], p['feat_b'])


def bilstm_forward(xproj, whh):
    # xproj: (ndir, T, B, 4W) padded input projections; whh: (ndir, 128, 4W).
    # ndir == 2 (v7x): direction split over the "parallel" grid axis -> 2 TensorCores.
    # ndir == 1 (v5e/v6e): both directions fused via block-diagonal Whh in one recurrence.
    ndir, T, B, G = xproj.shape
    return pl.pallas_call(
        _lstm_kernel,
        out_shape=jax.ShapeDtypeStruct((ndir, T, B, 128), jnp.float32),
        grid=(ndir,),
        in_specs=[pl.BlockSpec((None, T, B, G), lambda d: (d, 0, 0, 0)),
                  pl.BlockSpec((None, 128, G), lambda d: (d, 0, 0))],
        out_specs=pl.BlockSpec((None, T, B, 128), lambda d: (d, 0, 0, 0)),
        compiler_params=_cparams(),
    )(xproj, whh)


def obj_proj_forward(hf, hb, pin_a, p):
    n = hf.shape[0]
    tile = _choose_row_tile(n)
    enc_w = p['lin_obj_b'].shape[1]
    g6 = pin_a.shape[1]
    return pl.pallas_call(
        _obj_proj_kernel,
        out_shape=(jax.ShapeDtypeStruct((n, enc_w), jnp.float32),
                   jax.ShapeDtypeStruct((n, g6), jnp.float32)),
        grid=(pl.cdiv(n, tile),),
        in_specs=[_row_spec(hf.shape[1], tile), _row_spec(hb.shape[1], tile),
                  _row_spec(g6, tile),
                  _const_spec(p['lin_obj_wf']), _const_spec(p['lin_obj_wb']),
                  _const_spec(p['lin_obj_b']), _const_spec(p['dec_w_enc'])],
        out_specs=(_row_spec(enc_w, tile), _row_spec(g6, tile)),
        compiler_params=_cparams(),
    )(hf, hb, pin_a, p['lin_obj_wf'], p['lin_obj_wb'], p['lin_obj_b'], p['dec_w_enc'])


def decoder_forward(pin_pad, p):
    T, B, _ = pin_pad.shape
    return pl.pallas_call(
        functools.partial(_decoder_kernel, num_classes=NUM_OBJ_CLASSES),
        out_shape=jax.ShapeDtypeStruct((T, B, CPAD), jnp.float32),
        in_specs=_vmem(4), out_specs=VMEM,
        compiler_params=pltpu.CompilerParams(vmem_limit_bytes=VMEM_LIMIT),
    )(pin_pad, p['dec_w_comb'], p['dec_w_out'], p['dec_b_out'])


def edge_proj_forward(e2_p, x_p, ctx_pad, p):
    n = x_p.shape[0]
    tile = _choose_row_tile(n)
    out_w = p['edge_b'].shape[1]
    return pl.pallas_call(
        _edge_proj_kernel,
        out_shape=jax.ShapeDtypeStruct((n, out_w), jnp.float32),
        grid=(pl.cdiv(n, tile),),
        in_specs=[_row_spec(e2_p.shape[1], tile), _row_spec(x_p.shape[1], tile),
                  _row_spec(ctx_pad.shape[1], tile),
                  _const_spec(p['edge_we']), _const_spec(p['edge_wx']),
                  _const_spec(p['edge_wc']), _const_spec(p['edge_b'])],
        out_specs=_row_spec(out_w, tile),
        compiler_params=_cparams(),
    )(e2_p, x_p, ctx_pad, p['edge_we'], p['edge_wx'], p['edge_wc'], p['edge_b'])


def lin_edge_forward(hf, hb, p):
    n = hf.shape[0]
    tile = _choose_row_tile(n)
    out_w = p['lin_edge_b'].shape[1]
    return pl.pallas_call(
        _lin2_kernel,
        out_shape=jax.ShapeDtypeStruct((n, out_w), jnp.float32),
        grid=(pl.cdiv(n, tile),),
        in_specs=[_row_spec(hf.shape[1], tile), _row_spec(hb.shape[1], tile),
                  _const_spec(p['lin_edge_wf']), _const_spec(p['lin_edge_wb']),
                  _const_spec(p['lin_edge_b'])],
        out_specs=_row_spec(out_w, tile),
        compiler_params=_cparams(),
    )(hf, hb, p['lin_edge_wf'], p['lin_edge_wb'], p['lin_edge_b'])


# ============================ packed-sequence helpers (host glue) ============================

def transpose_packed_sequence_inds(lengths):
    new_inds, new_lens = [], []
    cum_add = np.cumsum([0] + list(lengths))
    max_len = lengths[0]
    length_pointer = len(lengths) - 1
    for i in range(max_len):
        while length_pointer > 0 and lengths[length_pointer] <= i:
            length_pointer -= 1
        new_inds.append(cum_add[:(length_pointer + 1)].copy())
        cum_add[:(length_pointer + 1)] += 1
        new_lens.append(length_pointer + 1)
    return np.concatenate(new_inds, 0), new_lens


def sort_rois_np(proposals):
    boxes = np.concatenate([p['bbox'] for p in proposals], 0)
    c_x = 0.5 * (boxes[:, 0] + boxes[:, 2])
    scores = c_x / (c_x.max() + 1.0)
    num_rois = [p['bbox'].shape[0] for p in proposals]
    offsets = np.concatenate([[0], np.cumsum(num_rois)[:-1]]).astype(np.int64)
    image_order = sorted(range(len(num_rois)), key=lambda i: -num_rois[i])
    P = []
    for i in image_order:
        sc = scores[offsets[i]:offsets[i] + num_rois[i]]
        local = np.argsort(-sc, kind='stable')
        P.append(offsets[i] + local)
    P = np.concatenate(P, 0)
    lengths_sorted = sorted(num_rois, reverse=True)
    inds, ls_transposed = transpose_packed_sequence_inds(lengths_sorted)
    perm = P[inds.astype(np.int64)]
    inv_perm = np.argsort(perm)
    return perm.astype(np.int32), inv_perm.astype(np.int32), [int(l) for l in ls_transposed]


def encode_box_info_np(proposals):
    infos = []
    for p in proposals:
        boxes = p['bbox'].astype(np.float32)
        wid, hei = float(p['size'][0]), float(p['size'][1])
        wh = boxes[:, 2:4] - boxes[:, 0:2] + 1.0
        xy = boxes[:, 0:2] + 0.5 * wh
        w, h = wh[:, 0:1], wh[:, 1:2]
        x, y = xy[:, 0:1], xy[:, 1:2]
        x1, y1, x2, y2 = boxes[:, 0:1], boxes[:, 1:2], boxes[:, 2:3], boxes[:, 3:4]
        info = np.concatenate([w / wid, h / hei, x / wid, y / hei,
                               x1 / wid, y1 / hei, x2 / wid, y2 / hei,
                               w * h / (wid * hei)], axis=-1)
        infos.append(info)
    return np.concatenate(infos, 0).astype(np.float32)


def build_packed_indices(batch_sizes):
    """Static index tables for padding a packed sequence to (T, B, .) per direction and for
    gathering the padded outputs back to packed order.  Inactive (t, b) slots read row 0 and carry
    garbage h/c by design: batch sizes are non-increasing so inactive lanes never reactivate, rows
    are independent in the recurrence, and inactive lanes are never gathered back."""
    bs = [int(v) for v in batch_sizes]
    assert all(bs[i] >= bs[i + 1] for i in range(len(bs) - 1)), \
        "packed-sequence batch sizes must be non-increasing"
    T, B = len(bs), bs[0]
    offsets = np.concatenate([[0], np.cumsum(bs)[:-1]]).astype(np.int64)
    lengths = np.array([sum(1 for v in bs if v > b) for b in range(B)], np.int64)
    pad_idx = np.zeros((T, B), np.int32)
    rev_idx = np.zeros((T, B), np.int32)
    for t in range(T):
        for b in range(B):
            pad_idx[t, b] = offsets[t] + b if b < bs[t] else 0
            rev_idx[t, b] = offsets[lengths[b] - 1 - t] + b if t < lengths[b] else 0
    fwd_g, bwd_g = [], []
    for t in range(T):
        for b in range(bs[t]):
            fwd_g.append(t * B + b)
            bwd_g.append((lengths[b] - 1 - t) * B + b)
    return pad_idx, rev_idx, np.array(fwd_g, np.int32), np.array(bwd_g, np.int32)


def _interleave_gates(a, b):
    """(T,B,4H) fwd + (T,B,4H) bwd -> (T,B,8H) gate-grouped [i_f i_b | f_f f_b | g_f g_b | o_f o_b]."""
    T, B, G = a.shape
    Hh = G // 4
    return jnp.concatenate([a.reshape(T, B, 4, Hh), b.reshape(T, B, 4, Hh)],
                           axis=3).reshape(T, B, 2 * G)


# ============================ parameters ============================

def init_params(key, fuse_dirs):
    E, H, C, D, P = EMBED_DIM, HIDDEN_DIM, NUM_OBJ_CLASSES, IN_CHANNELS, POS_DIM
    G4, G5, G6 = 4 * H, 5 * H, 6 * H
    ks = iter(jax.random.split(key, 64))

    def nrm(shape, scale=0.1):
        return scale * jax.random.normal(next(ks), shape, dtype=jnp.float32)

    bf = lambda a: a.astype(jnp.bfloat16)

    p = {}
    p['obj_embed1'] = bf(nrm((C, E)))
    p['obj_embed2'] = nrm((C, E))                            # gathered per-row on the host (f32)

    # pos_embed: Linear(9,32) -> BatchNorm1d(32) [eval, folded] -> Linear(32,128) -> ReLU
    w1, b1 = nrm((32, 9)), nrm((32,), 0.01)
    bn_gamma, bn_beta = jnp.ones((32,)), jnp.zeros((32,))
    bn_mean, bn_var, eps = jnp.zeros((32,)), jnp.ones((32,)), 1e-5
    s = bn_gamma / jnp.sqrt(bn_var + eps)
    p['pos_w1'] = bf((w1 * s[:, None]).T)                    # (9, 32)
    p['pos_b1'] = ((b1 - bn_mean) * s + bn_beta)[None, :]
    w2, b2 = nrm((P, 32)), nrm((P,), 0.01)
    p['pos_w2'], p['pos_b2'] = bf(w2.T), b2[None, :]

    def lstm_dir(I):
        wih, whh = nrm((G4, I)), nrm((G4, H))
        bih, bhh = nrm((G4,), 0.01), nrm((G4,), 0.01)
        return wih.T, whh.T, (bih + bhh)[None, :]            # (I, 4H), (H, 4H), (1, 4H)

    def pack_whh(whh_f, whh_b):
        if fuse_dirs:
            wf = whh_f.reshape(H, 4, H)
            wb = whh_b.reshape(H, 4, H)
            top = jnp.concatenate([wf, jnp.zeros_like(wf)], axis=2).reshape(H, 8 * H)
            bot = jnp.concatenate([jnp.zeros_like(wb), wb], axis=2).reshape(H, 8 * H)
            return jnp.concatenate([top, bot,
                                    jnp.zeros((128 - 2 * H, 8 * H), jnp.float32)], axis=0)[None]
        pad = jnp.zeros((128 - H, G4), jnp.float32)
        return jnp.stack([jnp.concatenate([whh_f, pad], 0),
                          jnp.concatenate([whh_b, pad], 0)], axis=0)

    I_obj = D + E + P                                        # [x | obj_embed | pos]
    of_wih, of_whh, of_b = lstm_dir(I_obj)
    ob_wih, ob_whh, ob_b = lstm_dir(I_obj)
    p['obj_whh'] = pack_whh(of_whh, ob_whh)

    I_edge = E + D + H                                       # [obj_embed2 | x | obj_ctx]
    ef_wih, ef_whh, ef_b = lstm_dir(I_edge)
    eb_wih, eb_whh, eb_b = lstm_dir(I_edge)
    p['edge_whh'] = pack_whh(ef_whh, eb_whh)

    # lin_obj_h / lin_edge_h: Linear(2H, H); split fwd/bwd halves, output cols padded to 128 lanes
    def lin_pad(w, b):
        wt = w.T                                             # (2H, H)
        padc = jnp.zeros((H, 128 - H), jnp.float32)
        bp = jnp.concatenate([b[None, :], jnp.zeros((1, 128 - H), jnp.float32)], 1)
        return (bf(jnp.concatenate([wt[:H, :], padc], 1)),
                bf(jnp.concatenate([wt[H:, :], padc], 1)), bp)
    p['lin_obj_wf'], p['lin_obj_wb'], p['lin_obj_b'] = lin_pad(nrm((H, 2 * H)), nrm((H,), 0.01))
    p['lin_edge_wf'], p['lin_edge_wb'], p['lin_edge_b'] = lin_pad(nrm((H, 2 * H)), nrm((H,), 0.01))

    # DecoderRNN
    dec_table = nrm((C + 1, E))                              # rows: ['start'] + obj_classes
    table_pad = jnp.concatenate([dec_table, jnp.zeros((NROWS - (C + 1), E), jnp.float32)], 0)
    dec_in = (H + D + E + P) + E                             # inputs_dim + embed_dim
    w_in_t = nrm((G6, dec_in)).T                             # (dec_in, 6H)
    b_in = jnp.zeros((1, G6), jnp.float32)                   # init_parameters(): bias = 0
    w_st = nrm((G5, H)).T                                    # (H, 5H)
    b_st = jnp.zeros((1, G5), jnp.float32)                   # init_parameters(): bias = 0
    w_out, b_out = nrm((C, H)), nrm((C,), 0.01)
    p['dec_w_out'] = jnp.concatenate([w_out.T, jnp.zeros((H, CPAD - C), jnp.float32)], 1)
    p['dec_b_out'] = jnp.concatenate([b_out[None, :], jnp.zeros((1, CPAD - C), jnp.float32)], 1)

    # input_linearity rows split by the timestep-input layout [x | obj_embed | pos | enc | prev_embed]
    wina_x = w_in_t[0:D, :]
    wina_e = w_in_t[D:D + E, :]
    wina_p = w_in_t[D + E:D + E + P, :]
    w_enc = w_in_t[D + E + P:D + E + P + H, :]               # (H, 6H)
    w_emb = w_in_t[D + E + P + H:, :]                        # (E, 6H)
    p['dec_w_enc'] = bf(jnp.concatenate([w_enc, jnp.zeros((128 - H, G6), jnp.float32)], 0))

    # Fused [onehot | h] -> 6H decoder weight: embedding lookup + prev_embed projection and the
    # state projection collapse into ONE per-step matmul; b_st is folded into the table rows
    # (the one-hot always sums to 1).
    table_emb = jnp.dot(table_pad, w_emb) + jnp.concatenate(
        [b_st, jnp.zeros((1, H), jnp.float32)], 1)           # (NROWS, 6H)
    w_st_pad = jnp.concatenate([w_st, jnp.zeros((H, H), jnp.float32)], 1)   # (H, 6H)
    p['dec_w_comb'] = jnp.concatenate([table_emb, w_st_pad], 0)             # (NROWS + H, 6H)

    # obj LSTM W_ih split by [x | obj_embed | pos], packed with the decoder static projection,
    # columns padded to FEATW for lane-dense output stores.
    def split_obj(w):
        return w[0:D, :], w[D:D + E, :], w[D + E:D + E + P, :]
    ofx, ofe, ofp = split_obj(of_wih)
    obx, obe, obp = split_obj(ob_wih)
    padw = FEATW - (8 * H + G6)

    def packw(fw, bw, dw, rows):
        return bf(jnp.concatenate([fw, bw, dw, jnp.zeros((rows, padw), jnp.float32)], 1))
    p['feat_wx'] = packw(ofx, obx, wina_x, D)
    p['feat_we'] = packw(ofe, obe, wina_e, E)
    p['feat_wp'] = packw(ofp, obp, wina_p, P)
    p['feat_b'] = jnp.concatenate([of_b, ob_b, b_in, jnp.zeros((1, padw), jnp.float32)], 1)

    # edge LSTM W_ih split by [obj_embed2 | x | obj_ctx]; ctx rows padded to 128 (enc lane-padded)
    def split_edge(w):
        return w[0:E, :], w[E:E + D, :], w[E + D:E + D + H, :]
    efe, efx, efc = split_edge(ef_wih)
    ebe, ebx, ebc = split_edge(eb_wih)
    p['edge_we'] = bf(jnp.concatenate([efe, ebe], 1))                         # (E, 8H)
    p['edge_wx'] = bf(jnp.concatenate([efx, ebx], 1))                         # (D, 8H)
    wc = jnp.concatenate([efc, ebc], 1)
    p['edge_wc'] = bf(jnp.concatenate([wc, jnp.zeros((128 - H, 8 * H), jnp.float32)], 0))
    p['edge_b'] = jnp.concatenate([ef_b, eb_b], 1)                            # (1, 8H)
    return p


# ============================ LSTMContext.forward (eval 'sgcls') ============================

def lstm_context_forward(x, obj_logits, box_info, params, perm, inv_perm,
                         pad_idx, rev_idx, fwd_g, bwd_g, fuse_dirs):
    H = HIDDEN_DIM
    G4, G6 = 4 * H, 6 * H
    T, B = pad_idx.shape

    x_p = jnp.take(x, perm, axis=0)                  # packed order
    logits_p = jnp.take(obj_logits, perm, axis=0)
    box_p = jnp.take(box_info, perm, axis=0)

    # fused feature prep + obj-LSTM input projections + decoder static input projection
    feat = feat_forward(x_p, logits_p, box_p, params)                # (N, FEATW)
    xproj_f, xproj_b = feat[:, 0:G4], feat[:, G4:2 * G4]
    pin_a = feat[:, 2 * G4:2 * G4 + G6]

    def pack_dirs(pf, pb):
        a = jnp.take(pf, pad_idx.reshape(-1), axis=0).reshape(T, B, pf.shape[1])
        b = jnp.take(pb, rev_idx.reshape(-1), axis=0).reshape(T, B, pb.shape[1])
        if fuse_dirs:
            return _interleave_gates(a, b)[None]                     # (1, T, B, 8H)
        return jnp.stack([a, b], axis=0)                             # (2, T, B, 4H)

    def unpack(hs):
        if fuse_dirs:
            flat = hs[0].reshape(T * B, 128)
            return (jnp.take(flat, fwd_g, axis=0)[:, 0:H],
                    jnp.take(flat, bwd_g, axis=0)[:, H:2 * H])
        return (jnp.take(hs[0].reshape(T * B, 128), fwd_g, axis=0)[:, :H],
                jnp.take(hs[1].reshape(T * B, 128), bwd_g, axis=0)[:, :H])

    # ---- obj_ctx ----
    hs_obj = bilstm_forward(pack_dirs(xproj_f, xproj_b), params['obj_whh'])
    hf, hb = unpack(hs_obj)
    enc_pad, pin_static = obj_proj_forward(hf, hb, pin_a, params)    # lin_obj_h + dec static proj

    pin_pad = jnp.take(pin_static, pad_idx.reshape(-1), axis=0).reshape(T, B, G6)
    dist_pad = decoder_forward(pin_pad, params)                      # (T, B, CPAD)
    dist_packed = jnp.take(dist_pad.reshape(T * B, CPAD), fwd_g, axis=0)[:, :NUM_OBJ_CLASSES]
    preds_packed = jnp.argmax(dist_packed[:, 1:], axis=-1).astype(jnp.int32) + 1

    # ---- edge_ctx ----
    e2_p = jnp.take(params['obj_embed2'], preds_packed, axis=0)      # obj_embed2(obj_preds)
    xproj_e = edge_proj_forward(e2_p, x_p, enc_pad, params)          # (N, 8H)
    hs_edge = bilstm_forward(pack_dirs(xproj_e[:, 0:G4], xproj_e[:, G4:2 * G4]),
                             params['edge_whh'])
    ef, eb = unpack(hs_edge)
    edge_packed = lin_edge_forward(ef, eb, params)[:, :H]

    obj_dists = jnp.take(dist_packed, inv_perm, axis=0)
    obj_preds = jnp.take(preds_packed, inv_perm, axis=0)
    edge_ctx = jnp.take(edge_packed, inv_perm, axis=0)
    return obj_dists, obj_preds, edge_ctx   # (num_obj, C), (num_obj,), (num_obj, H)


# ============================ main ============================

if __name__ == "__main__":
    key = jax.random.PRNGKey(0)
    k_param, k_x, k_logit, k_box, k_lab = jax.random.split(key, 5)

    fuse_dirs = _single_tensorcore()       # fuse biLSTM directions on v5e/v6e, split on v7x

    num_rois = [5, 3]                      # 2 images, 5 + 3 proposals
    N = sum(num_rois)
    wid, hei = 320.0, 240.0

    x = 0.1 * jax.random.normal(k_x, (N, IN_CHANNELS), dtype=jnp.float32)
    logits = jax.random.normal(k_logit, (N, NUM_OBJ_CLASSES), dtype=jnp.float32)
    bb = jax.random.uniform(k_box, (N, 4), dtype=jnp.float32)
    x1 = bb[:, 0] * (wid - 48.0)
    y1 = bb[:, 1] * (hei - 48.0)
    x2 = x1 + 8.0 + bb[:, 2] * 32.0
    y2 = y1 + 8.0 + bb[:, 3] * 32.0
    boxes = np.asarray(jnp.stack([x1, y1, x2, y2], axis=1))
    labels = np.asarray(jax.random.randint(k_lab, (N,), 1, NUM_OBJ_CLASSES))
    logits_np = np.asarray(logits)

    proposals = []
    off = 0
    for n in num_rois:
        proposals.append({'bbox': boxes[off:off + n], 'size': (wid, hei),
                          'labels': labels[off:off + n],
                          'predict_logits': logits_np[off:off + n]})
        off += n

    params = init_params(k_param, fuse_dirs)
    perm, inv_perm, ls_transposed = sort_rois_np(proposals)       # host glue (sort_rois)
    box_info = jnp.asarray(encode_box_info_np(proposals))         # host glue (encode_box_info)
    pad_idx, rev_idx, fwd_g, bwd_g = build_packed_indices(ls_transposed)

    fwd = jax.jit(functools.partial(lstm_context_forward, params=params,
                                    perm=perm, inv_perm=inv_perm,
                                    pad_idx=pad_idx, rev_idx=rev_idx,
                                    fwd_g=fwd_g, bwd_g=bwd_g, fuse_dirs=fuse_dirs))

    obj_dists, obj_preds, edge_ctx = fwd(x, logits, box_info)
    jax.block_until_ready(obj_dists)
    jax.block_until_ready(obj_preds)
    jax.block_until_ready(edge_ctx)

    assert obj_dists.shape == (N, NUM_OBJ_CLASSES)
    assert obj_preds.shape == (N,)
    assert edge_ctx.shape == (N, HIDDEN_DIM)
    assert bool(jnp.all(jnp.isfinite(obj_dists)))
    assert bool(jnp.all(jnp.isfinite(edge_ctx)))
    assert bool(jnp.all((obj_preds >= 1) & (obj_preds < NUM_OBJ_CLASSES)))
    print("KERNEL_OK")
</pallas_src>

<mosaic_0001>
module attributes {stable_mosaic.version = 11 : i64} {
  func.func @_lstm_kernel(%arg0: i32, %arg1: memref<1x5x2x256xf32, #tpu.memory_space<vmem>>, %arg2: memref<1x128x256xf32, #tpu.memory_space<vmem>>, %arg3: memref<1x5x2x128xf32, #tpu.memory_space<vmem>>) attributes {dimension_semantics = [#tpu.dimension_semantics<parallel>], iteration_bounds = array<i64: 1>, scalar_prefetch = 0 : i64, scratch_operands = 0 : i64, tpu.core_type = #tpu.core_type<tc>, window_params = [{transform_indices = @transform_0, window_bounds = array<i64: 1, 5, 2, 256>}, {transform_indices = @transform_1, window_bounds = array<i64: 1, 128, 256>}, {transform_indices = @transform_2, window_bounds = array<i64: 1, 5, 2, 128>}]} {
    %c0 = arith.constant 0 : index
    %c0_0 = arith.constant 0 : index
    %c0_1 = arith.constant 0 : index
    %0 = vector.load %arg2[%c0, %c0_0, %c0_1] : memref<1x128x256xf32, #tpu.memory_space<vmem>>, vector<1x128x256xf32>
    %1 = vector.shape_cast %0 : vector<1x128x256xf32> to vector<128x256xf32>
    %cst = arith.constant 0.000000e+00 : f32
    %2 = vector.broadcast %cst : f32 to vector<2x64xf32>
    %cst_2 = arith.constant 0.000000e+00 : f32
    %3 = vector.broadcast %cst_2 : f32 to vector<2x128xf32>
    %cst_3 = arith.constant 0.000000e+00 : f32
    %4 = vector.broadcast %cst_3 : f32 to vector<2x64xf32>
    %c0_i32 = arith.constant 0 : i32
    %c0_4 = arith.constant 0 : index
    %5 = arith.index_cast %c0_i32 : i32 to index
    %c0_5 = arith.constant 0 : index
    %c0_6 = arith.constant 0 : index
    %6 = vector.load %arg1[%c0_4, %5, %c0_5, %c0_6] : memref<1x5x2x256xf32, #tpu.memory_space<vmem>>, vector<1x1x2x256xf32>
    %7 = vector.shape_cast %6 : vector<1x1x2x256xf32> to vector<2x256xf32>
    %cst_7 = arith.constant dense<0.000000e+00> : vector<2x256xf32>
    %8 = tpu.matmul %3, %1, %cst_7 {dimension_numbers = #tpu.dot_dimension_numbers<[1], [0], [0], [1], [0, 0, 1, 1], [], []>} : vector<2x128xf32>, vector<128x256xf32>, vector<2x256xf32> -> vector<2x256xf32>
    %9 = arith.addf %7, %8 : vector<2x256xf32>
    %10 = arith.negf %9 : vector<2x256xf32>
    %11 = math.exp %10 : vector<2x256xf32>
    %cst_8 = arith.constant 1.000000e+00 : f32
    %12 = vector.broadcast %cst_8 : f32 to vector<2x256xf32>
    %13 = arith.addf %12, %11 : vector<2x256xf32>
    %14 = arith.divf %12, %13 : vector<2x256xf32>
    %15 = math.tanh %9 : vector<2x256xf32>
    %16 = vector.extract_strided_slice %14 {offsets = [0, 0], sizes = [2, 64], strides = [1, 1]} : vector<2x256xf32> to vector<2x64xf32>
    %17 = vector.extract_strided_slice %14 {offsets = [0, 64], sizes = [2, 64], strides = [1, 1]} : vector<2x256xf32> to vector<2x64xf32>
    %18 = vector.extract_strided_slice %15 {offsets = [0, 128], sizes = [2, 64], strides = [1, 1]} : vector<2x256xf32> to vector<2x64xf32>
    %19 = vector.extract_strided_slice %14 {offsets = [0, 192], sizes = [2, 64], strides = [1, 1]} : vector<2x256xf32> to vector<2x64xf32>
    %20 = arith.mulf %17, %4 : vector<2x64xf32>
    %21 = arith.mulf %16, %18 : vector<2x64xf32>
    %22 = arith.addf %20, %21 : vector<2x64xf32>
    %23 = math.tanh %22 : vector<2x64xf32>
    %24 = arith.mulf %19, %23 : vector<2x64xf32>
    %25 = tpu.concatenate %24, %2 in 1 : vector<2x64xf32>, vector<2x64xf32> -> vector<2x128xf32>
    %c0_9 = arith.constant 0 : index
    %26 = arith.index_cast %c0_i32 : i32 to index
    %c0_10 = arith.constant 0 : index
    %c0_11 = arith.constant 0 : index
    %27 = vector.load %arg3[%c0_9, %26, %c0_10, %c0_11] : memref<1x5x2x128xf32, #tpu.memory_space<vmem>>, vector<1x1x2x128xf32>
    %28 = vector.shape_cast %27 : vector<1x1x2x128xf32> to vector<2x128xf32>
    %29 = vector.shape_cast %25 : vector<2x128xf32> to vector<1x1x2x128xf32>
    tpu.vector_store %arg3[%c0_9, %26, %c0_10, %c0_11], %29 {strides = array<i32>} : memref<1x5x2x128xf32, #tpu.memory_space<vmem>>, vector<1x1x2x128xf32>,
    %c1_i32 = arith.constant 1 : i32
    %c0_12 = arith.constant 0 : index
    %30 = arith.index_cast %c1_i32 : i32 to index
    %c0_13 = arith.constant 0 : index
    %c0_14 = arith.constant 0 : index
    %31 = vector.load %arg1[%c0_12, %30, %c0_13, %c0_14] : memref<1x5x2x256xf32, #tpu.memory_space<vmem>>, vector<1x1x2x256xf32>
    %32 = vector.shape_cast %31 : vector<1x1x2x256xf32> to vector<2x256xf32>
    %cst_15 = arith.constant dense<0.000000e+00> : vector<2x256xf32>
    %33 = tpu.matmul %25, %1, %cst_15 {dimension_numbers = #tpu.dot_dimension_numbers<[1], [0], [0], [1], [0, 0, 1, 1], [], []>} : vector<2x128xf32>, vector<128x256xf32>, vector<2x256xf32> -> vector<2x256xf32>
    %34 = arith.addf %32, %33 : vector<2x256xf32>
    %35 = arith.negf %34 : vector<2x256xf32>
    %36 = math.exp %35 : vector<2x256xf32>
    %cst_16 = arith.constant 1.000000e+00 : f32
    %37 = vector.broadcast %cst_16 : f32 to vector<2x256xf32>
    %38 = arith.addf %37, %36 : vector<2x256xf32>
    %39 = arith.divf %37, %38 : vector<2x256xf32>
    %40 = math.tanh %34 : vector<2x256xf32>
    %41 = vector.extract_strided_slice %39 {offsets = [0, 0], sizes = [2, 64], strides = [1, 1]} : vector<2x256xf32> to vector<2x64xf32>
    %42 = vector.extract_strided_slice %39 {offsets = [0, 64], sizes = [2, 64], strides = [1, 1]} : vector<2x256xf32> to vector<2x64xf32>
    %43 = vector.extract_strided_slice %40 {offsets = [0, 128], sizes = [2, 64], strides = [1, 1]} : vector<2x256xf32> to vector<2x64xf32>
    %44 = vector.extract_strided_slice %39 {offsets = [0, 192], sizes = [2, 64], strides = [1, 1]} : vector<2x256xf32> to vector<2x64xf32>
    %45 = arith.mulf %42, %22 : vector<2x64xf32>
    %46 = arith.mulf %41, %43 : vector<2x64xf32>
    %47 = arith.addf %45, %46 : vector<2x64xf32>
    %48 = math.tanh %47 : vector<2x64xf32>
    %49 = arith.mulf %44, %48 : vector<2x64xf32>
    %50 = tpu.concatenate %49, %2 in 1 : vector<2x64xf32>, vector<2x64xf32> -> vector<2x128xf32>
    %c0_17 = arith.constant 0 : index
    %51 = arith.index_cast %c1_i32 : i32 to index
    %c0_18 = arith.constant 0 : index
    %c0_19 = arith.constant 0 : index
    %52 = vector.load %arg3[%c0_17, %51, %c0_18, %c0_19] : memref<1x5x2x128xf32, #tpu.memory_space<vmem>>, vector<1x1x2x128xf32>
    %53 = vector.shape_cast %52 : vector<1x1x2x128xf32> to vector<2x128xf32>
    %54 = vector.shape_cast %50 : vector<2x128xf32> to vector<1x1x2x128xf32>
    tpu.vector_store %arg3[%c0_17, %51, %c0_18, %c0_19], %54 {strides = array<i32>} : memref<1x5x2x128xf32, #tpu.memory_space<vmem>>, vector<1x1x2x128xf32>,
    %c2_i32 = arith.constant 2 : i32
    %c0_20 = arith.constant 0 : index
    %55 = arith.index_cast %c2_i32 : i32 to index
    %c0_21 = arith.constant 0 : index
    %c0_22 = arith.constant 0 : index
    %56 = vector.load %arg1[%c0_20, %55, %c0_21, %c0_22] : memref<1x5x2x256xf32, #tpu.memory_space<vmem>>, vector<1x1x2x256xf32>
    %57 = vector.shape_cast %56 : vector<1x1x2x256xf32> to vector<2x256xf32>
    %cst_23 = arith.constant dense<0.000000e+00> : vector<2x256xf32>
    %58 = tpu.matmul %50, %1, %cst_23 {dimension_numbers = #tpu.dot_dimension_numbers<[1], [0], [0], [1], [0, 0, 1, 1], [], []>} : vector<2x128xf32>, vector<128x256xf32>, vector<2x256xf32> -> vector<2x256xf32>
    %59 = arith.addf %57, %58 : vector<2x256xf32>
    %60 = arith.negf %59 : vector<2x256xf32>
    %61 = math.exp %60 : vector<2x256xf32>
    %cst_24 = arith.constant 1.000000e+00 : f32
    %62 = vector.broadcast %cst_24 : f32 to vector<2x256xf32>
    %63 = arith.addf %62, %61 : vector<2x256xf32>
    %64 = arith.divf %62, %63 : vector<2x256xf32>
    %65 = math.tanh %59 : vector<2x256xf32>
    %66 = vector.extract_strided_slice %64 {offsets = [0, 0], sizes = [2, 64], strides = [1, 1]} : vector<2x256xf32> to vector<2x64xf32>
    %67 = vector.extract_strided_slice %64 {offsets = [0, 64], sizes = [2, 64], strides = [1, 1]} : vector<2x256xf32> to vector<2x64xf32>
    %68 = vector.extract_strided_slice %65 {offsets = [0, 128], sizes = [2, 64], strides = [1, 1]} : vector<2x256xf32> to vector<2x64xf32>
    %69 = vector.extract_strided_slice %64 {offsets = [0, 192], sizes = [2, 64], strides = [1, 1]} : vector<2x256xf32> to vector<2x64xf32>
    %70 = arith.mulf %67, %47 : vector<2x64xf32>
    %71 = arith.mulf %66, %68 : vector<2x64xf32>
    %72 = arith.addf %70, %71 : vector<2x64xf32>
    %73 = math.tanh %72 : vector<2x64xf32>
    %74 = arith.mulf %69, %73 : vector<2x64xf32>
    %75 = tpu.concatenate %74, %2 in 1 : vector<2x64xf32>, vector<2x64xf32> -> vector<2x128xf32>
    %c0_25 = arith.constant 0 : index
    %76 = arith.index_cast %c2_i32 : i32 to index
    %c0_26 = arith.constant 0 : index
    %c0_27 = arith.constant 0 : index
    %77 = vector.load %arg3[%c0_25, %76, %c0_26, %c0_27] : memref<1x5x2x128xf32, #tpu.memory_space<vmem>>, vector<1x1x2x128xf32>
    %78 = vector.shape_cast %77 : vector<1x1x2x128xf32> to vector<2x128xf32>
    %79 = vector.shape_cast %75 : vector<2x128xf32> to vector<1x1x2x128xf32>
    tpu.vector_store %arg3[%c0_25, %76, %c0_26, %c0_27], %79 {strides = array<i32>} : memref<1x5x2x128xf32, #tpu.memory_space<vmem>>, vector<1x1x2x128xf32>,
    %c3_i32 = arith.constant 3 : i32
    %c0_28 = arith.constant 0 : index
    %80 = arith.index_cast %c3_i32 : i32 to index
    %c0_29 = arith.constant 0 : index
    %c0_30 = arith.constant 0 : index
    %81 = vector.load %arg1[%c0_28, %80, %c0_29, %c0_30] : memref<1x5x2x256xf32, #tpu.memory_space<vmem>>, vector<1x1x2x256xf32>
    %82 = vector.shape_cast %81 : vector<1x1x2x256xf32> to vector<2x256xf32>
    %cst_31 = arith.constant dense<0.000000e+00> : vector<2x256xf32>
    %83 = tpu.matmul %75, %1, %cst_31 {dimension_numbers = #tpu.dot_dimension_numbers<[1], [0], [0], [1], [0, 0, 1, 1], [], []>} : vector<2x128xf32>, vector<128x256xf32>, vector<2x256xf32> -> vector<2x256xf32>
    %84 = arith.addf %82, %83 : vector<2x256xf32>
    %85 = arith.negf %84 : vector<2x256xf32>
    %86 = math.exp %85 : vector<2x256xf32>
    %cst_32 = arith.constant 1.000000e+00 : f32
    %87 = vector.broadcast %cst_32 : f32 to vector<2x256xf32>
    %88 = arith.addf %87, %86 : vector<2x256xf32>
    %89 = arith.divf %87, %88 : vector<2x256xf32>
    %90 = math.tanh %84 : vector<2x256xf32>
    %91 = vector.extract_strided_slice %89 {offsets = [0, 0], sizes = [2, 64], strides = [1, 1]} : vector<2x256xf32> to vector<2x64xf32>
    %92 = vector.extract_strided_slice %89 {offsets = [0, 64], sizes = [2, 64], strides = [1, 1]} : vector<2x256xf32> to vector<2x64xf32>
    %93 = vector.extract_strided_slice %90 {offsets = [0, 128], sizes = [2, 64], strides = [1, 1]} : vector<2x256xf32> to vector<2x64xf32>
    %94 = vector.extract_strided_slice %89 {offsets = [0, 192], sizes = [2, 64], strides = [1, 1]} : vector<2x256xf32> to vector<2x64xf32>
    %95 = arith.mulf %92, %72 : vector<2x64xf32>
    %96 = arith.mulf %91, %93 : vector<2x64xf32>
    %97 = arith.addf %95, %96 : vector<2x64xf32>
    %98 = math.tanh %97 : vector<2x64xf32>
    %99 = arith.mulf %94, %98 : vector<2x64xf32>
    %100 = tpu.concatenate %99, %2 in 1 : vector<2x64xf32>, vector<2x64xf32> -> vector<2x128xf32>
    %c0_33 = arith.constant 0 : index
    %101 = arith.index_cast %c3_i32 : i32 to index
    %c0_34 = arith.constant 0 : index
    %c0_35 = arith.constant 0 : index
    %102 = vector.load %arg3[%c0_33, %101, %c0_34, %c0_35] : memref<1x5x2x128xf32, #tpu.memory_space<vmem>>, vector<1x1x2x128xf32>
    %103 = vector.shape_cast %102 : vector<1x1x2x128xf32> to vector<2x128xf32>
    %104 = vector.shape_cast %100 : vector<2x128xf32> to vector<1x1x2x128xf32>
    tpu.vector_store %arg3[%c0_33, %101, %c0_34, %c0_35], %104 {strides = array<i32>} : memref<1x5x2x128xf32, #tpu.memory_space<vmem>>, vector<1x1x2x128xf32>,
    %c4_i32 = arith.constant 4 : i32
    %c0_36 = arith.constant 0 : index
    %105 = arith.index_cast %c4_i32 : i32 to index
    %c0_37 = arith.constant 0 : index
    %c0_38 = arith.constant 0 : index
    %106 = vector.load %arg1[%c0_36, %105, %c0_37, %c0_38] : memref<1x5x2x256xf32, #tpu.memory_space<vmem>>, vector<1x1x2x256xf32>
    %107 = vector.shape_cast %106 : vector<1x1x2x256xf32> to vector<2x256xf32>
    %cst_39 = arith.constant dense<0.000000e+00> : vector<2x256xf32>
    %108 = tpu.matmul %100, %1, %cst_39 {dimension_numbers = #tpu.dot_dimension_numbers<[1], [0], [0], [1], [0, 0, 1, 1], [], []>} : vector<2x128xf32>, vector<128x256xf32>, vector<2x256xf32> -> vector<2x256xf32>
    %109 = arith.addf %107, %108 : vector<2x256xf32>
    %110 = arith.negf %109 : vector<2x256xf32>
    %111 = math.exp %110 : vector<2x256xf32>
    %cst_40 = arith.constant 1.000000e+00 : f32
    %112 = vector.broadcast %cst_40 : f32 to vector<2x256xf32>
    %113 = arith.addf %112, %111 : vector<2x256xf32>
    %114 = arith.divf %112, %113 : vector<2x256xf32>
    %115 = math.tanh %109 : vector<2x256xf32>
    %116 = vector.extract_strided_slice %114 {offsets = [0, 0], sizes = [2, 64], strides = [1, 1]} : vector<2x256xf32> to vector<2x64xf32>
    %117 = vector.extract_strided_slice %114 {offsets = [0, 64], sizes = [2, 64], strides = [1, 1]} : vector<2x256xf32> to vector<2x64xf32>
    %118 = vector.extract_strided_slice %115 {offsets = [0, 128], sizes = [2, 64], strides = [1, 1]} : vector<2x256xf32> to vector<2x64xf32>
    %119 = vector.extract_strided_slice %114 {offsets = [0, 192], sizes = [2, 64], strides = [1, 1]} : vector<2x256xf32> to vector<2x64xf32>
    %120 = arith.mulf %117, %97 : vector<2x64xf32>
    %121 = arith.mulf %116, %118 : vector<2x64xf32>
    %122 = arith.addf %120, %121 : vector<2x64xf32>
    %123 = math.tanh %122 : vector<2x64xf32>
    %124 = arith.mulf %119, %123 : vector<2x64xf32>
    %125 = tpu.concatenate %124, %2 in 1 : vector<2x64xf32>, vector<2x64xf32> -> vector<2x128xf32>
    %c0_41 = arith.constant 0 : index
    %126 = arith.index_cast %c4_i32 : i32 to index
    %c0_42 = arith.constant 0 : index
    %c0_43 = arith.constant 0 : index
    %127 = vector.load %arg3[%c0_41, %126, %c0_42, %c0_43] : memref<1x5x2x128xf32, #tpu.memory_space<vmem>>, vector<1x1x2x128xf32>
    %128 = vector.shape_cast %127 : vector<1x1x2x128xf32> to vector<2x128xf32>
    %129 = vector.shape_cast %125 : vector<2x128xf32> to vector<1x1x2x128xf32>
    tpu.vector_store %arg3[%c0_41, %126, %c0_42, %c0_43], %129 {strides = array<i32>} : memref<1x5x2x128xf32, #tpu.memory_space<vmem>>, vector<1x1x2x128xf32>,
    %c5_i32 = arith.constant 5 : i32
    return
  }
  func.func @transform_0(%arg0: i32) -> (i32, i32, i32, i32) {
    %c0_i32 = arith.constant 0 : i32
    %c0_i32_0 = arith.constant 0 : i32
    %c0_i32_1 = arith.constant 0 : i32
    %c0_i32_2 = arith.constant 0 : i32
    return %arg0, %c0_i32, %c0_i32_0, %c0_i32_1 : i32, i32, i32, i32
  }
  func.func @transform_1(%arg0: i32) -> (i32, i32, i32) {
    %c0_i32 = arith.constant 0 : i32
    %c0_i32_0 = arith.constant 0 : i32
    %c0_i32_1 = arith.constant 0 : i32
    return %arg0, %c0_i32, %c0_i32_0 : i32, i32, i32
  }
  func.func @transform_2(%arg0: i32) -> (i32, i32, i32, i32) {
    %c0_i32 = arith.constant 0 : i32
    %c0_i32_0 = arith.constant 0 : i32
    %c0_i32_1 = arith.constant 0 : i32
    %c0_i32_2 = arith.constant 0 : i32
    return %arg0, %c0_i32, %c0_i32_0, %c0_i32_1 : i32, i32, i32, i32
  }
}

module attributes {stable_mosaic.version = 11 : i64} {
  func.func @_feat_kernel(%arg0: i32, %arg1: memref<8x64xf32, #tpu.memory_space<vmem>>, %arg2: memref<8x16xf32, #tpu.memory_space<vmem>>, %arg3: memref<8x9xf32, #tpu.memory_space<vmem>>, %arg4: memref<16x32xbf16, #tpu.memory_space<vmem>>, %arg5: memref<9x32xbf16, #tpu.memory_space<vmem>>, %arg6: memref<1x32xf32, #tpu.memory_space<vmem>>, %arg7: memref<32x128xbf16, #tpu.memory_space<vmem>>, %arg8: memref<1x128xf32, #tpu.memory_space<vmem>>, %arg9: memref<64x512xbf16, #tpu.memory_space<vmem>>, %arg10: memref<32x512xbf16, #tpu.memory_space<vmem>>, %arg11: memref<128x512xbf16, #tpu.memory_space<vmem>>, %arg12: memref<1x512xf32, #tpu.memory_space<vmem>>, %arg13: memref<8x512xf32, #tpu.memory_space<vmem>>) attributes {dimension_semantics = [#tpu.dimension_semantics<parallel>], iteration_bounds = array<i64: 1>, scalar_prefetch = 0 : i64, scratch_operands = 0 : i64, tpu.core_type = #tpu.core_type<tc>, window_params = [{transform_indices = @transform_0, window_bounds = array<i64: 8, 64>}, {transform_indices = @transform_1, window_bounds = array<i64: 8, 16>}, {transform_indices = @transform_2, window_bounds = array<i64: 8, 9>}, {pipeline_mode = #tpu.pipeline_mode<synchronous>, transform_indices = @transform_3, window_bounds = array<i64: 16, 32>}, {pipeline_mode = #tpu.pipeline_mode<synchronous>, transform_indices = @transform_4, window_bounds = array<i64: 9, 32>}, {pipeline_mode = #tpu.pipeline_mode<synchronous>, transform_indices = @transform_5, window_bounds = array<i64: 1, 32>}, {pipeline_mode = #tpu.pipeline_mode<synchronous>, transform_indices = @transform_6, window_bounds = array<i64: 32, 128>}, {pipeline_mode = #tpu.pipeline_mode<synchronous>, transform_indices = @transform_7, window_bounds = array<i64: 1, 128>}, {pipeline_mode = #tpu.pipeline_mode<synchronous>, transform_indices = @transform_8, window_bounds = array<i64: 64, 512>}, {pipeline_mode = #tpu.pipeline_mode<synchronous>, transform_indices = @transform_9, window_bounds = array<i64: 32, 512>}, {pipeline_mode = #tpu.pipeline_mode<synchronous>, transform_indices = @transform_10, window_bounds = array<i64: 128, 512>}, {pipeline_mode = #tpu.pipeline_mode<synchronous>, transform_indices = @transform_11, window_bounds = array<i64: 1, 512>}, {transform_indices = @transform_12, window_bounds = array<i64: 8, 512>}]} {
    %c0 = arith.constant 0 : index
    %c0_0 = arith.constant 0 : index
    %0 = vector.load %arg2[%c0, %c0_0] : memref<8x16xf32, #tpu.memory_space<vmem>>, vector<8x16xf32>
    %cst = arith.constant dense<0xFF800000> : vector<8xf32>
    %1 = vector.multi_reduction <maximumf>, %0, %cst [1] : vector<8x16xf32> to vector<8xf32>
    %2 = vector.shape_cast %1 : vector<8xf32> to vector<8x1xf32>
    %3 = vector.broadcast %2 : vector<8x1xf32> to vector<8x16xf32>
    %4 = arith.subf %0, %3 : vector<8x16xf32>
    %5 = math.exp %4 : vector<8x16xf32>
    %cst_1 = arith.constant dense<0.000000e+00> : vector<8xf32>
    %6 = vector.multi_reduction <add>, %5, %cst_1 [1] : vector<8x16xf32> to vector<8xf32>
    %7 = vector.shape_cast %6 : vector<8xf32> to vector<8x1xf32>
    %8 = vector.broadcast %7 : vector<8x1xf32> to vector<8x16xf32>
    %9 = arith.divf %5, %8 : vector<8x16xf32>
    %10 = arith.truncf %9 : vector<8x16xf32> to vector<8x16xbf16>
    %c0_2 = arith.constant 0 : index
    %c0_3 = arith.constant 0 : index
    %11 = vector.load %arg4[%c0_2, %c0_3] : memref<16x32xbf16, #tpu.memory_space<vmem>>, vector<16x32xbf16>
    %cst_4 = arith.constant dense<0.000000e+00> : vector<8x32xf32>
    %12 = tpu.matmul %10, %11, %cst_4 {dimension_numbers = #tpu.dot_dimension_numbers<[1], [0], [0], [1], [0, 0, 1, 1], [], []>} : vector<8x16xbf16>, vector<16x32xbf16>, vector<8x32xf32> -> vector<8x32xf32>
    %c0_5 = arith.constant 0 : index
    %c0_6 = arith.constant 0 : index
    %13 = vector.load %arg3[%c0_5, %c0_6] : memref<8x9xf32, #tpu.memory_space<vmem>>, vector<8x9xf32>
    %14 = arith.truncf %13 : vector<8x9xf32> to vector<8x9xbf16>
    %c0_7 = arith.constant 0 : index
    %c0_8 = arith.constant 0 : index
    %15 = vector.load %arg5[%c0_7, %c0_8] : memref<9x32xbf16, #tpu.memory_space<vmem>>, vector<9x32xbf16>
    %cst_9 = arith.constant dense<0.000000e+00> : vector<8x32xf32>
    %16 = tpu.matmul %14, %15, %cst_9 {dimension_numbers = #tpu.dot_dimension_numbers<[1], [0], [0], [1], [0, 0, 1, 1], [], []>} : vector<8x9xbf16>, vector<9x32xbf16>, vector<8x32xf32> -> vector<8x32xf32>
    %c0_10 = arith.constant 0 : index
    %c0_11 = arith.constant 0 : index
    %17 = vector.load %arg6[%c0_10, %c0_11] : memref<1x32xf32, #tpu.memory_space<vmem>>, vector<1x32xf32>
    %18 = vector.broadcast %17 : vector<1x32xf32> to vector<8x32xf32>
    %19 = arith.addf %16, %18 : vector<8x32xf32>
    %20 = arith.truncf %19 : vector<8x32xf32> to vector<8x32xbf16>
    %c0_12 = arith.constant 0 : index
    %c0_13 = arith.constant 0 : index
    %21 = vector.load %arg7[%c0_12, %c0_13] : memref<32x128xbf16, #tpu.memory_space<vmem>>, vector<32x128xbf16>
    %cst_14 = arith.constant dense<0.000000e+00> : vector<8x128xf32>
    %22 = tpu.matmul %20, %21, %cst_14 {dimension_numbers = #tpu.dot_dimension_numbers<[1], [0], [0], [1], [0, 0, 1, 1], [], []>} : vector<8x32xbf16>, vector<32x128xbf16>, vector<8x128xf32> -> vector<8x128xf32>
    %c0_15 = arith.constant 0 : index
    %c0_16 = arith.constant 0 : index
    %23 = vector.load %arg8[%c0_15, %c0_16] : memref<1x128xf32, #tpu.memory_space<vmem>>, vector<1x128xf32>
    %24 = vector.broadcast %23 : vector<1x128xf32> to vector<8x128xf32>
    %25 = arith.addf %22, %24 : vector<8x128xf32>
    %cst_17 = arith.constant 0.000000e+00 : f32
    %26 = vector.broadcast %cst_17 : f32 to vector<8x128xf32>
    %27 = arith.maximumf %25, %26 : vector<8x128xf32>
    %c0_18 = arith.constant 0 : index
    %c0_19 = arith.constant 0 : index
    %28 = vector.load %arg1[%c0_18, %c0_19] : memref<8x64xf32, #tpu.memory_space<vmem>>, vector<8x64xf32>
    %29 = arith.truncf %28 : vector<8x64xf32> to vector<8x64xbf16>
    %c0_20 = arith.constant 0 : index
    %c0_21 = arith.constant 0 : index
    %30 = vector.load %arg9[%c0_20, %c0_21] : memref<64x512xbf16, #tpu.memory_space<vmem>>, vector<64x512xbf16>
    %cst_22 = arith.constant dense<0.000000e+00> : vector<8x512xf32>
    %31 = tpu.matmul %29, %30, %cst_22 {dimension_numbers = #tpu.dot_dimension_numbers<[1], [0], [0], [1], [0, 0, 1, 1], [], []>} : vector<8x64xbf16>, vector<64x512xbf16>, vector<8x512xf32> -> vector<8x512xf32>
    %32 = arith.truncf %12 : vector<8x32xf32> to vector<8x32xbf16>
    %c0_23 = arith.constant 0 : index
    %c0_24 = arith.constant 0 : index
    %33 = vector.load %arg10[%c0_23, %c0_24] : memref<32x512xbf16, #tpu.memory_space<vmem>>, vector<32x512xbf16>
    %cst_25 = arith.constant dense<0.000000e+00> : vector<8x512xf32>
    %34 = tpu.matmul %32, %33, %cst_25 {dimension_numbers = #tpu.dot_dimension_numbers<[1], [0], [0], [1], [0, 0, 1, 1], [], []>} : vector<8x32xbf16>, vector<32x512xbf16>, vector<8x512xf32> -> vector<8x512xf32>
    %35 = arith.addf %31, %34 : vector<8x512xf32>
    %36 = arith.truncf %27 : vector<8x128xf32> to vector<8x128xbf16>
    %c0_26 = arith.constant 0 : index
    %c0_27 = arith.constant 0 : index
    %37 = vector.load %arg11[%c0_26, %c0_27] : memref<128x512xbf16, #tpu.memory_space<vmem>>, vector<128x512xbf16>
    %cst_28 = arith.constant dense<0.000000e+00> : vector<8x512xf32>
    %38 = tpu.matmul %36, %37, %cst_28 {dimension_numbers = #tpu.dot_dimension_numbers<[1], [0], [0], [1], [0, 0, 1, 1], [], []>} : vector<8x128xbf16>, vector<128x512xbf16>, vector<8x512xf32> -> vector<8x512xf32>
    %39 = arith.addf %35, %38 : vector<8x512xf32>
    %c0_29 = arith.constant 0 : index
    %c0_30 = arith.constant 0 : index
    %40 = vector.load %arg12[%c0_29, %c0_30] : memref<1x512xf32, #tpu.memory_space<vmem>>, vector<1x512xf32>
    %41 = vector.broadcast %40 : vector<1x512xf32> to vector<8x512xf32>
    %42 = arith.addf %39, %41 : vector<8x512xf32>
    %c0_31 = arith.constant 0 : index
    %c0_32 = arith.constant 0 : index
    %43 = vector.load %arg13[%c0_31, %c0_32] : memref<8x512xf32, #tpu.memory_space<vmem>>, vector<8x512xf32>
    tpu.vector_store %arg13[%c0_31, %c0_32], %42 {strides = array<i32>} : memref<8x512xf32, #tpu.memory_space<vmem>>, vector<8x512xf32>,
    return
  }
  func.func @transform_0(%arg0: i32) -> (i32, i32) {
    %c0_i32 = arith.constant 0 : i32
    %c0_i32_0 = arith.constant 0 : i32
    return %arg0, %c0_i32 : i32, i32
  }
  func.func @transform_1(%arg0: i32) -> (i32, i32) {
    %c0_i32 = arith.constant 0 : i32
    %c0_i32_0 = arith.constant 0 : i32
    return %arg0, %c0_i32 : i32, i32
  }
  func.func @transform_2(%arg0: i32) -> (i32, i32) {
    %c0_i32 = arith.constant 0 : i32
    %c0_i32_0 = arith.constant 0 : i32
    return %arg0, %c0_i32 : i32, i32
  }
  func.func @transform_3(%arg0: i32) -> (i32, i32) {
    %c0_i32 = arith.constant 0 : i32
    %c0_i32_0 = arith.constant 0 : i32
    %c0_i32_1 = arith.constant 0 : i32
    return %c0_i32, %c0_i32_0 : i32, i32
  }
  func.func @transform_4(%arg0: i32) -> (i32, i32) {
    %c0_i32 = arith.constant 0 : i32
    %c0_i32_0 = arith.constant 0 : i32
    %c0_i32_1 = arith.constant 0 : i32
    return %c0_i32, %c0_i32_0 : i32, i32
  }
  func.func @transform_5(%arg0: i32) -> (i32, i32) {
    %c0_i32 = arith.constant 0 : i32
    %c0_i32_0 = arith.constant 0 : i32
    %c0_i32_1 = arith.constant 0 : i32
    return %c0_i32, %c0_i32_0 : i32, i32
  }
  func.func @transform_6(%arg0: i32) -> (i32, i32) {
    %c0_i32 = arith.constant 0 : i32
    %c0_i32_0 = arith.constant 0 : i32
    %c0_i32_1 = arith.constant 0 : i32
    return %c0_i32, %c0_i32_0 : i32, i32
  }
  func.func @transform_7(%arg0: i32) -> (i32, i32) {
    %c0_i32 = arith.constant 0 : i32
    %c0_i32_0 = arith.constant 0 : i32
    %c0_i32_1 = arith.constant 0 : i32
    return %c0_i32, %c0_i32_0 : i32, i32
  }
  func.func @transform_8(%arg0: i32) -> (i32, i32) {
    %c0_i32 = arith.constant 0 : i32
    %c0_i32_0 = arith.constant 0 : i32
    %c0_i32_1 = arith.constant 0 : i32
    return %c0_i32, %c0_i32_0 : i32, i32
  }
  func.func @transform_9(%arg0: i32) -> (i32, i32) {
    %c0_i32 = arith.constant 0 : i32
    %c0_i32_0 = arith.constant 0 : i32
    %c0_i32_1 = arith.constant 0 : i32
    return %c0_i32, %c0_i32_0 : i32, i32
  }
  func.func @transform_10(%arg0: i32) -> (i32, i32) {
    %c0_i32 = arith.constant 0 : i32
    %c0_i32_0 = arith.constant 0 : i32
    %c0_i32_1 = arith.constant 0 : i32
    return %c0_i32, %c0_i32_0 : i32, i32
  }
  func.func @transform_11(%arg0: i32) -> (i32, i32) {
    %c0_i32 = arith.constant 0 : i32
    %c0_i32_0 = arith.constant 0 : i32
    %c0_i32_1 = arith.constant 0 : i32
    return %c0_i32, %c0_i32_0 : i32, i32
  }
  func.func @transform_12(%arg0: i32) -> (i32, i32) {
    %c0_i32 = arith.constant 0 : i32
    %c0_i32_0 = arith.constant 0 : i32
    return %arg0, %c0_i32 : i32, i32
  }
}

module attributes {stable_mosaic.version = 11 : i64} {
  func.func @_obj_proj_kernel(%arg0: i32, %arg1: memref<8x32xf32, #tpu.memory_space<vmem>>, %arg2: memref<8x32xf32, #tpu.memory_space<vmem>>, %arg3: memref<8x192xf32, #tpu.memory_space<vmem>>, %arg4: memref<32x128xbf16, #tpu.memory_space<vmem>>, %arg5: memref<32x128xbf16, #tpu.memory_space<vmem>>, %arg6: memref<1x128xf32, #tpu.memory_space<vmem>>, %arg7: memref<128x192xbf16, #tpu.memory_space<vmem>>, %arg8: memref<8x128xf32, #tpu.memory_space<vmem>>, %arg9: memref<8x192xf32, #tpu.memory_space<vmem>>) attributes {dimension_semantics = [#tpu.dimension_semantics<parallel>], iteration_bounds = array<i64: 1>, scalar_prefetch = 0 : i64, scratch_operands = 0 : i64, tpu.core_type = #tpu.core_type<tc>, window_params = [{transform_indices = @transform_0, window_bounds = array<i64: 8, 32>}, {transform_indices = @transform_1, window_bounds = array<i64: 8, 32>}, {transform_indices = @transform_2, window_bounds = array<i64: 8, 192>}, {pipeline_mode = #tpu.pipeline_mode<synchronous>, transform_indices = @transform_3, window_bounds = array<i64: 32, 128>}, {pipeline_mode = #tpu.pipeline_mode<synchronous>, transform_indices = @transform_4, window_bounds = array<i64: 32, 128>}, {pipeline_mode = #tpu.pipeline_mode<synchronous>, transform_indices = @transform_5, window_bounds = array<i64: 1, 128>}, {pipeline_mode = #tpu.pipeline_mode<synchronous>, transform_indices = @transform_6, window_bounds = array<i64: 128, 192>}, {transform_indices = @transform_7, window_bounds = array<i64: 8, 128>}, {transform_indices = @transform_8, window_bounds = array<i64: 8, 192>}]} {
    %c0 = arith.constant 0 : index
    %c0_0 = arith.constant 0 : index
    %0 = vector.load %arg1[%c0, %c0_0] : memref<8x32xf32, #tpu.memory_space<vmem>>, vector<8x32xf32>
    %1 = arith.truncf %0 : vector<8x32xf32> to vector<8x32xbf16>
    %c0_1 = arith.constant 0 : index
    %c0_2 = arith.constant 0 : index
    %2 = vector.load %arg4[%c0_1, %c0_2] : memref<32x128xbf16, #tpu.memory_space<vmem>>, vector<32x128xbf16>
    %cst = arith.constant dense<0.000000e+00> : vector<8x128xf32>
    %3 = tpu.matmul %1, %2, %cst {dimension_numbers = #tpu.dot_dimension_numbers<[1], [0], [0], [1], [0, 0, 1, 1], [], []>} : vector<8x32xbf16>, vector<32x128xbf16>, vector<8x128xf32> -> vector<8x128xf32>
    %c0_3 = arith.constant 0 : index
    %c0_4 = arith.constant 0 : index
    %4 = vector.load %arg2[%c0_3, %c0_4] : memref<8x32xf32, #tpu.memory_space<vmem>>, vector<8x32xf32>
    %5 = arith.truncf %4 : vector<8x32xf32> to vector<8x32xbf16>
    %c0_5 = arith.constant 0 : index
    %c0_6 = arith.constant 0 : index
    %6 = vector.load %arg5[%c0_5, %c0_6] : memref<32x128xbf16, #tpu.memory_space<vmem>>, vector<32x128xbf16>
    %cst_7 = arith.constant dense<0.000000e+00> : vector<8x128xf32>
    %7 = tpu.matmul %5, %6, %cst_7 {dimension_numbers = #tpu.dot_dimension_numbers<[1], [0], [0], [1], [0, 0, 1, 1], [], []>} : vector<8x32xbf16>, vector<32x128xbf16>, vector<8x128xf32> -> vector<8x128xf32>
    %8 = arith.addf %3, %7 : vector<8x128xf32>
    %c0_8 = arith.constant 0 : index
    %c0_9 = arith.constant 0 : index
    %9 = vector.load %arg6[%c0_8, %c0_9] : memref<1x128xf32, #tpu.memory_space<vmem>>, vector<1x128xf32>
    %10 = vector.broadcast %9 : vector<1x128xf32> to vector<8x128xf32>
    %11 = arith.addf %8, %10 : vector<8x128xf32>
    %c0_10 = arith.constant 0 : index
    %c0_11 = arith.constant 0 : index
    %12 = vector.load %arg8[%c0_10, %c0_11] : memref<8x128xf32, #tpu.memory_space<vmem>>, vector<8x128xf32>
    tpu.vector_store %arg8[%c0_10, %c0_11], %11 {strides = array<i32>} : memref<8x128xf32, #tpu.memory_space<vmem>>, vector<8x128xf32>,
    %c0_12 = arith.constant 0 : index
    %c0_13 = arith.constant 0 : index
    %13 = vector.load %arg3[%c0_12, %c0_13] : memref<8x192xf32, #tpu.memory_space<vmem>>, vector<8x192xf32>
    %14 = arith.truncf %11 : vector<8x128xf32> to vector<8x128xbf16>
    %c0_14 = arith.constant 0 : index
    %c0_15 = arith.constant 0 : index
    %15 = vector.load %arg7[%c0_14, %c0_15] : memref<128x192xbf16, #tpu.memory_space<vmem>>, vector<128x192xbf16>
    %cst_16 = arith.constant dense<0.000000e+00> : vector<8x192xf32>
    %16 = tpu.matmul %14, %15, %cst_16 {dimension_numbers = #tpu.dot_dimension_numbers<[1], [0], [0], [1], [0, 0, 1, 1], [], []>} : vector<8x128xbf16>, vector<128x192xbf16>, vector<8x192xf32> -> vector<8x192xf32>
    %17 = arith.addf %13, %16 : vector<8x192xf32>
    %c0_17 = arith.constant 0 : index
    %c0_18 = arith.constant 0 : index
    %18 = vector.load %arg9[%c0_17, %c0_18] : memref<8x192xf32, #tpu.memory_space<vmem>>, vector<8x192xf32>
    tpu.vector_store %arg9[%c0_17, %c0_18], %17 {strides = array<i32>} : memref<8x192xf32, #tpu.memory_space<vmem>>, vector<8x192xf32>,
    return
  }
  func.func @transform_0(%arg0: i32) -> (i32, i32) {
    %c0_i32 = arith.constant 0 : i32
    %c0_i32_0 = arith.constant 0 : i32
    return %arg0, %c0_i32 : i32, i32
  }
  func.func @transform_1(%arg0: i32) -> (i32, i32) {
    %c0_i32 = arith.constant 0 : i32
    %c0_i32_0 = arith.constant 0 : i32
    return %arg0, %c0_i32 : i32, i32
  }
  func.func @transform_2(%arg0: i32) -> (i32, i32) {
    %c0_i32 = arith.constant 0 : i32
    %c0_i32_0 = arith.constant 0 : i32
    return %arg0, %c0_i32 : i32, i32
  }
  func.func @transform_3(%arg0: i32) -> (i32, i32) {
    %c0_i32 = arith.constant 0 : i32
    %c0_i32_0 = arith.constant 0 : i32
    %c0_i32_1 = arith.constant 0 : i32
    return %c0_i32, %c0_i32_0 : i32, i32
  }
  func.func @transform_4(%arg0: i32) -> (i32, i32) {
    %c0_i32 = arith.constant 0 : i32
    %c0_i32_0 = arith.constant 0 : i32
    %c0_i32_1 = arith.constant 0 : i32
    return %c0_i32, %c0_i32_0 : i32, i32
  }
  func.func @transform_5(%arg0: i32) -> (i32, i32) {
    %c0_i32 = arith.constant 0 : i32
    %c0_i32_0 = arith.constant 0 : i32
    %c0_i32_1 = arith.constant 0 : i32
    return %c0_i32, %c0_i32_0 : i32, i32
  }
  func.func @transform_6(%arg0: i32) -> (i32, i32) {
    %c0_i32 = arith.constant 0 : i32
    %c0_i32_0 = arith.constant 0 : i32
    %c0_i32_1 = arith.constant 0 : i32
    return %c0_i32, %c0_i32_0 : i32, i32
  }
  func.func @transform_7(%arg0: i32) -> (i32, i32) {
    %c0_i32 = arith.constant 0 : i32
    %c0_i32_0 = arith.constant 0 : i32
    return %arg0, %c0_i32 : i32, i32
  }
  func.func @transform_8(%arg0: i32) -> (i32, i32) {
    %c0_i32 = arith.constant 0 : i32
    %c0_i32_0 = arith.constant 0 : i32
    return %arg0, %c0_i32 : i32, i32
  }
}

module attributes {stable_mosaic.version = 11 : i64} {
  func.func @_decoder_kernel(%arg0: memref<5x2x192xf32, #tpu.memory_space<vmem>>, %arg1: memref<64x192xf32, #tpu.memory_space<vmem>>, %arg2: memref<32x128xf32, #tpu.memory_space<vmem>>, %arg3: memref<1x128xf32, #tpu.memory_space<vmem>>, %arg4: memref<5x2x128xf32, #tpu.memory_space<vmem>>) attributes {dimension_semantics = [], scalar_prefetch = 0 : i64, scratch_operands = 0 : i64, tpu.core_type = #tpu.core_type<tc>} {
    %c0 = arith.constant 0 : index
    %c0_0 = arith.constant 0 : index
    %0 = vector.load %arg1[%c0, %c0_0] : memref<64x192xf32, #tpu.memory_space<vmem>>, vector<64x192xf32>
    %c0_1 = arith.constant 0 : index
    %c0_2 = arith.constant 0 : index
    %1 = vector.load %arg2[%c0_1, %c0_2] : memref<32x128xf32, #tpu.memory_space<vmem>>, vector<32x128xf32>
    %c0_3 = arith.constant 0 : index
    %c0_4 = arith.constant 0 : index
    %2 = vector.load %arg3[%c0_3, %c0_4] : memref<1x128xf32, #tpu.memory_space<vmem>>, vector<1x128xf32>
    %3 = tpu.iota {dimensions = array<i32: 1>} : vector<2x128xi32>
    %c1_i32 = arith.constant 1 : i32
    %4 = vector.broadcast %c1_i32 : i32 to vector<2x128xi32>
    %5 = arith.cmpi sge, %3, %4 : vector<2x128xi32>
    %c16_i32 = arith.constant 16 : i32
    %6 = vector.broadcast %c16_i32 : i32 to vector<2x128xi32>
    %7 = arith.cmpi slt, %3, %6 : vector<2x128xi32>
    %8 = arith.andi %5, %7 : vector<2x128xi1>
    %9 = tpu.iota {dimensions = array<i32: 1>} : vector<2x32xi32>
    %c0_i32 = arith.constant 0 : i32
    %10 = vector.broadcast %c0_i32 : i32 to vector<2x32xi32>
    %11 = arith.cmpi eq, %9, %10 : vector<2x32xi32>
    %12 = arith.extui %11 : vector<2x32xi1> to vector<2x32xi32>
    %13 = arith.sitofp %12 : vector<2x32xi32> to vector<2x32xf32>
    %cst = arith.constant 0.000000e+00 : f32
    %14 = vector.broadcast %cst : f32 to vector<2x32xf32>
    %15 = tpu.concatenate %13, %14 in 1 : vector<2x32xf32>, vector<2x32xf32> -> vector<2x64xf32>
    %cst_5 = arith.constant 0.000000e+00 : f32
    %16 = vector.broadcast %cst_5 : f32 to vector<2x32xf32>
    %c0_i32_6 = arith.constant 0 : i32
    %17 = arith.index_cast %c0_i32_6 : i32 to index
    %c0_7 = arith.constant 0 : index
    %c0_8 = arith.constant 0 : index
    %18 = vector.load %arg0[%17, %c0_7, %c0_8] : memref<5x2x192xf32, #tpu.memory_space<vmem>>, vector<1x2x192xf32>
    %19 = vector.shape_cast %18 : vector<1x2x192xf32> to vector<2x192xf32>
    %cst_9 = arith.constant dense<0.000000e+00> : vector<2x192xf32>
    %20 = tpu.matmul %15, %0, %cst_9 {dimension_numbers = #tpu.dot_dimension_numbers<[1], [0], [0], [1], [0, 0, 1, 1], [], []>} : vector<2x64xf32>, vector<64x192xf32>, vector<2x192xf32> -> vector<2x192xf32>
    %21 = arith.addf %19, %20 : vector<2x192xf32>
    %22 = arith.negf %21 : vector<2x192xf32>
    %23 = math.exp %22 : vector<2x192xf32>
    %cst_10 = arith.constant 1.000000e+00 : f32
    %24 = vector.broadcast %cst_10 : f32 to vector<2x192xf32>
    %25 = arith.addf %24, %23 : vector<2x192xf32>
    %26 = arith.divf %24, %25 : vector<2x192xf32>
    %27 = math.tanh %21 : vector<2x192xf32>
    %28 = vector.extract_strided_slice %26 {offsets = [0, 0], sizes = [2, 32], strides = [1, 1]} : vector<2x192xf32> to vector<2x32xf32>
    %29 = vector.extract_strided_slice %26 {offsets = [0, 32], sizes = [2, 32], strides = [1, 1]} : vector<2x192xf32> to vector<2x32xf32>
    %30 = vector.extract_strided_slice %27 {offsets = [0, 64], sizes = [2, 32], strides = [1, 1]} : vector<2x192xf32> to vector<2x32xf32>
    %31 = vector.extract_strided_slice %26 {offsets = [0, 96], sizes = [2, 32], strides = [1, 1]} : vector<2x192xf32> to vector<2x32xf32>
    %32 = vector.extract_strided_slice %26 {offsets = [0, 128], sizes = [2, 32], strides = [1, 1]} : vector<2x192xf32> to vector<2x32xf32>
    %33 = arith.mulf %28, %30 : vector<2x32xf32>
    %34 = arith.mulf %29, %16 : vector<2x32xf32>
    %35 = arith.addf %33, %34 : vector<2x32xf32>
    %36 = math.tanh %35 : vector<2x32xf32>
    %37 = arith.mulf %31, %36 : vector<2x32xf32>
    %38 = arith.mulf %32, %37 : vector<2x32xf32>
    %cst_11 = arith.constant 1.000000e+00 : f32
    %39 = vector.broadcast %cst_11 : f32 to vector<2x32xf32>
    %40 = arith.subf %39, %32 : vector<2x32xf32>
    %41 = vector.extract_strided_slice %21 {offsets = [0, 160], sizes = [2, 32], strides = [1, 1]} : vector<2x192xf32> to vector<2x32xf32>
    %42 = arith.mulf %40, %41 : vector<2x32xf32>
    %43 = arith.addf %38, %42 : vector<2x32xf32>
    %cst_12 = arith.constant dense<0.000000e+00> : vector<2x128xf32>
    %44 = tpu.matmul %43, %1, %cst_12 {dimension_numbers = #tpu.dot_dimension_numbers<[1], [0], [0], [1], [0, 0, 1, 1], [], []>} : vector<2x32xf32>, vector<32x128xf32>, vector<2x128xf32> -> vector<2x128xf32>
    %45 = vector.broadcast %2 : vector<1x128xf32> to vector<2x128xf32>
    %46 = arith.addf %44, %45 : vector<2x128xf32>
    %47 = arith.index_cast %c0_i32_6 : i32 to index
    %c0_13 = arith.constant 0 : index
    %c0_14 = arith.constant 0 : index
    %48 = vector.load %arg4[%47, %c0_13, %c0_14] : memref<5x2x128xf32, #tpu.memory_space<vmem>>, vector<1x2x128xf32>
    %49 = vector.shape_cast %48 : vector<1x2x128xf32> to vector<2x128xf32>
    %50 = vector.shape_cast %46 : vector<2x128xf32> to vector<1x2x128xf32>
    tpu.vector_store %arg4[%47, %c0_13, %c0_14], %50 {strides = array<i32>} : memref<5x2x128xf32, #tpu.memory_space<vmem>>, vector<1x2x128xf32>,
    %cst_15 = arith.constant -1.000000e+30 : f32
    %51 = vector.broadcast %cst_15 : f32 to vector<2x128xf32>
    %52 = arith.select %8, %46, %51 : vector<2x128xi1>, vector<2x128xf32>
    %cst_16 = arith.constant dense<0xFF800000> : vector<2xf32>
    %53 = vector.multi_reduction <maximumf>, %52, %cst_16 [1] : vector<2x128xf32> to vector<2xf32>
    %54 = vector.shape_cast %53 : vector<2xf32> to vector<2x1xf32>
    %55 = vector.broadcast %54 : vector<2x1xf32> to vector<2x128xf32>
    %56 = arith.cmpf oge, %52, %55 : vector<2x128xf32>
    %c128_i32 = arith.constant 128 : i32
    %57 = vector.broadcast %c128_i32 : i32 to vector<2x128xi32>
    %58 = arith.select %56, %3, %57 : vector<2x128xi1>, vector<2x128xi32>
    %cst_17 = arith.constant dense<2147483647> : vector<2xi32>
    %59 = vector.multi_reduction <minsi>, %58, %cst_17 [1] : vector<2x128xi32> to vector<2xi32>
    %60 = vector.shape_cast %59 : vector<2xi32> to vector<2x1xi32>
    %c1_i32_18 = arith.constant 1 : i32
    %61 = vector.broadcast %c1_i32_18 : i32 to vector<2x1xi32>
    %62 = arith.addi %60, %61 : vector<2x1xi32>
    %63 = vector.broadcast %62 : vector<2x1xi32> to vector<2x32xi32>
    %64 = arith.cmpi eq, %9, %63 : vector<2x32xi32>
    %65 = arith.extui %64 : vector<2x32xi1> to vector<2x32xi32>
    %66 = arith.sitofp %65 : vector<2x32xi32> to vector<2x32xf32>
    %67 = tpu.concatenate %66, %43 in 1 : vector<2x32xf32>, vector<2x32xf32> -> vector<2x64xf32>
    %c1_i32_19 = arith.constant 1 : i32
    %68 = arith.index_cast %c1_i32_19 : i32 to index
    %c0_20 = arith.constant 0 : index
    %c0_21 = arith.constant 0 : index
    %69 = vector.load %arg0[%68, %c0_20, %c0_21] : memref<5x2x192xf32, #tpu.memory_space<vmem>>, vector<1x2x192xf32>
    %70 = vector.shape_cast %69 : vector<1x2x192xf32> to vector<2x192xf32>
    %cst_22 = arith.constant dense<0.000000e+00> : vector<2x192xf32>
    %71 = tpu.matmul %67, %0, %cst_22 {dimension_numbers = #tpu.dot_dimension_numbers<[1], [0], [0], [1], [0, 0, 1, 1], [], []>} : vector<2x64xf32>, vector<64x192xf32>, vector<2x192xf32> -> vector<2x192xf32>
    %72 = arith.addf %70, %71 : vector<2x192xf32>
    %73 = arith.negf %72 : vector<2x192xf32>
    %74 = math.exp %73 : vector<2x192xf32>
    %cst_23 = arith.constant 1.000000e+00 : f32
    %75 = vector.broadcast %cst_23 : f32 to vector<2x192xf32>
    %76 = arith.addf %75, %74 : vector<2x192xf32>
    %77 = arith.divf %75, %76 : vector<2x192xf32>
    %78 = math.tanh %72 : vector<2x192xf32>
    %79 = vector.extract_strided_slice %77 {offsets = [0, 0], sizes = [2, 32], strides = [1, 1]} : vector<2x192xf32> to vector<2x32xf32>
    %80 = vector.extract_strided_slice %77 {offsets = [0, 32], sizes = [2, 32], strides = [1, 1]} : vector<2x192xf32> to vector<2x32xf32>
    %81 = vector.extract_strided_slice %78 {offsets = [0, 64], sizes = [2, 32], strides = [1, 1]} : vector<2x192xf32> to vector<2x32xf32>
    %82 = vector.extract_strided_slice %77 {offsets = [0, 96], sizes = [2, 32], strides = [1, 1]} : vector<2x192xf32> to vector<2x32xf32>
    %83 = vector.extract_strided_slice %77 {offsets = [0, 128], sizes = [2, 32], strides = [1, 1]} : vector<2x192xf32> to vector<2x32xf32>
    %84 = arith.mulf %79, %81 : vector<2x32xf32>
    %85 = arith.mulf %80, %35 : vector<2x32xf32>
    %86 = arith.addf %84, %85 : vector<2x32xf32>
    %87 = math.tanh %86 : vector<2x32xf32>
    %88 = arith.mulf %82, %87 : vector<2x32xf32>
    %89 = arith.mulf %83, %88 : vector<2x32xf32>
    %cst_24 = arith.constant 1.000000e+00 : f32
    %90 = vector.broadcast %cst_24 : f32 to vector<2x32xf32>
    %91 = arith.subf %90, %83 : vector<2x32xf32>
    %92 = vector.extract_strided_slice %72 {offsets = [0, 160], sizes = [2, 32], strides = [1, 1]} : vector<2x192xf32> to vector<2x32xf32>
    %93 = arith.mulf %91, %92 : vector<2x32xf32>
    %94 = arith.addf %89, %93 : vector<2x32xf32>
    %cst_25 = arith.constant dense<0.000000e+00> : vector<2x128xf32>
    %95 = tpu.matmul %94, %1, %cst_25 {dimension_numbers = #tpu.dot_dimension_numbers<[1], [0], [0], [1], [0, 0, 1, 1], [], []>} : vector<2x32xf32>, vector<32x128xf32>, vector<2x128xf32> -> vector<2x128xf32>
    %96 = vector.broadcast %2 : vector<1x128xf32> to vector<2x128xf32>
    %97 = arith.addf %95, %96 : vector<2x128xf32>
    %98 = arith.index_cast %c1_i32_19 : i32 to index
    %c0_26 = arith.constant 0 : index
    %c0_27 = arith.constant 0 : index
    %99 = vector.load %arg4[%98, %c0_26, %c0_27] : memref<5x2x128xf32, #tpu.memory_space<vmem>>, vector<1x2x128xf32>
    %100 = vector.shape_cast %99 : vector<1x2x128xf32> to vector<2x128xf32>
    %101 = vector.shape_cast %97 : vector<2x128xf32> to vector<1x2x128xf32>
    tpu.vector_store %arg4[%98, %c0_26, %c0_27], %101 {strides = array<i32>} : memref<5x2x128xf32, #tpu.memory_space<vmem>>, vector<1x2x128xf32>,
    %cst_28 = arith.constant -1.000000e+30 : f32
    %102 = vector.broadcast %cst_28 : f32 to vector<2x128xf32>
    %103 = arith.select %8, %97, %102 : vector<2x128xi1>, vector<2x128xf32>
    %cst_29 = arith.constant dense<0xFF800000> : vector<2xf32>
    %104 = vector.multi_reduction <maximumf>, %103, %cst_29 [1] : vector<2x128xf32> to vector<2xf32>
    %105 = vector.shape_cast %104 : vector<2xf32> to vector<2x1xf32>
    %106 = vector.broadcast %105 : vector<2x1xf32> to vector<2x128xf32>
    %107 = arith.cmpf oge, %103, %106 : vector<2x128xf32>
    %c128_i32_30 = arith.constant 128 : i32
    %108 = vector.broadcast %c128_i32_30 : i32 to vector<2x128xi32>
    %109 = arith.select %107, %3, %108 : vector<2x128xi1>, vector<2x128xi32>
    %cst_31 = arith.constant dense<2147483647> : vector<2xi32>
    %110 = vector.multi_reduction <minsi>, %109, %cst_31 [1] : vector<2x128xi32> to vector<2xi32>
    %111 = vector.shape_cast %110 : vector<2xi32> to vector<2x1xi32>
    %c1_i32_32 = arith.constant 1 : i32
    %112 = vector.broadcast %c1_i32_32 : i32 to vector<2x1xi32>
    %113 = arith.addi %111, %112 : vector<2x1xi32>
    %114 = vector.broadcast %113 : vector<2x1xi32> to vector<2x32xi32>
    %115 = arith.cmpi eq, %9, %114 : vector<2x32xi32>
    %116 = arith.extui %115 : vector<2x32xi1> to vector<2x32xi32>
    %117 = arith.sitofp %116 : vector<2x32xi32> to vector<2x32xf32>
    %118 = tpu.concatenate %117, %94 in 1 : vector<2x32xf32>, vector<2x32xf32> -> vector<2x64xf32>
    %c2_i32 = arith.constant 2 : i32
    %119 = arith.index_cast %c2_i32 : i32 to index
    %c0_33 = arith.constant 0 : index
    %c0_34 = arith.constant 0 : index
    %120 = vector.load %arg0[%119, %c0_33, %c0_34] : memref<5x2x192xf32, #tpu.memory_space<vmem>>, vector<1x2x192xf32>
    %121 = vector.shape_cast %120 : vector<1x2x192xf32> to vector<2x192xf32>
    %cst_35 = arith.constant dense<0.000000e+00> : vector<2x192xf32>
    %122 = tpu.matmul %118, %0, %cst_35 {dimension_numbers = #tpu.dot_dimension_numbers<[1], [0], [0], [1], [0, 0, 1, 1], [], []>} : vector<2x64xf32>, vector<64x192xf32>, vector<2x192xf32> -> vector<2x192xf32>
    %123 = arith.addf %121, %122 : vector<2x192xf32>
    %124 = arith.negf %123 : vector<2x192xf32>
    %125 = math.exp %124 : vector<2x192xf32>
    %cst_36 = arith.constant 1.000000e+00 : f32
    %126 = vector.broadcast %cst_36 : f32 to vector<2x192xf32>
    %127 = arith.addf %126, %125 : vector<2x192xf32>
    %128 = arith.divf %126, %127 : vector<2x192xf32>
    %129 = math.tanh %123 : vector<2x192xf32>
    %130 = vector.extract_strided_slice %128 {offsets = [0, 0], sizes = [2, 32], strides = [1, 1]} : vector<2x192xf32> to vector<2x32xf32>
    %131 = vector.extract_strided_slice %128 {offsets = [0, 32], sizes = [2, 32], strides = [1, 1]} : vector<2x192xf32> to vector<2x32xf32>
    %132 = vector.extract_strided_slice %129 {offsets = [0, 64], sizes = [2, 32], strides = [1, 1]} : vector<2x192xf32> to vector<2x32xf32>
    %133 = vector.extract_strided_slice %128 {offsets = [0, 96], sizes = [2, 32], strides = [1, 1]} : vector<2x192xf32> to vector<2x32xf32>
    %134 = vector.extract_strided_slice %128 {offsets = [0, 128], sizes = [2, 32], strides = [1, 1]} : vector<2x192xf32> to vector<2x32xf32>
    %135 = arith.mulf %130, %132 : vector<2x32xf32>
    %136 = arith.mulf %131, %86 : vector<2x32xf32>
    %137 = arith.addf %135, %136 : vector<2x32xf32>
    %138 = math.tanh %137 : vector<2x32xf32>
    %139 = arith.mulf %133, %138 : vector<2x32xf32>
    %140 = arith.mulf %134, %139 : vector<2x32xf32>
    %cst_37 = arith.constant 1.000000e+00 : f32
    %141 = vector.broadcast %cst_37 : f32 to vector<2x32xf32>
    %142 = arith.subf %141, %134 : vector<2x32xf32>
    %143 = vector.extract_strided_slice %123 {offsets = [0, 160], sizes = [2, 32], strides = [1, 1]} : vector<2x192xf32> to vector<2x32xf32>
    %144 = arith.mulf %142, %143 : vector<2x32xf32>
    %145 = arith.addf %140, %144 : vector<2x32xf32>
    %cst_38 = arith.constant dense<0.000000e+00> : vector<2x128xf32>
    %146 = tpu.matmul %145, %1, %cst_38 {dimension_numbers = #tpu.dot_dimension_numbers<[1], [0], [0], [1], [0, 0, 1, 1], [], []>} : vector<2x32xf32>, vector<32x128xf32>, vector<2x128xf32> -> vector<2x128xf32>
    %147 = vector.broadcast %2 : vector<1x128xf32> to vector<2x128xf32>
    %148 = arith.addf %146, %147 : vector<2x128xf32>
    %149 = arith.index_cast %c2_i32 : i32 to index
    %c0_39 = arith.constant 0 : index
    %c0_40 = arith.constant 0 : index
    %150 = vector.load %arg4[%149, %c0_39, %c0_40] : memref<5x2x128xf32, #tpu.memory_space<vmem>>, vector<1x2x128xf32>
    %151 = vector.shape_cast %150 : vector<1x2x128xf32> to vector<2x128xf32>
    %152 = vector.shape_cast %148 : vector<2x128xf32> to vector<1x2x128xf32>
    tpu.vector_store %arg4[%149, %c0_39, %c0_40], %152 {strides = array<i32>} : memref<5x2x128xf32, #tpu.memory_space<vmem>>, vector<1x2x128xf32>,
    %cst_41 = arith.constant -1.000000e+30 : f32
    %153 = vector.broadcast %cst_41 : f32 to vector<2x128xf32>
    %154 = arith.select %8, %148, %153 : vector<2x128xi1>, vector<2x128xf32>
    %cst_42 = arith.constant dense<0xFF800000> : vector<2xf32>
    %155 = vector.multi_reduction <maximumf>, %154, %cst_42 [1] : vector<2x128xf32> to vector<2xf32>
    %156 = vector.shape_cast %155 : vector<2xf32> to vector<2x1xf32>
    %157 = vector.broadcast %156 : vector<2x1xf32> to vector<2x128xf32>
    %158 = arith.cmpf oge, %154, %157 : vector<2x128xf32>
    %c128_i32_43 = arith.constant 128 : i32
    %159 = vector.broadcast %c128_i32_43 : i32 to vector<2x128xi32>
    %160 = arith.select %158, %3, %159 : vector<2x128xi1>, vector<2x128xi32>
    %cst_44 = arith.constant dense<2147483647> : vector<2xi32>
    %161 = vector.multi_reduction <minsi>, %160, %cst_44 [1] : vector<2x128xi32> to vector<2xi32>
    %162 = vector.shape_cast %161 : vector<2xi32> to vector<2x1xi32>
    %c1_i32_45 = arith.constant 1 : i32
    %163 = vector.broadcast %c1_i32_45 : i32 to vector<2x1xi32>
    %164 = arith.addi %162, %163 : vector<2x1xi32>
    %165 = vector.broadcast %164 : vector<2x1xi32> to vector<2x32xi32>
    %166 = arith.cmpi eq, %9, %165 : vector<2x32xi32>
    %167 = arith.extui %166 : vector<2x32xi1> to vector<2x32xi32>
    %168 = arith.sitofp %167 : vector<2x32xi32> to vector<2x32xf32>
    %169 = tpu.concatenate %168, %145 in 1 : vector<2x32xf32>, vector<2x32xf32> -> vector<2x64xf32>
    %c3_i32 = arith.constant 3 : i32
    %170 = arith.index_cast %c3_i32 : i32 to index
    %c0_46 = arith.constant 0 : index
    %c0_47 = arith.constant 0 : index
    %171 = vector.load %arg0[%170, %c0_46, %c0_47] : memref<5x2x192xf32, #tpu.memory_space<vmem>>, vector<1x2x192xf32>
    %172 = vector.shape_cast %171 : vector<1x2x192xf32> to vector<2x192xf32>
    %cst_48 = arith.constant dense<0.000000e+00> : vector<2x192xf32>
    %173 = tpu.matmul %169, %0, %cst_48 {dimension_numbers = #tpu.dot_dimension_numbers<[1], [0], [0], [1], [0, 0, 1, 1], [], []>} : vector<2x64xf32>, vector<64x192xf32>, vector<2x192xf32> -> vector<2x192xf32>
    %174 = arith.addf %172, %173 : vector<2x192xf32>
    %175 = arith.negf %174 : vector<2x192xf32>
    %176 = math.exp %175 : vector<2x192xf32>
    %cst_49 = arith.constant 1.000000e+00 : f32
    %177 = vector.broadcast %cst_49 : f32 to vector<2x192xf32>
    %178 = arith.addf %177, %176 : vector<2x192xf32>
    %179 = arith.divf %177, %178 : vector<2x192xf32>
    %180 = math.tanh %174 : vector<2x192xf32>
    %181 = vector.extract_strided_slice %179 {offsets = [0, 0], sizes = [2, 32], strides = [1, 1]} : vector<2x192xf32> to vector<2x32xf32>
    %182 = vector.extract_strided_slice %179 {offsets = [0, 32], sizes = [2, 32], strides = [1, 1]} : vector<2x192xf32> to vector<2x32xf32>
    %183 = vector.extract_strided_slice %180 {offsets = [0, 64], sizes = [2, 32], strides = [1, 1]} : vector<2x192xf32> to vector<2x32xf32>
    %184 = vector.extract_strided_slice %179 {offsets = [0, 96], sizes = [2, 32], strides = [1, 1]} : vector<2x192xf32> to vector<2x32xf32>
    %185 = vector.extract_strided_slice %179 {offsets = [0, 128], sizes = [2, 32], strides = [1, 1]} : vector<2x192xf32> to vector<2x32xf32>
    %186 = arith.mulf %181, %183 : vector<2x32xf32>
    %187 = arith.mulf %182, %137 : vector<2x32xf32>
    %188 = arith.addf %186, %187 : vector<2x32xf32>
    %189 = math.tanh %188 : vector<2x32xf32>
    %190 = arith.mulf %184, %189 : vector<2x32xf32>
    %191 = arith.mulf %185, %190 : vector<2x32xf32>
    %cst_50 = arith.constant 1.000000e+00 : f32
    %192 = vector.broadcast %cst_50 : f32 to vector<2x32xf32>
    %193 = arith.subf %192, %185 : vector<2x32xf32>
    %194 = vector.extract_strided_slice %174 {offsets = [0, 160], sizes = [2, 32], strides = [1, 1]} : vector<2x192xf32> to vector<2x32xf32>
    %195 = arith.mulf %193, %194 : vector<2x32xf32>
    %196 = arith.addf %191, %195 : vector<2x32xf32>
    %cst_51 = arith.constant dense<0.000000e+00> : vector<2x128xf32>
    %197 = tpu.matmul %196, %1, %cst_51 {dimension_numbers = #tpu.dot_dimension_numbers<[1], [0], [0], [1], [0, 0, 1, 1], [], []>} : vector<2x32xf32>, vector<32x128xf32>, vector<2x128xf32> -> vector<2x128xf32>
    %198 = vector.broadcast %2 : vector<1x128xf32> to vector<2x128xf32>
    %199 = arith.addf %197, %198 : vector<2x128xf32>
    %200 = arith.index_cast %c3_i32 : i32 to index
    %c0_52 = arith.constant 0 : index
    %c0_53 = arith.constant 0 : index
    %201 = vector.load %arg4[%200, %c0_52, %c0_53] : memref<5x2x128xf32, #tpu.memory_space<vmem>>, vector<1x2x128xf32>
    %202 = vector.shape_cast %201 : vector<1x2x128xf32> to vector<2x128xf32>
    %203 = vector.shape_cast %199 : vector<2x128xf32> to vector<1x2x128xf32>
    tpu.vector_store %arg4[%200, %c0_52, %c0_53], %203 {strides = array<i32>} : memref<5x2x128xf32, #tpu.memory_space<vmem>>, vector<1x2x128xf32>,
    %cst_54 = arith.constant -1.000000e+30 : f32
    %204 = vector.broadcast %cst_54 : f32 to vector<2x128xf32>
    %205 = arith.select %8, %199, %204 : vector<2x128xi1>, vector<2x128xf32>
    %cst_55 = arith.constant dense<0xFF800000> : vector<2xf32>
    %206 = vector.multi_reduction <maximumf>, %205, %cst_55 [1] : vector<2x128xf32> to vector<2xf32>
    %207 = vector.shape_cast %206 : vector<2xf32> to vector<2x1xf32>
    %208 = vector.broadcast %207 : vector<2x1xf32> to vector<2x128xf32>
    %209 = arith.cmpf oge, %205, %208 : vector<2x128xf32>
    %c128_i32_56 = arith.constant 128 : i32
    %210 = vector.broadcast %c128_i32_56 : i32 to vector<2x128xi32>
    %211 = arith.select %209, %3, %210 : vector<2x128xi1>, vector<2x128xi32>
    %cst_57 = arith.constant dense<2147483647> : vector<2xi32>
    %212 = vector.multi_reduction <minsi>, %211, %cst_57 [1] : vector<2x128xi32> to vector<2xi32>
    %213 = vector.shape_cast %212 : vector<2xi32> to vector<2x1xi32>
    %c1_i32_58 = arith.constant 1 : i32
    %214 = vector.broadcast %c1_i32_58 : i32 to vector<2x1xi32>
    %215 = arith.addi %213, %214 : vector<2x1xi32>
    %216 = vector.broadcast %215 : vector<2x1xi32> to vector<2x32xi32>
    %217 = arith.cmpi eq, %9, %216 : vector<2x32xi32>
    %218 = arith.extui %217 : vector<2x32xi1> to vector<2x32xi32>
    %219 = arith.sitofp %218 : vector<2x32xi32> to vector<2x32xf32>
    %220 = tpu.concatenate %219, %196 in 1 : vector<2x32xf32>, vector<2x32xf32> -> vector<2x64xf32>
    %c4_i32 = arith.constant 4 : i32
    %221 = arith.index_cast %c4_i32 : i32 to index
    %c0_59 = arith.constant 0 : index
    %c0_60 = arith.constant 0 : index
    %222 = vector.load %arg0[%221, %c0_59, %c0_60] : memref<5x2x192xf32, #tpu.memory_space<vmem>>, vector<1x2x192xf32>
    %223 = vector.shape_cast %222 : vector<1x2x192xf32> to vector<2x192xf32>
    %cst_61 = arith.constant dense<0.000000e+00> : vector<2x192xf32>
    %224 = tpu.matmul %220, %0, %cst_61 {dimension_numbers = #tpu.dot_dimension_numbers<[1], [0], [0], [1], [0, 0, 1, 1], [], []>} : vector<2x64xf32>, vector<64x192xf32>, vector<2x192xf32> -> vector<2x192xf32>
    %225 = arith.addf %223, %224 : vector<2x192xf32>
    %226 = arith.negf %225 : vector<2x192xf32>
    %227 = math.exp %226 : vector<2x192xf32>
    %cst_62 = arith.constant 1.000000e+00 : f32
    %228 = vector.broadcast %cst_62 : f32 to vector<2x192xf32>
    %229 = arith.addf %228, %227 : vector<2x192xf32>
    %230 = arith.divf %228, %229 : vector<2x192xf32>
    %231 = math.tanh %225 : vector<2x192xf32>
    %232 = vector.extract_strided_slice %230 {offsets = [0, 0], sizes = [2, 32], strides = [1, 1]} : vector<2x192xf32> to vector<2x32xf32>
    %233 = vector.extract_strided_slice %230 {offsets = [0, 32], sizes = [2, 32], strides = [1, 1]} : vector<2x192xf32> to vector<2x32xf32>
    %234 = vector.extract_strided_slice %231 {offsets = [0, 64], sizes = [2, 32], strides = [1, 1]} : vector<2x192xf32> to vector<2x32xf32>
    %235 = vector.extract_strided_slice %230 {offsets = [0, 96], sizes = [2, 32], strides = [1, 1]} : vector<2x192xf32> to vector<2x32xf32>
    %236 = vector.extract_strided_slice %230 {offsets = [0, 128], sizes = [2, 32], strides = [1, 1]} : vector<2x192xf32> to vector<2x32xf32>
    %237 = arith.mulf %232, %234 : vector<2x32xf32>
    %238 = arith.mulf %233, %188 : vector<2x32xf32>
    %239 = arith.addf %237, %238 : vector<2x32xf32>
    %240 = math.tanh %239 : vector<2x32xf32>
    %241 = arith.mulf %235, %240 : vector<2x32xf32>
    %242 = arith.mulf %236, %241 : vector<2x32xf32>
    %cst_63 = arith.constant 1.000000e+00 : f32
    %243 = vector.broadcast %cst_63 : f32 to vector<2x32xf32>
    %244 = arith.subf %243, %236 : vector<2x32xf32>
    %245 = vector.extract_strided_slice %225 {offsets = [0, 160], sizes = [2, 32], strides = [1, 1]} : vector<2x192xf32> to vector<2x32xf32>
    %246 = arith.mulf %244, %245 : vector<2x32xf32>
    %247 = arith.addf %242, %246 : vector<2x32xf32>
    %cst_64 = arith.constant dense<0.000000e+00> : vector<2x128xf32>
    %248 = tpu.matmul %247, %1, %cst_64 {dimension_numbers = #tpu.dot_dimension_numbers<[1], [0], [0], [1], [0, 0, 1, 1], [], []>} : vector<2x32xf32>, vector<32x128xf32>, vector<2x128xf32> -> vector<2x128xf32>
    %249 = vector.broadcast %2 : vector<1x128xf32> to vector<2x128xf32>
    %250 = arith.addf %248, %249 : vector<2x128xf32>
    %251 = arith.index_cast %c4_i32 : i32 to index
    %c0_65 = arith.constant 0 : index
    %c0_66 = arith.constant 0 : index
    %252 = vector.load %arg4[%251, %c0_65, %c0_66] : memref<5x2x128xf32, #tpu.memory_space<vmem>>, vector<1x2x128xf32>
    %253 = vector.shape_cast %252 : vector<1x2x128xf32> to vector<2x128xf32>
    %254 = vector.shape_cast %250 : vector<2x128xf32> to vector<1x2x128xf32>
    tpu.vector_store %arg4[%251, %c0_65, %c0_66], %254 {strides = array<i32>} : memref<5x2x128xf32, #tpu.memory_space<vmem>>, vector<1x2x128xf32>,
    %cst_67 = arith.constant -1.000000e+30 : f32
    %255 = vector.broadcast %cst_67 : f32 to vector<2x128xf32>
    %256 = arith.select %8, %250, %255 : vector<2x128xi1>, vector<2x128xf32>
    %cst_68 = arith.constant dense<0xFF800000> : vector<2xf32>
    %257 = vector.multi_reduction <maximumf>, %256, %cst_68 [1] : vector<2x128xf32> to vector<2xf32>
    %258 = vector.shape_cast %257 : vector<2xf32> to vector<2x1xf32>
    %259 = vector.broadcast %258 : vector<2x1xf32> to vector<2x128xf32>
    %260 = arith.cmpf oge, %256, %259 : vector<2x128xf32>
    %c128_i32_69 = arith.constant 128 : i32
    %261 = vector.broadcast %c128_i32_69 : i32 to vector<2x128xi32>
    %262 = arith.select %260, %3, %261 : vector<2x128xi1>, vector<2x128xi32>
    %cst_70 = arith.constant dense<2147483647> : vector<2xi32>
    %263 = vector.multi_reduction <minsi>, %262, %cst_70 [1] : vector<2x128xi32> to vector<2xi32>
    %264 = vector.shape_cast %263 : vector<2xi32> to vector<2x1xi32>
    %c1_i32_71 = arith.constant 1 : i32
    %265 = vector.broadcast %c1_i32_71 : i32 to vector<2x1xi32>
    %266 = arith.addi %264, %265 : vector<2x1xi32>
    %267 = vector.broadcast %266 : vector<2x1xi32> to vector<2x32xi32>
    %268 = arith.cmpi eq, %9, %267 : vector<2x32xi32>
    %269 = arith.extui %268 : vector<2x32xi1> to vector<2x32xi32>
    %270 = arith.sitofp %269 : vector<2x32xi32> to vector<2x32xf32>
    %271 = tpu.concatenate %270, %247 in 1 : vector<2x32xf32>, vector<2x32xf32> -> vector<2x64xf32>
    %c5_i32 = arith.constant 5 : i32
    return
  }
}

module attributes {stable_mosaic.version = 11 : i64} {
  func.func @_lin2_kernel(%arg0: i32, %arg1: memref<8x32xf32, #tpu.memory_space<vmem>>, %arg2: memref<8x32xf32, #tpu.memory_space<vmem>>, %arg3: memref<32x128xbf16, #tpu.memory_space<vmem>>, %arg4: memref<32x128xbf16, #tpu.memory_space<vmem>>, %arg5: memref<1x128xf32, #tpu.memory_space<vmem>>, %arg6: memref<8x128xf32, #tpu.memory_space<vmem>>) attributes {dimension_semantics = [#tpu.dimension_semantics<parallel>], iteration_bounds = array<i64: 1>, scalar_prefetch = 0 : i64, scratch_operands = 0 : i64, tpu.core_type = #tpu.core_type<tc>, window_params = [{transform_indices = @transform_0, window_bounds = array<i64: 8, 32>}, {transform_indices = @transform_1, window_bounds = array<i64: 8, 32>}, {pipeline_mode = #tpu.pipeline_mode<synchronous>, transform_indices = @transform_2, window_bounds = array<i64: 32, 128>}, {pipeline_mode = #tpu.pipeline_mode<synchronous>, transform_indices = @transform_3, window_bounds = array<i64: 32, 128>}, {pipeline_mode = #tpu.pipeline_mode<synchronous>, transform_indices = @transform_4, window_bounds = array<i64: 1, 128>}, {transform_indices = @transform_5, window_bounds = array<i64: 8, 128>}]} {
    %c0 = arith.constant 0 : index
    %c0_0 = arith.constant 0 : index
    %0 = vector.load %arg1[%c0, %c0_0] : memref<8x32xf32, #tpu.memory_space<vmem>>, vector<8x32xf32>
    %1 = arith.truncf %0 : vector<8x32xf32> to vector<8x32xbf16>
    %c0_1 = arith.constant 0 : index
    %c0_2 = arith.constant 0 : index
    %2 = vector.load %arg3[%c0_1, %c0_2] : memref<32x128xbf16, #tpu.memory_space<vmem>>, vector<32x128xbf16>
    %cst = arith.constant dense<0.000000e+00> : vector<8x128xf32>
    %3 = tpu.matmul %1, %2, %cst {dimension_numbers = #tpu.dot_dimension_numbers<[1], [0], [0], [1], [0, 0, 1, 1], [], []>} : vector<8x32xbf16>, vector<32x128xbf16>, vector<8x128xf32> -> vector<8x128xf32>
    %c0_3 = arith.constant 0 : index
    %c0_4 = arith.constant 0 : index
    %4 = vector.load %arg2[%c0_3, %c0_4] : memref<8x32xf32, #tpu.memory_space<vmem>>, vector<8x32xf32>
    %5 = arith.truncf %4 : vector<8x32xf32> to vector<8x32xbf16>
    %c0_5 = arith.constant 0 : index
    %c0_6 = arith.constant 0 : index
    %6 = vector.load %arg4[%c0_5, %c0_6] : memref<32x128xbf16, #tpu.memory_space<vmem>>, vector<32x128xbf16>
    %cst_7 = arith.constant dense<0.000000e+00> : vector<8x128xf32>
    %7 = tpu.matmul %5, %6, %cst_7 {dimension_numbers = #tpu.dot_dimension_numbers<[1], [0], [0], [1], [0, 0, 1, 1], [], []>} : vector<8x32xbf16>, vector<32x128xbf16>, vector<8x128xf32> -> vector<8x128xf32>
    %8 = arith.addf %3, %7 : vector<8x128xf32>
    %c0_8 = arith.constant 0 : index
    %c0_9 = arith.constant 0 : index
    %9 = vector.load %arg5[%c0_8, %c0_9] : memref<1x128xf32, #tpu.memory_space<vmem>>, vector<1x128xf32>
    %10 = vector.broadcast %9 : vector<1x128xf32> to vector<8x128xf32>
    %11 = arith.addf %8, %10 : vector<8x128xf32>
    %c0_10 = arith.constant 0 : index
    %c0_11 = arith.constant 0 : index
    %12 = vector.load %arg6[%c0_10, %c0_11] : memref<8x128xf32, #tpu.memory_space<vmem>>, vector<8x128xf32>
    tpu.vector_store %arg6[%c0_10, %c0_11], %11 {strides = array<i32>} : memref<8x128xf32, #tpu.memory_space<vmem>>, vector<8x128xf32>,
    return
  }
  func.func @transform_0(%arg0: i32) -> (i32, i32) {
    %c0_i32 = arith.constant 0 : i32
    %c0_i32_0 = arith.constant 0 : i32
    return %arg0, %c0_i32 : i32, i32
  }
  func.func @transform_1(%arg0: i32) -> (i32, i32) {
    %c0_i32 = arith.constant 0 : i32
    %c0_i32_0 = arith.constant 0 : i32
    return %arg0, %c0_i32 : i32, i32
  }
  func.func @transform_2(%arg0: i32) -> (i32, i32) {
    %c0_i32 = arith.constant 0 : i32
    %c0_i32_0 = arith.constant 0 : i32
    %c0_i32_1 = arith.constant 0 : i32
    return %c0_i32, %c0_i32_0 : i32, i32
  }
  func.func @transform_3(%arg0: i32) -> (i32, i32) {
    %c0_i32 = arith.constant 0 : i32
    %c0_i32_0 = arith.constant 0 : i32
    %c0_i32_1 = arith.constant 0 : i32
    return %c0_i32, %c0_i32_0 : i32, i32
  }
  func.func @transform_4(%arg0: i32) -> (i32, i32) {
    %c0_i32 = arith.constant 0 : i32
    %c0_i32_0 = arith.constant 0 : i32
    %c0_i32_1 = arith.constant 0 : i32
    return %c0_i32, %c0_i32_0 : i32, i32
  }
  func.func @transform_5(%arg0: i32) -> (i32, i32) {
    %c0_i32 = arith.constant 0 : i32
    %c0_i32_0 = arith.constant 0 : i32
    return %arg0, %c0_i32 : i32, i32
  }
}

module attributes {stable_mosaic.version = 11 : i64} {
  func.func @_edge_proj_kernel(%arg0: i32, %arg1: memref<8x32xf32, #tpu.memory_space<vmem>>, %arg2: memref<8x64xf32, #tpu.memory_space<vmem>>, %arg3: memref<8x128xf32, #tpu.memory_space<vmem>>, %arg4: memref<32x256xbf16, #tpu.memory_space<vmem>>, %arg5: memref<64x256xbf16, #tpu.memory_space<vmem>>, %arg6: memref<128x256xbf16, #tpu.memory_space<vmem>>, %arg7: memref<1x256xf32, #tpu.memory_space<vmem>>, %arg8: memref<8x256xf32, #tpu.memory_space<vmem>>) attributes {dimension_semantics = [#tpu.dimension_semantics<parallel>], iteration_bounds = array<i64: 1>, scalar_prefetch = 0 : i64, scratch_operands = 0 : i64, tpu.core_type = #tpu.core_type<tc>, window_params = [{transform_indices = @transform_0, window_bounds = array<i64: 8, 32>}, {transform_indices = @transform_1, window_bounds = array<i64: 8, 64>}, {transform_indices = @transform_2, window_bounds = array<i64: 8, 128>}, {pipeline_mode = #tpu.pipeline_mode<synchronous>, transform_indices = @transform_3, window_bounds = array<i64: 32, 256>}, {pipeline_mode = #tpu.pipeline_mode<synchronous>, transform_indices = @transform_4, window_bounds = array<i64: 64, 256>}, {pipeline_mode = #tpu.pipeline_mode<synchronous>, transform_indices = @transform_5, window_bounds = array<i64: 128, 256>}, {pipeline_mode = #tpu.pipeline_mode<synchronous>, transform_indices = @transform_6, window_bounds = array<i64: 1, 256>}, {transform_indices = @transform_7, window_bounds = array<i64: 8, 256>}]} {
    %c0 = arith.constant 0 : index
    %c0_0 = arith.constant 0 : index
    %0 = vector.load %arg1[%c0, %c0_0] : memref<8x32xf32, #tpu.memory_space<vmem>>, vector<8x32xf32>
    %1 = arith.truncf %0 : vector<8x32xf32> to vector<8x32xbf16>
    %c0_1 = arith.constant 0 : index
    %c0_2 = arith.constant 0 : index
    %2 = vector.load %arg4[%c0_1, %c0_2] : memref<32x256xbf16, #tpu.memory_space<vmem>>, vector<32x256xbf16>
    %cst = arith.constant dense<0.000000e+00> : vector<8x256xf32>
    %3 = tpu.matmul %1, %2, %cst {dimension_numbers = #tpu.dot_dimension_numbers<[1], [0], [0], [1], [0, 0, 1, 1], [], []>} : vector<8x32xbf16>, vector<32x256xbf16>, vector<8x256xf32> -> vector<8x256xf32>
    %c0_3 = arith.constant 0 : index
    %c0_4 = arith.constant 0 : index
    %4 = vector.load %arg2[%c0_3, %c0_4] : memref<8x64xf32, #tpu.memory_space<vmem>>, vector<8x64xf32>
    %5 = arith.truncf %4 : vector<8x64xf32> to vector<8x64xbf16>
    %c0_5 = arith.constant 0 : index
    %c0_6 = arith.constant 0 : index
    %6 = vector.load %arg5[%c0_5, %c0_6] : memref<64x256xbf16, #tpu.memory_space<vmem>>, vector<64x256xbf16>
    %cst_7 = arith.constant dense<0.000000e+00> : vector<8x256xf32>
    %7 = tpu.matmul %5, %6, %cst_7 {dimension_numbers = #tpu.dot_dimension_numbers<[1], [0], [0], [1], [0, 0, 1, 1], [], []>} : vector<8x64xbf16>, vector<64x256xbf16>, vector<8x256xf32> -> vector<8x256xf32>
    %8 = arith.addf %3, %7 : vector<8x256xf32>
    %c0_8 = arith.constant 0 : index
    %c0_9 = arith.constant 0 : index
    %9 = vector.load %arg3[%c0_8, %c0_9] : memref<8x128xf32, #tpu.memory_space<vmem>>, vector<8x128xf32>
    %10 = arith.truncf %9 : vector<8x128xf32> to vector<8x128xbf16>
    %c0_10 = arith.constant 0 : index
    %c0_11 = arith.constant 0 : index
    %11 = vector.load %arg6[%c0_10, %c0_11] : memref<128x256xbf16, #tpu.memory_space<vmem>>, vector<128x256xbf16>
    %cst_12 = arith.constant dense<0.000000e+00> : vector<8x256xf32>
    %12 = tpu.matmul %10, %11, %cst_12 {dimension_numbers = #tpu.dot_dimension_numbers<[1], [0], [0], [1], [0, 0, 1, 1], [], []>} : vector<8x128xbf16>, vector<128x256xbf16>, vector<8x256xf32> -> vector<8x256xf32>
    %13 = arith.addf %8, %12 : vector<8x256xf32>
    %c0_13 = arith.constant 0 : index
    %c0_14 = arith.constant 0 : index
    %14 = vector.load %arg7[%c0_13, %c0_14] : memref<1x256xf32, #tpu.memory_space<vmem>>, vector<1x256xf32>
    %15 = vector.broadcast %14 : vector<1x256xf32> to vector<8x256xf32>
    %16 = arith.addf %13, %15 : vector<8x256xf32>
    %c0_15 = arith.constant 0 : index
    %c0_16 = arith.constant 0 : index
    %17 = vector.load %arg8[%c0_15, %c0_16] : memref<8x256xf32, #tpu.memory_space<vmem>>, vector<8x256xf32>
    tpu.vector_store %arg8[%c0_15, %c0_16], %16 {strides = array<i32>} : memref<8x256xf32, #tpu.memory_space<vmem>>, vector<8x256xf32>,
    return
  }
  func.func @transform_0(%arg0: i32) -> (i32, i32) {
    %c0_i32 = arith.constant 0 : i32
    %c0_i32_0 = arith.constant 0 : i32
    return %arg0, %c0_i32 : i32, i32
  }
  func.func @transform_1(%arg0: i32) -> (i32, i32) {
    %c0_i32 = arith.constant 0 : i32
    %c0_i32_0 = arith.constant 0 : i32
    return %arg0, %c0_i32 : i32, i32
  }
  func.func @transform_2(%arg0: i32) -> (i32, i32) {
    %c0_i32 = arith.constant 0 : i32
    %c0_i32_0 = arith.constant 0 : i32
    return %arg0, %c0_i32 : i32, i32
  }
  func.func @transform_3(%arg0: i32) -> (i32, i32) {
    %c0_i32 = arith.constant 0 : i32
    %c0_i32_0 = arith.constant 0 : i32
    %c0_i32_1 = arith.constant 0 : i32
    return %c0_i32, %c0_i32_0 : i32, i32
  }
  func.func @transform_4(%arg0: i32) -> (i32, i32) {
    %c0_i32 = arith.constant 0 : i32
    %c0_i32_0 = arith.constant 0 : i32
    %c0_i32_1 = arith.constant 0 : i32
    return %c0_i32, %c0_i32_0 : i32, i32
  }
  func.func @transform_5(%arg0: i32) -> (i32, i32) {
    %c0_i32 = arith.constant 0 : i32
    %c0_i32_0 = arith.constant 0 : i32
    %c0_i32_1 = arith.constant 0 : i32
    return %c0_i32, %c0_i32_0 : i32, i32
  }
  func.func @transform_6(%arg0: i32) -> (i32, i32) {
    %c0_i32 = arith.constant 0 : i32
    %c0_i32_0 = arith.constant 0 : i32
    %c0_i32_1 = arith.constant 0 : i32
    return %c0_i32, %c0_i32_0 : i32, i32
  }
  func.func @transform_7(%arg0: i32) -> (i32, i32) {
    %c0_i32 = arith.constant 0 : i32
    %c0_i32_0 = arith.constant 0 : i32
    return %arg0, %c0_i32 : i32, i32
  }
}

</mosaic_0001>

<bundles_post_ra>
// kernel: squeeze.2
= control target key start
LH: loop header
LB: loop body
LE: loop exit
PB: predicated region body
PF: predicated region fallthrough
CT: control target
= control target key end

     0   :  { %s94_s0 = inlined_call_operand.vmem [shape: f32[1,5,2,128], index: 0, kind: input, shape index: {}]   ;;  %s95_s1 = inlined_call_operand.vmem [shape: f32[10,128], index: 1, kind: output, shape index: {}]  }
   0x1   :  { %v46_v0 = vld [vmem:[%s94_s0 + $0x8] sm:$0x3]  ;;  %v47_v1 = vld [vmem:[%s94_s0 + $0x6] sm:$0x3]  ;;  %v48_v2 = vld [vmem:[%s94_s0 + $0x4] sm:$0x3] }
   0x2   :  { %8 = vst [vmem:[#allocation0 + $0x20] sm:$0x3] %v46_v0  ;;  %13 = vst [vmem:[#allocation0 + $0x18] sm:$0x3] %v47_v1  ;;  %v49_v3 = vld [vmem:[%s94_s0 + $0x2] sm:$0x3] }
   0x3   :  { %18 = vst [vmem:[#allocation0 + $0x10] sm:$0x3] %v48_v2  ;;  %v23_v4 = vld [vmem:[%s94_s0] sm:$0x3]  ;;  %22 = vst [vmem:[#allocation0 + $0x8] sm:$0x3] %v49_v3 }
   0x4   :  { %24 = vst [vmem:[#allocation0] sm:$0x3] %v23_v4 }
   0x9   :  { %v36_v6 = vld [vmem:[#allocation0 + $0x18] sm:$0x3]   ;;  %v40_v7 = vld [vmem:[#allocation0 + $0x20] sm:$0x3]  }
   0xa   :  { %v32_v5 = vld [vmem:[#allocation0 + $0x10] sm:$0x3]   ;;  %v28_v9 = vld [vmem:[#allocation0 + $0x8] sm:$0x3]   ;;  %52 = vst [vmem:[%s95_s1 + $0x6] sm:$0x3] %v36_v6  }
   0xb   :  { %v25_v8 = vld [vmem:[#allocation0] sm:$0x3]   ;;  %51 = vst [vmem:[%s95_s1 + $0x4] sm:$0x3] %v32_v5   ;;  %53 = vst [vmem:[%s95_s1 + $0x8] sm:$0x3] %v40_v7  }
   0xc   :  { %26 = vst [vmem:[%s95_s1] sm:$0x3] %v25_v8   ;;  %50 = vst [vmem:[%s95_s1 + $0x2] sm:$0x3] %v28_v9  }

// kernel: lstm_context_forward.8
= control target key start
LH: loop header
LB: loop body
LE: loop exit
PB: predicated region body
PF: predicated region fallthrough
CT: control target
= control target key end

     0   :  { %v846_v3 = vmov 0.0   ;;  %v847_v49 = vmov 1983009808   ;;  %v121_v51 = vlaneseq  ;;  %s848_s18 = smov 64   ;;  %vm155_vm0 = vcmask 523264   ;;  %s1139_s1 = inlined_call_operand.vmem [shape: f32[1,128,256], index: 1, kind: input, shape index: {}]   ;;  %s1140_s0 = inlined_call_operand.vmem [shape: f32[1,5,2,256], index: 0, kind: input, shape index: {}]   ;;  %s1141_s2 = inlined_call_operand.vmem [shape: f32[1,5,2,128], index: 2, kind: output, shape index: {}]  }
   0x1   :  { %v12_v0 = vld [vmem:[%s1139_s1 + $0x8] sm:$0xff]  ;;  %v14_v1 = vld [vmem:[%s1139_s1 + $0x18] sm:$0xff]  ;;  %v11_v2 = vld [vmem:[%s1139_s1] sm:$0xff]  ;;  %108 = vmatprep.mubr.f32.mxu0 %v846_v3  ;;  %224 = vmatprep.mubr.f32.mxu1 %v846_v3  ;;  %v119_v50 = vunpack.c.l.s4 %v847_v49 }
   0x2   :  { %v875_v4 = vpack.c.bf16 %v14_v1, %v12_v0  ;;  %v13_v5 = vld [vmem:[%s1139_s1 + $0x10] sm:$0xff]  ;;  %v16_v6 = vld [vmem:[%s1139_s1 + $0x28] sm:$0xff]  ;;  %v18_v7 = vld [vmem:[%s1139_s1 + $0x38] sm:$0xff]  ;;  %v122_v53 = vshrl.u32 %v121_v51, 7 }
   0x3   :  { %v886_v8 = vpack.c.bf16 %v13_v5, %v11_v2  ;;  %v888_v9 = vpack.c.bf16 %v18_v7, %v16_v6  ;;  %v15_v10 = vld [vmem:[%s1139_s1 + $0x20] sm:$0xff]  ;;  %v17_v11 = vld [vmem:[%s1139_s1 + $0x30] sm:$0xff]  ;;  %v20_v12 = vld [vmem:[%s1139_s1 + $0x48] sm:$0xff]  ;;  %v120_v52 = vunpack.c.0.s8 %v119_v50 }
   0x4   :  { %644 = vmatprep.subr.bf16.mxu0 %v875_v4  ;;  %v22_v13 = vld [vmem:[%s1139_s1 + $0x58] sm:$0xff]  ;;  %676 = vmatprep.subr.bf16.mxu1 %v875_v4  ;;  %v905_v14 = vpack.c.bf16 %v17_v11, %v15_v10  ;;  %v19_v16 = vld [vmem:[%s1139_s1 + $0x40] sm:$0xff]  ;;  %v21_v17 = vld [vmem:[%s1139_s1 + $0x50] sm:$0xff] }
   0x5   :  { %646 = vmatpush1.bf16.msra.mxu0 %v886_v8  ;;  %678 = vmatpush1.bf16.msra.mxu1 %v886_v8  ;;  %v909_v15 = vpack.c.bf16 %v22_v13, %v20_v12  ;;  %v24_v18 = vld [vmem:[%s1139_s1 + $0x68] sm:$0xff]  ;;  %v26_v19 = vld [vmem:[%s1139_s1 + $0x78] sm:$0xff]  ;;  %v925_v20 = vpack.c.bf16 %v21_v17, %v19_v16  ;;  %v23_v22 = vld [vmem:[%s1139_s1 + $0x60] sm:$0xff]  ;;  %v1046_v55 = vsub.s32 %v120_v52, %v122_v53 }
   0x6   :  { %648 = vmatprep.subr.bf16.mxu0 %v888_v9  ;;  %680 = vmatprep.subr.bf16.mxu1 %v888_v9  ;;  %v929_v21 = vpack.c.bf16 %v26_v19, %v24_v18  ;;  %v25_v23 = vld [vmem:[%s1139_s1 + $0x70] sm:$0xff]  ;;  %v28_v24 = vld [vmem:[%s1139_s1 + $0x88] sm:$0xff]  ;;  %v30_v25 = vld [vmem:[%s1139_s1 + $0x98] sm:$0xff] }
   0x7   :  { %v945_v26 = vpack.c.bf16 %v25_v23, %v23_v22  ;;  %v949_v27 = vpack.c.bf16 %v30_v25, %v28_v24  ;;  %v27_v28 = vld [vmem:[%s1139_s1 + $0x80] sm:$0xff]  ;;  %v29_v29 = vld [vmem:[%s1139_s1 + $0x90] sm:$0xff]  ;;  %v32_v30 = vld [vmem:[%s1139_s1 + $0xa8] sm:$0xff] }
   0x8   :  { %v34_v31 = vld [vmem:[%s1139_s1 + $0xb8] sm:$0xff]  ;;  %v965_v32 = vpack.c.bf16 %v29_v29, %v27_v28  ;;  %v31_v34 = vld [vmem:[%s1139_s1 + $0xa0] sm:$0xff]  ;;  %v33_v35 = vld [vmem:[%s1139_s1 + $0xb0] sm:$0xff] }
   0x9   :  { %650 = vmatpush1.bf16.msra.mxu0 %v905_v14  ;;  %682 = vmatpush1.bf16.msra.mxu1 %v905_v14  ;;  %v969_v33 = vpack.c.bf16 %v34_v31, %v32_v30  ;;  %v36_v36 = vld [vmem:[%s1139_s1 + $0xc8] sm:$0xff]  ;;  %v38_v37 = vld [vmem:[%s1139_s1 + $0xd8] sm:$0xff]  ;;  %v985_v38 = vpack.c.bf16 %v33_v35, %v31_v34  ;;  %v35_v40 = vld [vmem:[%s1139_s1 + $0xc0] sm:$0xff] }
   0xa   :  { %652 = vmatprep.subr.bf16.mxu0 %v909_v15  ;;  %684 = vmatprep.subr.bf16.mxu1 %v909_v15  ;;  %v989_v39 = vpack.c.bf16 %v38_v37, %v36_v36  ;;  %v37_v41 = vld [vmem:[%s1139_s1 + $0xd0] sm:$0xff]  ;;  %v40_v42 = vld [vmem:[%s1139_s1 + $0xe8] sm:$0xff]  ;;  %v42_v43 = vld [vmem:[%s1139_s1 + $0xf8] sm:$0xff] }
   0xb   :  { %v1005_v44 = vpack.c.bf16 %v37_v41, %v35_v40  ;;  %v1009_v45 = vpack.c.bf16 %v42_v43, %v40_v42  ;;  %v39_v46 = vld [vmem:[%s1139_s1 + $0xe0] sm:$0xff]  ;;  %v41_v47 = vld [vmem:[%s1139_s1 + $0xf0] sm:$0xff] }
   0xc   :  { %v1019_v48 = vpack.c.bf16 %v41_v47, %v39_v46  ;;  %v43_v58 = vld [vmem:[%s1140_s0] sm:$0xf]  ;;  %v627_v23 = vld [vmem:[%s1140_s0 + $0x4] sm:$0xf] }
   0xd   :  { %654 = vmatpush1.bf16.msra.mxu0 %v925_v20  ;;  %686 = vmatpush1.bf16.msra.mxu1 %v925_v20 }
   0xe   :  { %656 = vmatprep.subr.bf16.mxu0 %v929_v21  ;;  %688 = vmatprep.subr.bf16.mxu1 %v929_v21 }
  0x11   :  { %658 = vmatpush1.bf16.msra.mxu0 %v945_v26  ;;  %690 = vmatpush1.bf16.msra.mxu1 %v945_v26 }
  0x12   :  { %660 = vmatprep.subr.bf16.mxu0 %v949_v27  ;;  %692 = vmatprep.subr.bf16.mxu1 %v949_v27 }
  0x15   :  { %662 = vmatpush1.bf16.msra.mxu0 %v965_v32  ;;  %694 = vmatpush1.bf16.msra.mxu1 %v965_v32 }
  0x16   :  { %664 = vmatprep.subr.bf16.mxu0 %v969_v33  ;;  %696 = vmatprep.subr.bf16.mxu1 %v969_v33 }
  0x19   :  { %666 = vmatpush1.bf16.msra.mxu0 %v985_v38  ;;  %698 = vmatpush1.bf16.msra.mxu1 %v985_v38 }
  0x1a   :  { %668 = vmatprep.subr.bf16.mxu0 %v989_v39  ;;  %700 = vmatprep.subr.bf16.mxu1 %v989_v39 }
  0x1d   :  { %670 = vmatpush1.bf16.msra.mxu0 %v1005_v44  ;;  %702 = vmatpush1.bf16.msra.mxu1 %v1005_v44 }
  0x1e   :  { %672 = vmatprep.subr.bf16.mxu0 %v1009_v45  ;;  %704 = vmatprep.subr.bf16.mxu1 %v1009_v45 }
  0x21   :  { %674 = vmatpush1.bf16.msra.mxu0 %v1019_v48  ;;  %706 = vmatpush1.bf16.msra.mxu1 %v1019_v48 }
  0x22   :  { %708 = vmatprep.subr.bf16.mxu0 %v875_v4  ;;  %740 = vmatprep.subr.bf16.mxu1 %v875_v4 }
  0x24   :  { %109 = vmatmul.mubr.f32.vlgmr.msra.gmra.mrb[0].mxu0 %v846_v3 }
  0x25   :  { %710 = vmatpush1.bf16.msra.mxu0 %v886_v8  ;;  %340 = vmatprep.mubr.f32.mxu0 %v846_v3 }
  0x26   :  { %712 = vmatprep.subr.bf16.mxu0 %v888_v9 }
  0x29   :  { %714 = vmatpush1.bf16.msra.mxu0 %v905_v14 }
  0x2a   :  { %716 = vmatprep.subr.bf16.mxu0 %v909_v15 }
  0x2d   :  { %718 = vmatpush1.bf16.msra.mxu0 %v925_v20 }
  0x2e   :  { %720 = vmatprep.subr.bf16.mxu0 %v929_v21 }
  0x31   :  { %722 = vmatpush1.bf16.msra.mxu0 %v945_v26 }
  0x32   :  { %724 = vmatprep.subr.bf16.mxu0 %v949_v27 }
  0x35   :  { %726 = vmatpush1.bf16.msra.mxu0 %v965_v32 }
  0x36   :  { %728 = vmatprep.subr.bf16.mxu0 %v969_v33 }
  0x39   :  { %730 = vmatpush1.bf16.msra.mxu0 %v985_v38 }
  0x3a   :  { %732 = vmatprep.subr.bf16.mxu0 %v989_v39 }
  0x3d   :  { %734 = vmatpush1.bf16.msra.mxu0 %v1005_v44 }
  0x3e   :  { %736 = vmatprep.subr.bf16.mxu0 %v1009_v45 }
  0x41   :  { %738 = vmatpush1.bf16.msra.mxu0 %v1019_v48 }
  0x42   :  { %772 = vmatprep.subr.bf16.mxu0 %v875_v4 }
  0xf7   :  { %v110_v54 = vpop.f32.mrb[0].mxu0 }
  0xf8   :  { %v112_v56 = vpop.f32.mrb[1].mxu0 }
  0xf9   :  { %v117_v57 = vcombine.low %v110_v54, %v112_v56 }
  0xfb   :  { %v124_v59 = vrot.slane %v117_v57, %v1046_v55 }
  0xfd   :  { %v126_v60 = vadd.f32 %v124_v59, %v43_v58 }
  0xff   :  { %v626_v61 = vmul.f32 -1.442695, %v126_v60 }
 0x101   :  { %806 = vpow2.f32 %v626_v61  ;;  %v635_v61 = vld [vmem:[%s1140_s0 + $0xc] sm:$0xf] }
 0x102   :  { %808 = vtanh.f32 %v126_v60 }
 0x10b   :  { %v807_v62 = vpop.eup %806 }
 0x10c   :  { %v130_v63 = vadd.f32 1.0, %v807_v62  ;;  %v809_v0 = vpop.eup %808 }
 0x10d   :  { %v136_v1 = vrot.slane %v809_v0, 2 }
 0x10e   :  { %810 = vrcp.f32 %v130_v63 }
 0x118   :  { %v811_v2 = vpop.eup %810 }
 0x119   :  { %v138_v4 = vmul.f32 %v811_v2, %v136_v1  ;;  %v134_v5 = vmul.f32 0.0, %v811_v2 }
 0x11b   :  { %140 = vrot.lane.b32.xlu0 %v138_v4, %s848_s18 }
 0x11f   :  { %146 = vrot.lane.b32.xlu0 %v811_v2, %s848_s18 }
 0x18d   :  { %v141_v6 = vpop.permute.xlu0 %140 }
 0x18e   :  { %v143_v7 = vadd.f32 %v141_v6, %v134_v5 }
 0x190   :  { %812 = vtanh.f32 %v143_v7 }
 0x191   :  { %v147_v11 = vpop.permute.xlu0 %146 }
 0x192   :  { %v148_v12 = vrot.slane %v147_v11, 2 }
 0x19a   :  { %v813_v10 = vpop.eup %812 }
 0x19b   :  { %151 = vrot.lane.b32.xlu1 %v813_v10, %s848_s18 }
 0x20d   :  { %v152_v13 = vpop.permute.xlu1 %151 }
 0x20e   :  { %v154_v16 = vmul.f32 %v152_v13, %v148_v12 }
 0x210   :  { %v156_v17 = vsel %vm155_vm0, %v154_v16, 0.0  ;;  %628 = vmatmul.mubr.msk.f32.vlgmr.msra.gmra.mrb[0].mxu1 %vm155_vm0, %v154_v16 }
 0x211   :  { %157 = vst [vmem:[%s1141_s2] sm:$0x3] %v156_v17  ;;  %742 = vmatpush1.bf16.msra.mxu1 %v886_v8  ;;  %456 = vmatprep.mubr.f32.mxu1 %v846_v3 }
 0x212   :  { %744 = vmatprep.subr.bf16.mxu1 %v888_v9 }
 0x215   :  { %746 = vmatpush1.bf16.msra.mxu1 %v905_v14 }
 0x216   :  { %748 = vmatprep.subr.bf16.mxu1 %v909_v15 }
 0x219   :  { %750 = vmatpush1.bf16.msra.mxu1 %v925_v20 }
 0x21a   :  { %752 = vmatprep.subr.bf16.mxu1 %v929_v21 }
 0x21d   :  { %754 = vmatpush1.bf16.msra.mxu1 %v945_v26 }
 0x21e   :  { %756 = vmatprep.subr.bf16.mxu1 %v949_v27 }
 0x221   :  { %758 = vmatpush1.bf16.msra.mxu1 %v965_v32 }
 0x222   :  { %760 = vmatprep.subr.bf16.mxu1 %v969_v33 }
 0x225   :  { %762 = vmatpush1.bf16.msra.mxu1 %v985_v38 }
 0x226   :  { %764 = vmatprep.subr.bf16.mxu1 %v989_v39 }
 0x229   :  { %766 = vmatpush1.bf16.msra.mxu1 %v1005_v44 }
 0x22a   :  { %768 = vmatprep.subr.bf16.mxu1 %v1009_v45 }
 0x22d   :  { %770 = vmatpush1.bf16.msra.mxu1 %v1019_v48 }
 0x2e3   :  { %v226_v18 = vpop.f32.mrb[0].mxu1 }
 0x2e4   :  { %v228_v19 = vpop.f32.mrb[1].mxu1 }
 0x2e5   :  { %v233_v22 = vcombine.low %v226_v18, %v228_v19 }
 0x2e7   :  { %v240_v24 = vrot.slane %v233_v22, %v1046_v55 }
 0x2e9   :  { %v242_v25 = vadd.f32 %v627_v23, %v240_v24 }
 0x2eb   :  { %v629_v28 = vmul.f32 -1.442695, %v242_v25 }
 0x2ed   :  { %814 = vpow2.f32 %v629_v28  ;;  %v639_v28 = vld [vmem:[%s1140_s0 + $0x10] sm:$0xf] }
 0x2ee   :  { %816 = vtanh.f32 %v242_v25 }
 0x2f7   :  { %v815_v29 = vpop.eup %814 }
 0x2f8   :  { %v246_v30 = vadd.f32 1.0, %v815_v29  ;;  %v817_v31 = vpop.eup %816 }
 0x2f9   :  { %v252_v34 = vrot.slane %v817_v31, 2 }
 0x2fa   :  { %818 = vrcp.f32 %v246_v30 }
 0x304   :  { %v819_v35 = vpop.eup %818 }
 0x305   :  { %262 = vrot.lane.b32.xlu0 %v819_v35, %s848_s18  ;;  %v254_v36 = vmul.f32 %v819_v35, %v252_v34  ;;  %v250_v37 = vmul.f32 %v819_v35, %v143_v7 }
 0x307   :  { %256 = vrot.lane.b32.xlu1 %v254_v36, %s848_s18 }
 0x377   :  { %v263_v43 = vpop.permute.xlu0 %262 }
 0x378   :  { %v264_v46 = vrot.slane %v263_v43, 2 }
 0x379   :  { %v257_v40 = vpop.permute.xlu1 %256 }
 0x37a   :  { %v259_v41 = vadd.f32 %v257_v40, %v250_v37 }
 0x37c   :  { %820 = vtanh.f32 %v259_v41 }
 0x386   :  { %v821_v42 = vpop.eup %820 }
 0x387   :  { %267 = vrot.lane.b32.xlu1 %v821_v42, %s848_s18 }
 0x3f9   :  { %v268_v47 = vpop.permute.xlu1 %267 }
 0x3fa   :  { %v270_v49 = vmul.f32 %v268_v47, %v264_v46 }
 0x3fc   :  { %v271_v50 = vsel %vm155_vm0, %v270_v49, 0.0  ;;  %632 = vmatmul.mubr.msk.f32.vlgmr.msra.gmra.mrb[2].mxu0 %vm155_vm0, %v270_v49 }
 0x3fd   :  { %630 = vst [vmem:[%s1141_s2 + $0x2] sm:$0x3] %v271_v50  ;;  %774 = vmatpush1.bf16.msra.mxu0 %v886_v8  ;;  %572 = vmatprep.mubr.f32.mxu0 %v846_v3 }
 0x3fe   :  { %776 = vmatprep.subr.bf16.mxu0 %v888_v9 }
 0x401   :  { %778 = vmatpush1.bf16.msra.mxu0 %v905_v14  ;;  %v631_v14 = vld [vmem:[%s1140_s0 + $0x8] sm:$0xf] }
 0x402   :  { %780 = vmatprep.subr.bf16.mxu0 %v909_v15 }
 0x405   :  { %782 = vmatpush1.bf16.msra.mxu0 %v925_v20 }
 0x406   :  { %784 = vmatprep.subr.bf16.mxu0 %v929_v21 }
 0x409   :  { %786 = vmatpush1.bf16.msra.mxu0 %v945_v26 }
 0x40a   :  { %788 = vmatprep.subr.bf16.mxu0 %v949_v27 }
 0x40d   :  { %790 = vmatpush1.bf16.msra.mxu0 %v965_v32 }
 0x40e   :  { %792 = vmatprep.subr.bf16.mxu0 %v969_v33 }
 0x411   :  { %794 = vmatpush1.bf16.msra.mxu0 %v985_v38 }
 0x412   :  { %796 = vmatprep.subr.bf16.mxu0 %v989_v39 }
 0x415   :  { %798 = vmatpush1.bf16.msra.mxu0 %v1005_v44 }
 0x416   :  { %800 = vmatprep.subr.bf16.mxu0 %v1009_v45 }
 0x419   :  { %802 = vmatpush1.bf16.msra.mxu0 %v1019_v48 }
 0x4cf   :  { %v342_v3 = vpop.f32.mrb[2].mxu0 }
 0x4d0   :  { %v344_v8 = vpop.f32.mrb[3].mxu0 }
 0x4d1   :  { %v349_v9 = vcombine.low %v342_v3, %v344_v8 }
 0x4d3   :  { %v356_v15 = vrot.slane %v349_v9, %v1046_v55 }
 0x4d5   :  { %v358_v20 = vadd.f32 %v631_v14, %v356_v15 }
 0x4d7   :  { %v633_v21 = vmul.f32 -1.442695, %v358_v20 }
 0x4d9   :  { %822 = vpow2.f32 %v633_v21 }
 0x4da   :  { %824 = vtanh.f32 %v358_v20 }
 0x4e3   :  { %v823_v26 = vpop.eup %822 }
 0x4e4   :  { %v362_v27 = vadd.f32 1.0, %v823_v26  ;;  %v825_v32 = vpop.eup %824 }
 0x4e5   :  { %v368_v33 = vrot.slane %v825_v32, 2 }
 0x4e6   :  { %826 = vrcp.f32 %v362_v27 }
 0x4f0   :  { %v827_v38 = vpop.eup %826 }
 0x4f1   :  { %378 = vrot.lane.b32.xlu1 %v827_v38, %s848_s18  ;;  %v370_v39 = vmul.f32 %v827_v38, %v368_v33  ;;  %v366_v44 = vmul.f32 %v827_v38, %v259_v41 }
 0x4f3   :  { %372 = vrot.lane.b32.xlu0 %v370_v39, %s848_s18 }
 0x563   :  { %v379_v52 = vpop.permute.xlu1 %378 }
 0x564   :  { %v380_v53 = vrot.slane %v379_v52, 2 }
 0x565   :  { %v373_v45 = vpop.permute.xlu0 %372 }
 0x566   :  { %v375_v48 = vadd.f32 %v373_v45, %v366_v44 }
 0x568   :  { %828 = vtanh.f32 %v375_v48 }
 0x572   :  { %v829_v51 = vpop.eup %828 }
 0x573   :  { %383 = vrot.lane.b32.xlu0 %v829_v51, %s848_s18 }
 0x5e5   :  { %v384_v54 = vpop.permute.xlu0 %383 }
 0x5e6   :  { %v386_v56 = vmul.f32 %v384_v54, %v380_v53 }
 0x5e8   :  { %v387_v57 = vsel %vm155_vm0, %v386_v56, 0.0  ;;  %636 = vmatmul.mubr.msk.f32.vlgmr.msra.gmra.mrb[2].mxu1 %vm155_vm0, %v386_v56 }
 0x5e9   :  { %634 = vst [vmem:[%s1141_s2 + $0x4] sm:$0x3] %v387_v57 }
 0x6bb   :  { %v458_v58 = vpop.f32.mrb[2].mxu1 }
 0x6bc   :  { %v460_v59 = vpop.f32.mrb[3].mxu1 }
 0x6bd   :  { %v465_v60 = vcombine.low %v458_v58, %v460_v59 }
 0x6bf   :  { %v472_v62 = vrot.slane %v465_v60, %v1046_v55 }
 0x6c1   :  { %v474_v63 = vadd.f32 %v635_v61, %v472_v62 }
 0x6c3   :  { %v637_v0 = vmul.f32 -1.442695, %v474_v63 }
 0x6c5   :  { %830 = vpow2.f32 %v637_v0 }
 0x6c6   :  { %832 = vtanh.f32 %v474_v63 }
 0x6cf   :  { %v831_v1 = vpop.eup %830 }
 0x6d0   :  { %v478_v2 = vadd.f32 1.0, %v831_v1  ;;  %v833_v4 = vpop.eup %832 }
 0x6d1   :  { %v484_v5 = vrot.slane %v833_v4, 2 }
 0x6d2   :  { %834 = vrcp.f32 %v478_v2 }
 0x6dc   :  { %v835_v6 = vpop.eup %834 }
 0x6dd   :  { %494 = vrot.lane.b32.xlu0 %v835_v6, %s848_s18  ;;  %v486_v7 = vmul.f32 %v835_v6, %v484_v5  ;;  %v482_v10 = vmul.f32 %v835_v6, %v375_v48 }
 0x6df   :  { %488 = vrot.lane.b32.xlu1 %v486_v7, %s848_s18 }
 0x74f   :  { %v495_v16 = vpop.permute.xlu0 %494 }
 0x750   :  { %v496_v17 = vrot.slane %v495_v16, 2 }
 0x751   :  { %v489_v11 = vpop.permute.xlu1 %488 }
 0x752   :  { %v491_v12 = vadd.f32 %v489_v11, %v482_v10 }
 0x754   :  { %836 = vtanh.f32 %v491_v12 }
 0x75e   :  { %v837_v13 = vpop.eup %836 }
 0x75f   :  { %499 = vrot.lane.b32.xlu1 %v837_v13, %s848_s18 }
 0x7d1   :  { %v500_v18 = vpop.permute.xlu1 %499 }
 0x7d2   :  { %v502_v19 = vmul.f32 %v500_v18, %v496_v17 }
 0x7d4   :  { %v503_v22 = vsel %vm155_vm0, %v502_v19, 0.0  ;;  %640 = vmatmul.mubr.msk.f32.vlgmr.msra.gmra.mrb[4].mxu0 %vm155_vm0, %v502_v19 }
 0x7d5   :  { %638 = vst [vmem:[%s1141_s2 + $0x6] sm:$0x3] %v503_v22 }
 0x8a7   :  { %v574_v23 = vpop.f32.mrb[4].mxu0 }
 0x8a8   :  { %v576_v24 = vpop.f32.mrb[5].mxu0 }
 0x8a9   :  { %v581_v25 = vcombine.low %v574_v23, %v576_v24 }
 0x8ab   :  { %v588_v29 = vrot.slane %v581_v25, %v1046_v55 }
 0x8ad   :  { %v590_v30 = vadd.f32 %v639_v28, %v588_v29 }
 0x8af   :  { %v641_v31 = vmul.f32 -1.442695, %v590_v30 }
 0x8b1   :  { %838 = vpow2.f32 %v641_v31 }
 0x8b2   :  { %840 = vtanh.f32 %v590_v30 }
 0x8bb   :  { %v839_v34 = vpop.eup %838 }
 0x8bc   :  { %v594_v35 = vadd.f32 1.0, %v839_v34  ;;  %v841_v36 = vpop.eup %840 }
 0x8bd   :  { %v600_v37 = vrot.slane %v841_v36, 2 }
 0x8be   :  { %842 = vrcp.f32 %v594_v35 }
 0x8c8   :  { %v843_v40 = vpop.eup %842 }
 0x8c9   :  { %610 = vrot.lane.b32.xlu1 %v843_v40, %s848_s18  ;;  %v602_v41 = vmul.f32 %v843_v40, %v600_v37  ;;  %v598_v42 = vmul.f32 %v843_v40, %v491_v12 }
 0x8cb   :  { %604 = vrot.lane.b32.xlu0 %v602_v41, %s848_s18 }
 0x93b   :  { %v611_v47 = vpop.permute.xlu1 %610 }
 0x93c   :  { %v612_v49 = vrot.slane %v611_v47, 2 }
 0x93d   :  { %v605_v43 = vpop.permute.xlu0 %604 }
 0x93e   :  { %v607_v46 = vadd.f32 %v605_v43, %v598_v42 }
 0x940   :  { %844 = vtanh.f32 %v607_v46 }
 0x94a   :  { %v845_v55 = vpop.eup %844 }
 0x94b   :  { %615 = vrot.lane.b32.xlu0 %v845_v55, %s848_s18 }
 0x9bd   :  { %v616_v50 = vpop.permute.xlu0 %615 }
 0x9be   :  { %v618_v3 = vmul.f32 %v616_v50, %v612_v49 }
 0x9c0   :  { %v619_v8 = vsel %vm155_vm0, %v618_v3, 0.0 }
 0x9c1   :  { %642 = vst [vmem:[%s1141_s2 + $0x8] sm:$0x3] %v619_v8 }

// kernel: lstm_context_forward.9
= control target key start
LH: loop header
LB: loop body
LE: loop exit
PB: predicated region body
PF: predicated region fallthrough
CT: control target
= control target key end

     0   :  { %v390_v0 = vmov 0.0   ;;  %vm391_vm0 = vmmov 0   ;;  %vm53_vm1 = vcmask 261120   ;;  %v392_v25 = vmov 0   ;;  %s526_s4 = inlined_call_operand.vmem [shape: bf16[32,128], index: 4, kind: input, shape index: {}]   ;;  %s527_s1 = inlined_call_operand.vmem [shape: f32[8,32], index: 1, kind: input, shape index: {}]   ;;  %s528_s3 = inlined_call_operand.vmem [shape: bf16[32,128], index: 3, kind: input, shape index: {}]   ;;  %s529_s6 = inlined_call_operand.vmem [shape: bf16[128,192], index: 6, kind: input, shape index: {}]   ;;  %s530_s0 = inlined_call_operand.vmem [shape: f32[8,32], index: 0, kind: input, shape index: {}]   ;;  %s531_s5 = inlined_call_operand.vmem [shape: f32[1,128], index: 5, kind: input, shape index: {}]   ;;  %s532_s7 = inlined_call_operand.vmem [shape: f32[8,128], index: 7, kind: output, shape index: {0}]   ;;  %s533_s2 = inlined_call_operand.vmem [shape: f32[8,192], index: 2, kind: input, shape index: {}]   ;;  %s534_s8 = inlined_call_operand.vmem [shape: f32[8,192], index: 8, kind: output, shape index: {1}]  }
   0x1   :  { %343 = vmatprep.subr.bf16.mxu1 %v390_v0  ;;  %v362_v1 = vld [vmem:[%s526_s4] sm:$0xff]   ;;  %347 = vmatprep.mubr.msk.bf16.mxu1 %vm391_vm0, %v390_v0  ;;  %v363_v2 = vld [vmem:[%s526_s4 + $0x8] sm:$0xff]   ;;  %v369_v8 = vld [vmem:[%s529_s6 + $0x14] ss:$8 sps:$4 sm:$0xff]   ;;  %vm304_vm2 = vcmask 523264  }
   0x2   :  { %344 = vmatpush3.bf16.msra.mxu1 %v362_v1  ;;  %v35_v3 = vld [vmem:[%s527_s1] sm:$0xff]  ;;  %v365_v9 = vld [vmem:[%s528_s3 + $0x8] sm:$0xff]   ;;  %v371_v10 = vld [vmem:[%s529_s6 + $0x10] ss:$8 sps:$4 sm:$0xff]   ;;  %292 = vmatprep.mubr.bf16.mxu0 %v392_v25 }
   0x3   :  { %345 = vmatprep.subr.bf16.mxu1 %v390_v0  ;;  %v364_v4 = vld [vmem:[%s528_s3] sm:$0xff]   ;;  %v36_v5 = vpack.c.bf16 %v35_v3, %v35_v3  ;;  %v375_v15 = vld [vmem:[%s529_s6 + $0x34] ss:$8 sps:$4 sm:$0xff]   ;;  %v377_v16 = vld [vmem:[%s529_s6 + $0x30] ss:$8 sps:$4 sm:$0xff]  }
   0x4   :  { %v366_v6 = vld [vmem:[%s529_s6 + $0x4] ss:$8 sps:$4 sm:$0xff]   ;;  %v368_v7 = vld [vmem:[%s529_s6] ss:$8 sps:$4 sm:$0xff]   ;;  %v381_v19 = vld [vmem:[%s529_s6 + $0x54] ss:$8 sps:$4 sm:$0xff]  }
   0x5   :  { %260 = vmatprep.subr.bf16.mxu0 %v366_v6  ;;  %v29_v11 = vld [vmem:[%s530_s0] sm:$0xff]  ;;  %v383_v20 = vld [vmem:[%s529_s6 + $0x50] ss:$8 sps:$4 sm:$0xff]   ;;  %v387_v23 = vld [vmem:[%s529_s6 + $0x74] ss:$8 sps:$4 sm:$0xff]  }
   0x6   :  { %346 = vmatpush3.bf16.msra.mxu1 %v363_v2  ;;  %261 = vmatpush1.bf16.msra.mxu0 %v368_v7  ;;  %v372_v12 = vld [vmem:[%s529_s6 + $0x24] ss:$8 sps:$4 sm:$0xff]   ;;  %v374_v13 = vld [vmem:[%s529_s6 + $0x20] ss:$8 sps:$4 sm:$0xff]   ;;  %v30_v14 = vpack.c.bf16 %v29_v11, %v29_v11  ;;  %v389_v24 = vld [vmem:[%s529_s6 + $0x70] ss:$8 sps:$4 sm:$0xff]  }
   0x7   :  { %351 = vmatprep.subr.bf16.mxu1 %v390_v0  ;;  %262 = vmatprep.subr.bf16.mxu0 %v369_v8  ;;  %v378_v17 = vld [vmem:[%s529_s6 + $0x44] ss:$8 sps:$4 sm:$0xff]   ;;  %v380_v18 = vld [vmem:[%s529_s6 + $0x40] ss:$8 sps:$4 sm:$0xff]  }
   0x8   :  { %v384_v21 = vld [vmem:[%s529_s6 + $0x64] ss:$8 sps:$4 sm:$0xff]   ;;  %v386_v22 = vld [vmem:[%s529_s6 + $0x60] ss:$8 sps:$4 sm:$0xff]  }
   0x9   :  { %348 = vmatmul.mubr.msk.bf16.vlgmr.msra.gmra.mrb[0].mxu1 %vm53_vm1, %v36_v5  ;;  %v320_v31 = vld [vmem:[%s531_s5] ss:$0 sm:$0xff]  ;;  %v162_v39 = vld [vmem:[%s533_s2 + $0x8] sm:$0xff] }
   0xa   :  { %352 = vmatpush3.bf16.msra.mxu1 %v364_v4  ;;  %355 = vmatprep.mubr.msk.bf16.mxu1 %vm391_vm0, %v390_v0  ;;  %v161_v38 = vld [vmem:[%s533_s2] sm:$0xff] }
   0xb   :  { %353 = vmatprep.subr.bf16.mxu1 %v390_v0  ;;  %263 = vmatpush1.bf16.msra.mxu0 %v371_v10 }
   0xc   :  { %264 = vmatprep.subr.bf16.mxu0 %v372_v12 }
   0xe   :  { %354 = vmatpush3.bf16.msra.mxu1 %v365_v9 }
   0xf   :  { %265 = vmatpush1.bf16.msra.mxu0 %v374_v13 }
  0x10   :  { %266 = vmatprep.subr.bf16.mxu0 %v375_v15 }
  0x11   :  { %356 = vmatmul.mubr.msk.bf16.vlgmr.msra.gmra.mrb[4].mxu1 %vm53_vm1, %v30_v14 }
  0x13   :  { %267 = vmatpush1.bf16.msra.mxu0 %v377_v16 }
  0x14   :  { %268 = vmatprep.subr.bf16.mxu0 %v378_v17 }
  0x17   :  { %269 = vmatpush1.bf16.msra.mxu0 %v380_v18 }
  0x18   :  { %270 = vmatprep.subr.bf16.mxu0 %v381_v19 }
  0x1b   :  { %271 = vmatpush1.bf16.msra.mxu0 %v383_v20 }
  0x1c   :  { %272 = vmatprep.subr.bf16.mxu0 %v384_v21 }
  0x1f   :  { %273 = vmatpush1.bf16.msra.mxu0 %v386_v22 }
  0x20   :  { %274 = vmatprep.subr.bf16.mxu0 %v387_v23 }
  0x23   :  { %275 = vmatpush1.bf16.msra.mxu0 %v389_v24 }
  0xdc   :  { %v91_v26 = vpop.f32.mrb[0].mxu1 }
  0xdd   :  { %v349_v27 = vpop.f32.mrb[1].mxu1 }
  0xde   :  { %v94_v28 = vpop.f32.mrb[2].mxu1 }
  0xdf   :  { %v350_v29 = vpop.f32.mrb[3].mxu1 }
  0xe4   :  { %v146_v30 = vpop.f32.mrb[4].mxu1 }
  0xe5   :  { %v147_v32 = vadd.f32 %v146_v30, %v91_v26  ;;  %v357_v33 = vpop.f32.mrb[5].mxu1 }
  0xe6   :  { %v149_v34 = vpop.f32.mrb[6].mxu1 }
  0xe7   :  { %v159_v35 = vadd.f32 %v320_v31, %v147_v32  ;;  %v358_v36 = vpop.f32.mrb[7].mxu1 }
  0xe9   :  { %160 = vst [vmem:[%s532_s7] sm:$0xff] %v159_v35  ;;  %v163_v37 = vpack.c.bf16 %v159_v35, %v159_v35 }
  0xeb   :  { %293 = vmatmul.mubr.bf16.vlgmr.msra.gmra.mrb[0].mxu0 %v163_v37 }
 0x1be   :  { %v294_v40 = vpop.f32.mrb[0].mxu0 }
 0x1bf   :  { %v301_v41 = vadd.f32 %v294_v40, %v161_v38  ;;  %v296_v42 = vpop.f32.mrb[1].mxu0 }
 0x1c0   :  { %v302_v43 = vadd.f32 %v296_v42, %v162_v39  ;;  %v298_v44 = vpop.f32.mrb[2].mxu0 }
 0x1c1   :  { %303 = vst [vmem:[%s534_s8] sm:$0xff] %v301_v41  ;;  %v299_v45 = vpop.f32.mrb[3].mxu0 }
 0x1c2   :  { %305 = vst.msk [vmem:[%s534_s8 + $0x8] sm:$0xff] %vm304_vm2, %v302_v43 }

// kernel: lstm_context_forward.7
= control target key start
LH: loop header
LB: loop body
LE: loop exit
PB: predicated region body
PF: predicated region fallthrough
CT: control target
= control target key end

     0   :  { %vm43_vm0 = vcmask 130048   ;;  %vm127_vm1 = vcmask 1043456   ;;  %vm128_vm2 = vcmask 1044480   ;;  %v1066_v1 = vmov 0.0   ;;  %s1363_s1 = inlined_call_operand.vmem [shape: f32[8,16], index: 1, kind: input, shape index: {}]   ;;  %s1364_s4 = inlined_call_operand.vmem [shape: bf16[9,32], index: 4, kind: input, shape index: {}]   ;;  %s1365_s2 = inlined_call_operand.vmem [shape: f32[8,9], index: 2, kind: input, shape index: {}]   ;;  %s1366_s3 = inlined_call_operand.vmem [shape: bf16[16,32], index: 3, kind: input, shape index: {}]   ;;  %s1367_s6 = inlined_call_operand.vmem [shape: bf16[32,128], index: 6, kind: input, shape index: {}]   ;;  %s1368_s9 = inlined_call_operand.vmem [shape: bf16[32,512], index: 9, kind: input, shape index: {}]   ;;  %s1369_s5 = inlined_call_operand.vmem [shape: f32[1,32], index: 5, kind: input, shape index: {}]   ;;  %s1370_s8 = inlined_call_operand.vmem [shape: bf16[64,512], index: 8, kind: input, shape index: {}]   ;;  %s1371_s10 = inlined_call_operand.vmem [shape: bf16[128,512], index: 10, kind: input, shape index: {}]   ;;  %s1372_s0 = inlined_call_operand.vmem [shape: f32[8,64], index: 0, kind: input, shape index: {}]   ;;  %s1373_s7 = inlined_call_operand.vmem [shape: f32[1,128], index: 7, kind: input, shape index: {}]   ;;  %s1374_s11 = inlined_call_operand.vmem [shape: f32[1,512], index: 11, kind: input, shape index: {}]   ;;  %s1375_s12 = inlined_call_operand.vmem [shape: f32[8,512], index: 12, kind: output, shape index: {}]  }
   0x1   :  { %v42_v0 = vld [vmem:[%s1363_s1] sm:$0xff]  ;;  %956 = vmatprep.subr.bf16.mxu1 %v1066_v1  ;;  %950 = vmatprep.subr.bf16.mxu0 %v1066_v1  ;;  %v1067_v4 = vmov 65535   ;;  %vm1068_vm3 = vmmov 0   ;;  %vm123_vm4 = vcmask 72704   ;;  %v977_v31 = vld [vmem:[%s1367_s6 + $0x8] sm:$0xff]   ;;  %vm198_vm5 = vcmask 261120  }
   0x2   :  { %v44_v2 = vsel %vm43_vm0, %v42_v0, -inf  ;;  %v974_v3 = vld [vmem:[%s1364_s4] sm:$0x1f]   ;;  %v129_v5 = vsel %vm127_vm1, 4294967295, %v1067_v4  ;;  %958 = vmatprep.mubr.msk.bf16.mxu1 %vm1068_vm3, %v1066_v1  ;;  %952 = vmatprep.mubr.msk.bf16.mxu0 %vm1068_vm3, %v1066_v1  ;;  %v983_v32 = vld [vmem:[%s1368_s9 + $0xc] ss:$16 sps:$4 sm:$0xff]  }
   0x3   :  { %v107_v6 = vld [vmem:[%s1365_s2] sm:$0xff]  ;;  %45 = vmax.xlane.f32.xlu0 %v44_v2  ;;  %v130_v7 = vsel %vm128_vm2, %v129_v5, 0  ;;  %v981_v34 = vld [vmem:[%s1368_s9 + $0x8] ss:$16 sps:$4 sm:$0xff]   ;;  %v989_v35 = vld [vmem:[%s1368_s9 + $0x2c] ss:$16 sps:$4 sm:$0xff]  }
   0x4   :  { %v132_v8 = vand.u32 %v974_v3, %v130_v7  ;;  %v108_v9 = vpack.c.bf16 %v107_v6, %v107_v6  ;;  %v975_v15 = vld [vmem:[%s1366_s3] sm:$0xff]   ;;  %v987_v36 = vld [vmem:[%s1368_s9 + $0x28] ss:$16 sps:$4 sm:$0xff]   ;;  %v1069_v38 = vmov 0   ;;  %v995_v39 = vld [vmem:[%s1370_s8 + $0xc] ss:$16 sps:$4 sm:$0xff]  }
   0x5   :  { %951 = vmatpush3.bf16.msra.mxu0 %v975_v15  ;;  %v978_v16 = vld [vmem:[%s1368_s9] ss:$16 sps:$4 sm:$0xff]   ;;  %v980_v17 = vld [vmem:[%s1368_s9 + $0x4] ss:$16 sps:$4 sm:$0xff]   ;;  %v993_v42 = vld [vmem:[%s1370_s8 + $0x8] ss:$16 sps:$4 sm:$0xff]  }
   0x6   :  { %957 = vmatpush3.bf16.msra.mxu1 %v132_v8  ;;  %962 = vmatprep.subr.bf16.mxu0 %v1066_v1  ;;  %v986_v18 = vld [vmem:[%s1368_s9 + $0x24] ss:$16 sps:$4 sm:$0xff]   ;;  %v984_v19 = vld [vmem:[%s1368_s9 + $0x20] ss:$16 sps:$4 sm:$0xff]   ;;  %v1001_v46 = vld [vmem:[%s1370_s8 + $0x2c] ss:$16 sps:$4 sm:$0xff]  }
   0x7   :  { %313 = vmatprep.subr.bf16.mxu1 %v980_v17  ;;  %v976_v27 = vld [vmem:[%s1367_s6] sm:$0xff]   ;;  %v999_v50 = vld [vmem:[%s1370_s8 + $0x28] ss:$16 sps:$4 sm:$0xff]   ;;  %v1007_v52 = vld [vmem:[%s1370_s8 + $0x4c] ss:$16 sps:$4 sm:$0xff]   ;;  %vm475_vm6 = vcmask 523264  }
   0x8   :  { %v876_v28 = vld [vmem:[%s1369_s5] ss:$0 sm:$0xff]  ;;  %v992_v37 = vld [vmem:[%s1370_s8 + $0x4] ss:$16 sps:$4 sm:$0xff]   ;;  %v1005_v54 = vld [vmem:[%s1370_s8 + $0x48] ss:$16 sps:$4 sm:$0xff]  }
   0x9   :  { %959 = vmatmul.mubr.msk.bf16.vlgmr.msra.gmra.mrb[0].mxu1 %vm123_vm4, %v108_v9  ;;  %v990_v41 = vld [vmem:[%s1370_s8] ss:$16 sps:$4 sm:$0xff]   ;;  %v998_v45 = vld [vmem:[%s1370_s8 + $0x24] ss:$16 sps:$4 sm:$0xff]   ;;  %v1013_v57 = vld [vmem:[%s1370_s8 + $0x6c] ss:$16 sps:$4 sm:$0xff]  }
   0xa   :  { %314 = vmatpush1.bf16.msra.mxu1 %v978_v16  ;;  %345 = vmatprep.mubr.bf16.mxu1 %v1069_v38  ;;  %v996_v49 = vld [vmem:[%s1370_s8 + $0x20] ss:$16 sps:$4 sm:$0xff]   ;;  %v1004_v51 = vld [vmem:[%s1370_s8 + $0x44] ss:$16 sps:$4 sm:$0xff]   ;;  %v1011_v62 = vld [vmem:[%s1370_s8 + $0x68] ss:$16 sps:$4 sm:$0xff]  }
   0xb   :  { %315 = vmatprep.subr.bf16.mxu1 %v986_v18  ;;  %v1002_v53 = vld [vmem:[%s1370_s8 + $0x40] ss:$16 sps:$4 sm:$0xff]   ;;  %v1010_v56 = vld [vmem:[%s1370_s8 + $0x64] ss:$16 sps:$4 sm:$0xff]   ;;  %v1017_v4 = vld [vmem:[%s1371_s10 + $0x8] ss:$16 sps:$4 sm:$0xff]  }
   0xc   :  { %v1008_v61 = vld [vmem:[%s1370_s8 + $0x60] ss:$16 sps:$4 sm:$0xff]   ;;  %v1022_v5 = vld [vmem:[%s1371_s10 + $0x24] ss:$16 sps:$4 sm:$0xff]   ;;  %v1025_v6 = vld [vmem:[%s1371_s10 + $0x2c] ss:$16 sps:$4 sm:$0xff]  }
   0xd   :  { %v243_v63 = vld [vmem:[%s1372_s0] sm:$0xff]  ;;  %v1023_v8 = vld [vmem:[%s1371_s10 + $0x28] ss:$16 sps:$4 sm:$0xff]   ;;  %v1043_v18 = vld [vmem:[%s1371_s10 + $0x8c] ss:$16 sps:$4 sm:$0xff]  }
   0xe   :  { %316 = vmatpush1.bf16.msra.mxu1 %v984_v19  ;;  %v244_v2 = vpack.c.bf16 %v243_v63, %v243_v63  ;;  %v1014_v3 = vld [vmem:[%s1371_s10] ss:$16 sps:$4 sm:$0xff]   ;;  %v1028_v9 = vld [vmem:[%s1371_s10 + $0x44] ss:$16 sps:$4 sm:$0xff]   ;;  %v1035_v16 = vld [vmem:[%s1371_s10 + $0x68] ss:$16 sps:$4 sm:$0xff]  }
   0xf   :  { %479 = vmatprep.subr.bf16.mxu1 %v992_v37  ;;  %v1020_v7 = vld [vmem:[%s1371_s10 + $0x20] ss:$16 sps:$4 sm:$0xff]   ;;  %v1040_v17 = vld [vmem:[%s1371_s10 + $0x84] ss:$16 sps:$4 sm:$0xff]  }
  0x10   :  { %v1032_v15 = vld [vmem:[%s1371_s10 + $0x60] ss:$16 sps:$4 sm:$0xff]  }
  0x11   :  { %v1038_v19 = vld [vmem:[%s1371_s10 + $0x80] ss:$16 sps:$4 sm:$0xff]  }
  0x90   :  { %v46_v10 = vpop.xlane.xlu0 %45 }
  0x91   :  { %v47_v11 = vsub.f32 %v42_v0, %v46_v10  ;;  %v1016_v0 = vld [vmem:[%s1371_s10 + $0x4] ss:$16 sps:$4 sm:$0xff]   ;;  %v1031_v10 = vld [vmem:[%s1371_s10 + $0x4c] ss:$16 sps:$4 sm:$0xff]  }
  0x93   :  { %v48_v12 = vmul.f32 1.442695, %v47_v11  ;;  %v1026_v11 = vld [vmem:[%s1371_s10 + $0x40] ss:$16 sps:$4 sm:$0xff]  }
  0x95   :  { %1062 = vpow2.f32 %v48_v12  ;;  %v1029_v12 = vld [vmem:[%s1371_s10 + $0x48] ss:$16 sps:$4 sm:$0xff]  }
  0x9f   :  { %v1063_v13 = vpop.eup %1062 }
  0xa0   :  { %v50_v14 = vsel %vm43_vm0, %v1063_v13, 0.0 }
  0xa1   :  { %51 = vadd.xlane.f32.xlu0 %v50_v14  ;;  %v1037_v14 = vld [vmem:[%s1371_s10 + $0x6c] ss:$16 sps:$4 sm:$0xff]  }
  0xdc   :  { %v168_v20 = vpop.f32.mrb[0].mxu1 }
  0xdd   :  { %v960_v21 = vpop.f32.mrb[1].mxu1  ;;  %v169_v30 = vadd.f32 %v876_v28, %v168_v20  ;;  %v1041_v20 = vld [vmem:[%s1371_s10 + $0x88] ss:$16 sps:$4 sm:$0xff]  }
  0xde   :  { %v171_v22 = vpop.f32.mrb[2].mxu1  ;;  %v1046_v21 = vld [vmem:[%s1371_s10 + $0xa4] ss:$16 sps:$4 sm:$0xff]  }
  0xdf   :  { %v961_v23 = vpop.f32.mrb[3].mxu1  ;;  %v174_v33 = vpack.c.bf16 %v169_v30, %v169_v30  ;;  %v1049_v22 = vld [vmem:[%s1371_s10 + $0xac] ss:$16 sps:$4 sm:$0xff]   ;;  %v1053_v30 = vld [vmem:[%s1371_s10 + $0xc8] ss:$16 sps:$4 sm:$0xff]  }
  0xe0   :  { %v1044_v23 = vld [vmem:[%s1371_s10 + $0xa0] ss:$16 sps:$4 sm:$0xff]  }
 0x12e   :  { %v52_v24 = vpop.xlane.xlu0 %51 }
 0x12f   :  { %1064 = vrcp.f32 %v52_v24  ;;  %v1047_v24 = vld [vmem:[%s1371_s10 + $0xa8] ss:$16 sps:$4 sm:$0xff]  }
 0x139   :  { %v1065_v25 = vpop.eup %1064 }
 0x13a   :  { %v54_v26 = vmul.f32 %v1065_v25, %v1063_v13  ;;  %v1034_v13 = vld [vmem:[%s1371_s10 + $0x64] ss:$16 sps:$4 sm:$0xff]   ;;  %v879_v25 = vld [vmem:[%s1373_s7] ss:$0 sm:$0xff] }
 0x13c   :  { %v55_v29 = vpack.c.bf16 %v54_v26, %v54_v26  ;;  %v1052_v26 = vld [vmem:[%s1371_s10 + $0xc4] ss:$16 sps:$4 sm:$0xff]  }
 0x13e   :  { %953 = vmatmul.mubr.msk.bf16.vlgmr.msra.gmra.mrb[0].mxu0 %vm43_vm0, %v55_v29  ;;  %v1050_v29 = vld [vmem:[%s1371_s10 + $0xc0] ss:$16 sps:$4 sm:$0xff]  }
 0x13f   :  { %963 = vmatpush3.bf16.msra.mxu0 %v976_v27  ;;  %966 = vmatprep.mubr.msk.bf16.mxu0 %vm1068_vm3, %v1066_v1  ;;  %v1055_v27 = vld [vmem:[%s1371_s10 + $0xcc] ss:$16 sps:$4 sm:$0xff]  }
 0x140   :  { %964 = vmatprep.subr.bf16.mxu0 %v1066_v1  ;;  %v1019_v1 = vld [vmem:[%s1371_s10 + $0xc] ss:$16 sps:$4 sm:$0xff]  }
 0x143   :  { %965 = vmatpush3.bf16.msra.mxu0 %v977_v31  ;;  %v1058_v31 = vld [vmem:[%s1371_s10 + $0xe4] ss:$16 sps:$4 sm:$0xff]  }
 0x144   :  { %354 = vmatprep.subr.bf16.mxu0 %v983_v32  ;;  %v1061_v32 = vld [vmem:[%s1371_s10 + $0xec] ss:$16 sps:$4 sm:$0xff]  }
 0x146   :  { %967 = vmatmul.mubr.msk.bf16.vlgmr.msra.gmra.mrb[4].mxu0 %vm198_vm5, %v174_v33 }
 0x147   :  { %355 = vmatpush1.bf16.msra.mxu0 %v981_v34  ;;  %386 = vmatprep.mubr.bf16.mxu0 %v1069_v38  ;;  %v1056_v34 = vld [vmem:[%s1371_s10 + $0xe0] ss:$16 sps:$4 sm:$0xff]  }
 0x148   :  { %356 = vmatprep.subr.bf16.mxu0 %v989_v35  ;;  %v1059_v35 = vld [vmem:[%s1371_s10 + $0xe8] ss:$16 sps:$4 sm:$0xff]  }
 0x14b   :  { %357 = vmatpush1.bf16.msra.mxu0 %v987_v36 }
 0x14c   :  { %520 = vmatprep.subr.bf16.mxu0 %v995_v39 }
 0x211   :  { %v101_v40 = vpop.f32.mrb[0].mxu0 }
 0x212   :  { %v261_v43 = vpack.c.bf16 %v101_v40, %v101_v40  ;;  %v954_v44 = vpop.f32.mrb[1].mxu0 }
 0x213   :  { %v104_v47 = vpop.f32.mrb[2].mxu0 }
 0x214   :  { %v955_v48 = vpop.f32.mrb[3].mxu0  ;;  %891 = vmatmul.mubr.msk.bf16.vlgmr.msra.gmra.mrb[4].mxu1 %vm198_vm5, %v261_v43  ;;  %892 = vmatmul.mubr.msk.bf16.vlgmr.msra.gmra.mrb[8].mxu0 %vm198_vm5, %v261_v43 }
 0x215   :  { %480 = vmatpush1.bf16.msra.mxu1 %v990_v41  ;;  %521 = vmatpush1.bf16.msra.mxu0 %v993_v42 }
 0x216   :  { %481 = vmatprep.subr.bf16.mxu1 %v998_v45  ;;  %522 = vmatprep.subr.bf16.mxu0 %v1001_v46 }
 0x217   :  { %511 = vmatprep.mubr.bf16.mxu1 %v1069_v38  ;;  %552 = vmatprep.mubr.bf16.mxu0 %v1069_v38 }
 0x219   :  { %482 = vmatpush1.bf16.msra.mxu1 %v996_v49  ;;  %523 = vmatpush1.bf16.msra.mxu0 %v999_v50  ;;  %v1229_v55 = vpop.f32.mrb[4].mxu0 }
 0x21a   :  { %483 = vmatprep.subr.bf16.mxu1 %v1004_v51  ;;  %524 = vmatprep.subr.bf16.mxu0 %v1007_v52  ;;  %v968_v58 = vpop.f32.mrb[5].mxu0  ;;  %v237_v28 = vadd.f32 %v879_v25, %v1229_v55 }
 0x21b   :  { %v239_v59 = vpop.f32.mrb[6].mxu0 }
 0x21c   :  { %v969_v60 = vpop.f32.mrb[7].mxu0  ;;  %v242_v33 = vmax.f32 %v237_v28, 0.0 }
 0x21d   :  { %484 = vmatpush1.bf16.msra.mxu1 %v1002_v53  ;;  %525 = vmatpush1.bf16.msra.mxu0 %v1005_v54 }
 0x21e   :  { %485 = vmatprep.subr.bf16.mxu1 %v1010_v56  ;;  %526 = vmatprep.subr.bf16.mxu0 %v1013_v57  ;;  %v561_v36 = vpack.c.bf16 %v242_v33, %v242_v33  ;;  %v842_v57 = vlaneseq }
 0x220   :  { %v843_v58 = vshrl.u32 %v842_v57, 7 }
 0x221   :  { %486 = vmatpush1.bf16.msra.mxu1 %v1008_v61  ;;  %527 = vmatpush1.bf16.msra.mxu0 %v1011_v62  ;;  %v840_v61 = vld [vmem:[%s1374_s11] sm:$0xf] }
 0x222   :  { %754 = vmatprep.subr.bf16.mxu1 %v1016_v0  ;;  %795 = vmatprep.subr.bf16.mxu0 %v1019_v1  ;;  %v844_v59 = vsub.s32 0, %v843_v58  ;;  %v852_v60 = vsub.s32 2, %v843_v58  ;;  %v848_v62 = vsub.s32 1, %v843_v58  ;;  %v856_v63 = vsub.s32 3, %v843_v58 }
 0x224   :  { %909 = vmatmul.mubr.msk.bf16.vlgmr.msra.gmra.mrb[8].mxu1 %vm475_vm6, %v244_v2  ;;  %910 = vmatmul.mubr.msk.bf16.vlgmr.msra.gmra.mrb[12].mxu0 %vm475_vm6, %v244_v2  ;;  %v845_v0 = vrot.slane %v840_v61, %v844_v59  ;;  %v853_v1 = vrot.slane %v840_v61, %v852_v60 }
 0x225   :  { %755 = vmatpush1.bf16.msra.mxu1 %v1014_v3  ;;  %796 = vmatpush1.bf16.msra.mxu0 %v1017_v4  ;;  %v849_v4 = vrot.slane %v840_v61, %v848_v62 }
 0x226   :  { %756 = vmatprep.subr.bf16.mxu1 %v1022_v5  ;;  %797 = vmatprep.subr.bf16.mxu0 %v1025_v6  ;;  %v857_v5 = vrot.slane %v840_v61, %v856_v63 }
 0x227   :  { %786 = vmatprep.mubr.bf16.mxu1 %v1069_v38  ;;  %827 = vmatprep.mubr.bf16.mxu0 %v1069_v38 }
 0x229   :  { %757 = vmatpush1.bf16.msra.mxu1 %v1020_v7  ;;  %798 = vmatpush1.bf16.msra.mxu0 %v1023_v8 }
 0x22a   :  { %758 = vmatprep.subr.bf16.mxu1 %v1028_v9  ;;  %799 = vmatprep.subr.bf16.mxu0 %v1031_v10 }
 0x22d   :  { %759 = vmatpush1.bf16.msra.mxu1 %v1026_v11  ;;  %800 = vmatpush1.bf16.msra.mxu0 %v1029_v12 }
 0x22e   :  { %760 = vmatprep.subr.bf16.mxu1 %v1034_v13  ;;  %801 = vmatprep.subr.bf16.mxu0 %v1037_v14 }
 0x231   :  { %761 = vmatpush1.bf16.msra.mxu1 %v1032_v15  ;;  %802 = vmatpush1.bf16.msra.mxu0 %v1035_v16 }
 0x232   :  { %762 = vmatprep.subr.bf16.mxu1 %v1040_v17  ;;  %803 = vmatprep.subr.bf16.mxu0 %v1043_v18 }
 0x235   :  { %763 = vmatpush1.bf16.msra.mxu1 %v1038_v19  ;;  %804 = vmatpush1.bf16.msra.mxu0 %v1041_v20 }
 0x236   :  { %764 = vmatprep.subr.bf16.mxu1 %v1046_v21  ;;  %805 = vmatprep.subr.bf16.mxu0 %v1049_v22 }
 0x239   :  { %765 = vmatpush1.bf16.msra.mxu1 %v1044_v23  ;;  %806 = vmatpush1.bf16.msra.mxu0 %v1047_v24 }
 0x23a   :  { %766 = vmatprep.subr.bf16.mxu1 %v1052_v26  ;;  %807 = vmatprep.subr.bf16.mxu0 %v1055_v27 }
 0x23d   :  { %767 = vmatpush1.bf16.msra.mxu1 %v1050_v29  ;;  %808 = vmatpush1.bf16.msra.mxu0 %v1053_v30 }
 0x23e   :  { %768 = vmatprep.subr.bf16.mxu1 %v1058_v31  ;;  %809 = vmatprep.subr.bf16.mxu0 %v1061_v32 }
 0x241   :  { %769 = vmatpush1.bf16.msra.mxu1 %v1056_v34  ;;  %810 = vmatpush1.bf16.msra.mxu0 %v1059_v35 }
 0x244   :  { %787 = vmatmul.mubr.bf16.vlgmr.msra.gmra.mrb[12].mxu1 %v561_v36  ;;  %828 = vmatmul.mubr.bf16.vlgmr.msra.gmra.mrb[16].mxu0 %v561_v36 }
 0x2e7   :  { %v347_v37 = vpop.f32.mrb[4].mxu1  ;;  %v388_v38 = vpop.f32.mrb[8].mxu0 }
 0x2e8   :  { %v349_v39 = vpop.f32.mrb[5].mxu1  ;;  %v390_v40 = vpop.f32.mrb[9].mxu0 }
 0x2e9   :  { %v351_v41 = vpop.f32.mrb[6].mxu1  ;;  %v392_v42 = vpop.f32.mrb[10].mxu0 }
 0x2ea   :  { %v352_v43 = vpop.f32.mrb[7].mxu1  ;;  %v393_v44 = vpop.f32.mrb[11].mxu0 }
 0x2f7   :  { %v513_v45 = vpop.f32.mrb[8].mxu1  ;;  %v554_v46 = vpop.f32.mrb[12].mxu0 }
 0x2f8   :  { %v514_v47 = vadd.f32 %v513_v45, %v347_v37  ;;  %v555_v48 = vadd.f32 %v554_v46, %v388_v38  ;;  %v515_v49 = vpop.f32.mrb[9].mxu1  ;;  %v556_v50 = vpop.f32.mrb[13].mxu0 }
 0x2f9   :  { %v516_v51 = vadd.f32 %v515_v49, %v349_v39  ;;  %v557_v52 = vadd.f32 %v556_v50, %v390_v40  ;;  %v517_v53 = vpop.f32.mrb[10].mxu1  ;;  %v558_v54 = vpop.f32.mrb[14].mxu0 }
 0x2fa   :  { %v518_v55 = vpop.f32.mrb[11].mxu1  ;;  %v559_v56 = vpop.f32.mrb[15].mxu0 }
 0x317   :  { %v788_v2 = vpop.f32.mrb[12].mxu1  ;;  %v829_v3 = vpop.f32.mrb[16].mxu0 }
 0x318   :  { %v836_v6 = vadd.f32 %v788_v2, %v514_v47  ;;  %v838_v7 = vadd.f32 %v829_v3, %v555_v48  ;;  %v790_v8 = vpop.f32.mrb[13].mxu1  ;;  %v831_v9 = vpop.f32.mrb[17].mxu0 }
 0x319   :  { %v837_v10 = vadd.f32 %v790_v8, %v516_v51  ;;  %v839_v11 = vadd.f32 %v831_v9, %v557_v52  ;;  %v792_v12 = vpop.f32.mrb[14].mxu1  ;;  %v833_v13 = vpop.f32.mrb[18].mxu0 }
 0x31a   :  { %v862_v14 = vadd.f32 %v845_v0, %v836_v6  ;;  %v864_v15 = vadd.f32 %v853_v1, %v838_v7  ;;  %v793_v16 = vpop.f32.mrb[15].mxu1  ;;  %v834_v17 = vpop.f32.mrb[19].mxu0 }
 0x31b   :  { %v863_v18 = vadd.f32 %v849_v4, %v837_v10  ;;  %v865_v19 = vadd.f32 %v857_v5, %v839_v11 }
 0x31c   :  { %866 = vst [vmem:[%s1375_s12] sm:$0xff] %v862_v14  ;;  %868 = vst [vmem:[%s1375_s12 + $0x10] sm:$0xff] %v864_v15 }
 0x31d   :  { %867 = vst [vmem:[%s1375_s12 + $0x8] sm:$0xff] %v863_v18  ;;  %869 = vst [vmem:[%s1375_s12 + $0x18] sm:$0xff] %v865_v19 }

// kernel: lstm_context_forward.10
= control target key start
LH: loop header
LB: loop body
LE: loop exit
PB: predicated region body
PF: predicated region fallthrough
CT: control target
= control target key end

     0   :  { %v1499_v3 = vmov 0.0   ;;  %v38_v13 = vlaneseq  ;;  %vm46_vm1 = vcmask 261120   ;;  %vm49_vm2 = vcmask 523264   ;;  %s1501_s22 = smov 64   ;;  %s1502_s23 = smov 96   ;;  %s1827_s1 = inlined_call_operand.vmem [shape: f32[64,192], index: 1, kind: input, shape index: {}]   ;;  %s1828_s0 = inlined_call_operand.vmem [shape: f32[5,2,192], index: 0, kind: input, shape index: {}]   ;;  %s1829_s2 = inlined_call_operand.vmem [shape: f32[32,128], index: 2, kind: input, shape index: {}]   ;;  %s1830_s3 = inlined_call_operand.vmem [shape: f32[1,128], index: 3, kind: input, shape index: {}]   ;;  %s1831_s4 = inlined_call_operand.vmem [shape: f32[5,2,128], index: 4, kind: output, shape index: {}]  }
   0x1   :  { %v18_v0 = vld [vmem:[%s1827_s1 + $0x8] sm:$0xff]  ;;  %v20_v1 = vld [vmem:[%s1827_s1 + $0x18] sm:$0xff]  ;;  %v17_v2 = vld [vmem:[%s1827_s1] sm:$0xff]  ;;  %117 = vmatprep.mubr.f32.mxu0 %v1499_v3  ;;  %v1500_v29 = vmov 1983009808   ;;  %v1503_v50 = vmov 0.0|0.0  }
   0x2   :  { %v1541_v4 = vpack.c.bf16 %v20_v1, %v18_v0  ;;  %v19_v5 = vld [vmem:[%s1827_s1 + $0x10] sm:$0xff]  ;;  %v22_v6 = vld [vmem:[%s1827_s1 + $0x28] sm:$0xff]  ;;  %v24_v7 = vld [vmem:[%s1827_s1 + $0x38] sm:$0xff]  ;;  %v1587_v21 = vand.u32 127, %v38_v13  ;;  %v128_v30 = vunpack.c.l.s4 %v1500_v29  ;;  %v131_v32 = vshrl.u32 %v38_v13, 7  ;;  %1358 = vmatprep.subr.bf16.mxu1 %v1503_v50 }
   0x3   :  { %v1552_v8 = vpack.c.bf16 %v19_v5, %v17_v2  ;;  %v1554_v9 = vpack.c.bf16 %v24_v7, %v22_v6  ;;  %v21_v10 = vld [vmem:[%s1827_s1 + $0x20] sm:$0xff]  ;;  %v23_v11 = vld [vmem:[%s1827_s1 + $0x30] sm:$0xff]  ;;  %v26_v12 = vld [vmem:[%s1827_s1 + $0x48] sm:$0xff]  ;;  %vm1504_vm3 = vmmov 0   ;;  %vm257_vm7 = vcmask 1041408  }
   0x4   :  { %1343 = vmatprep.subr.bf16.mxu0 %v1541_v4  ;;  %v28_v14 = vld [vmem:[%s1827_s1 + $0x58] sm:$0xff]  ;;  %v1570_v15 = vpack.c.bf16 %v23_v11, %v21_v10  ;;  %v25_v17 = vld [vmem:[%s1827_s1 + $0x40] sm:$0xff]  ;;  %v27_v18 = vld [vmem:[%s1827_s1 + $0x50] sm:$0xff]  ;;  %vm43_vm0 = vcmp.eq.s32.totalorder %v1587_v21, 0  ;;  %v129_v31 = vunpack.c.0.s8 %v128_v30  ;;  %1295 = vmatprep.mubr.msk.f32.mxu1 %vm1504_vm3, %v1499_v3  ;;  %vm40_vm4 = vcmp.ge.s32.totalorder %v1587_v21, 1 }
   0x5   :  { %1345 = vmatpush1.bf16.msra.mxu0 %v1552_v8  ;;  %v1573_v16 = vpack.c.bf16 %v28_v14, %v26_v12  ;;  %v30_v19 = vld [vmem:[%s1827_s1 + $0x68] sm:$0xff]  ;;  %v32_v20 = vld [vmem:[%s1827_s1 + $0x78] sm:$0xff]  ;;  %v1590_v22 = vpack.c.bf16 %v27_v18, %v25_v17  ;;  %v29_v24 = vld [vmem:[%s1827_s1 + $0x60] sm:$0xff]  ;;  %v1233_v27 = vsel %vm43_vm0, 1.0, %v1499_v3  ;;  %vm41_vm5 = vcmp.lt.s32.totalorder %v1587_v21, 16 }
   0x6   :  { %1347 = vmatprep.subr.bf16.mxu0 %v1554_v9  ;;  %v1593_v23 = vpack.c.bf16 %v32_v20, %v30_v19  ;;  %v31_v25 = vld [vmem:[%s1827_s1 + $0x70] sm:$0xff]  ;;  %v47_v28 = vsel %vm46_vm1, %v1233_v27, 0.0  ;;  %v1610_v34 = vsub.s32 %v129_v31, %v131_v32  ;;  %v48_v37 = vld [vmem:[%s1828_s0] sm:$0xf]  ;;  %v34_v52 = vld [vmem:[%s1829_s2 + $0x8] sm:$0xff] }
   0x7   :  { %v1603_v26 = vpack.c.bf16 %v31_v25, %v29_v24  ;;  %v33_v51 = vld [vmem:[%s1829_s2] sm:$0xff]  ;;  %v35_v55 = vld [vmem:[%s1829_s2 + $0x10] sm:$0xff]  ;;  %v36_v56 = vld [vmem:[%s1829_s2 + $0x18] sm:$0xff]  ;;  %s1505_s2 = smov 32  }
   0x8   :  { %v1629_v53 = vpack.c.bf16 %v34_v52, %v33_v51  ;;  %v1643_v57 = vpack.c.bf16 %v36_v56, %v35_v55  ;;  %v1669_v6 = vld [vmem:[%s1830_s3] ss:$0 sm:$0xff]  ;;  %vm1671_vm6 = vmand %vm40_vm4, %vm41_vm5 }
   0x9   :  { %1349 = vmatpush1.bf16.msra.mxu0 %v1570_v15 }
   0xa   :  { %1351 = vmatprep.subr.bf16.mxu0 %v1573_v16  ;;  %1360 = vmatpush3.bf16.msra.mxu1 %v1629_v53 }
   0xb   :  { %1361 = vmatprep.subr.bf16.mxu1 %v1503_v50 }
   0xd   :  { %1353 = vmatpush1.bf16.msra.mxu0 %v1590_v22 }
   0xe   :  { %1355 = vmatprep.subr.bf16.mxu0 %v1593_v23  ;;  %1363 = vmatpush3.bf16.msra.mxu1 %v1643_v57 }
   0xf   :  { %1365 = vmatprep.subr.bf16.mxu1 %v1541_v4 }
  0x11   :  { %1357 = vmatpush1.bf16.msra.mxu0 %v1603_v26 }
  0x12   :  { %1380 = vmatprep.subr.bf16.mxu0 %v1503_v50 }
  0x14   :  { %1234 = vmatmul.mubr.msk.f32.vlgmr.msra.gmra.mrb[0].mxu0 %vm49_vm2, %v47_v28 }
  0x15   :  { %1382 = vmatpush3.bf16.msra.mxu0 %v1629_v53  ;;  %1306 = vmatprep.mubr.msk.f32.mxu0 %vm1504_vm3, %v1499_v3 }
  0x16   :  { %1383 = vmatprep.subr.bf16.mxu0 %v1503_v50 }
  0x19   :  { %1385 = vmatpush3.bf16.msra.mxu0 %v1643_v57 }
  0x1a   :  { %1387 = vmatprep.subr.bf16.mxu0 %v1541_v4 }
  0xe7   :  { %v119_v33 = vpop.f32.mrb[0].mxu0 }
  0xe8   :  { %v121_v35 = vpop.f32.mrb[1].mxu0 }
  0xe9   :  { %v126_v36 = vcombine.low %v119_v33, %v121_v35 }
  0xeb   :  { %v133_v38 = vrot.slane %v126_v36, %v1610_v34 }
  0xed   :  { %v135_v39 = vadd.f32 %v133_v38, %v48_v37 }
  0xef   :  { %v1235_v40 = vmul.f32 -1.442695, %v135_v39  ;;  %1459 = vtanh.f32 %v135_v39 }
  0xf1   :  { %1461 = vpow2.f32 %v1235_v40 }
  0xf9   :  { %v1460_v41 = vpop.eup %1459 }
  0xfa   :  { %144 = vrot.lane.b32.xlu0 %v1460_v41, %s1501_s22 }
  0xfb   :  { %v1462_v42 = vpop.eup %1461 }
  0xfc   :  { %v139_v43 = vadd.f32 1.0, %v1462_v42 }
  0xfe   :  { %1463 = vrcp.f32 %v139_v43 }
 0x108   :  { %v1464_v44 = vpop.eup %1463 }
 0x109   :  { %v148_v45 = vmul.f32 0.0, %v1464_v44  ;;  %v161_v61 = vrot.slane %v1464_v44, 2 }
 0x10b   :  { %150 = vrot.lane.b32.xlu0 %v148_v45, %s1502_s23  ;;  %v168_v63 = vsub.f32 1.0, %v161_v61 }
 0x16c   :  { %v145_v46 = vpop.permute.xlu0 %144 }
 0x16d   :  { %v147_v47 = vmul.f32 %v1464_v44, %v145_v46 }
 0x17d   :  { %v151_v48 = vpop.permute.xlu0 %150 }
 0x17e   :  { %v1618_v49 = vadd.f32 %v151_v48, %v147_v47 }
 0x180   :  { %1465 = vtanh.f32 %v1618_v49 }
 0x18a   :  { %v1466_v54 = vpop.eup %1465 }
 0x18b   :  { %156 = vrot.lane.b32.xlu1 %v1466_v54, %s1502_s23 }
 0x18f   :  { %170 = vrot.lane.b32.xlu1 %v135_v39, %s1502_s23 }
 0x1fd   :  { %v157_v58 = vpop.permute.xlu1 %156 }
 0x1fe   :  { %v159_v59 = vmul.f32 %v1464_v44, %v157_v58  ;;  %v1239_v44 = vld [vmem:[%s1828_s0 + $0x4] sm:$0xf] }
 0x200   :  { %164 = vrot.lane.b32.xlu0 %v159_v59, %s1505_s2 }
 0x201   :  { %v171_v60 = vpop.permute.xlu1 %170 }
 0x202   :  { %v172_v62 = vrot.slane %v171_v60, 2 }
 0x204   :  { %v174_v1 = vmul.f32 %v172_v62, %v168_v63 }
 0x272   :  { %v165_v0 = vpop.permute.xlu0 %164 }
 0x273   :  { %v167_v2 = vmul.f32 %v165_v0, %v161_v61 }
 0x275   :  { %v175_v5 = vadd.f32 %v174_v1, %v167_v2 }
 0x277   :  { %1296 = vmatmul.mubr.msk.f32.vlgmr.msra.gmra.mrb[0].mxu1 %vm46_vm1, %v175_v5  ;;  %v288_v17 = vrot.slane %v175_v5, %v1610_v34 }
 0x278   :  { %1367 = vmatpush1.bf16.msra.mxu1 %v1552_v8  ;;  %362 = vmatprep.mubr.f32.mxu1 %v1499_v3 }
 0x279   :  { %1369 = vmatprep.subr.bf16.mxu1 %v1554_v9 }
 0x27c   :  { %1371 = vmatpush1.bf16.msra.mxu1 %v1570_v15 }
 0x27d   :  { %1373 = vmatprep.subr.bf16.mxu1 %v1573_v16 }
 0x280   :  { %1375 = vmatpush1.bf16.msra.mxu1 %v1590_v22 }
 0x281   :  { %1377 = vmatprep.subr.bf16.mxu1 %v1593_v23 }
 0x284   :  { %1379 = vmatpush1.bf16.msra.mxu1 %v1603_v26 }
 0x285   :  { %1402 = vmatprep.subr.bf16.mxu1 %v1503_v50 }
 0x34a   :  { %v251_v7 = vpop.f32.mrb[0].mxu1 }
 0x34b   :  { %v252_v11 = vadd.f32 %v1669_v6, %v251_v7  ;;  %v1297_v12 = vpop.f32.mrb[1].mxu1 }
 0x34d   :  { %255 = vst [vmem:[%s1831_s4] sm:$0x3] %v252_v11  ;;  %v256_v13 = vsel %vm1671_vm6, %v252_v11, -1e+30 }
 0x34e   :  { %v258_v14 = vsel %vm257_vm7, %v256_v13, -inf }
 0x34f   :  { %259 = vmax.xlane.f32.xlu1 %v258_v14 }
 0x360   :  { %289 = vrot.lane.b32.xlu1 %v288_v17, %s1505_s2 }
 0x3dc   :  { %v260_v18 = vpop.xlane.xlu1 %259 }
 0x3dd   :  { %vm261_vm8 = vcmp.ge.f32.partialorder %v256_v13, %v260_v18 }
 0x3de   :  { %v262_v19 = vsel %vm261_vm8, %v1587_v21, 128 }
 0x3df   :  { %v263_v20 = vsel %vm257_vm7, %v262_v19, 2147483647 }
 0x3e0   :  { %v265_v24 = vshra.s32 %v263_v20, 16  ;;  %v264_v27 = vand.u32 65535, %v263_v20  ;;  %v290_v38 = vpop.permute.xlu1 %289 }
 0x3e2   :  { %v267_v25 = vcvt.s32.f32 %v265_v24  ;;  %v266_v29 = vcvt.s32.f32 %v264_v27 }
 0x3e4   :  { %268 = vmin.xlane.f32.xlu0 %v267_v25 }
 0x471   :  { %v269_v28 = vpop.xlane.xlu0 %268 }
 0x472   :  { %vm270_vm9 = vcmp.eq.f32.partialorder %v267_v25, %v269_v28  ;;  %v275_v31 = vcvt.f32.s32 %v269_v28 }
 0x473   :  { %v271_v30 = vsel %vm270_vm9, %v266_v29, inf }
 0x474   :  { %272 = vmin.xlane.f32.xlu0 %v271_v30  ;;  %v276_v33 = vshll.u32 %v275_v31, 16 }
 0x48a   :  { %394 = vrot.lane.b32.xlu0 %v1618_v49, %s1505_s2 }
 0x501   :  { %v273_v32 = vpop.xlane.xlu0 %272 }
 0x502   :  { %v274_v35 = vcvt.f32.s32 %v273_v32 }
 0x504   :  { %v277_v36 = vadd.s32 %v276_v33, %v274_v35 }
 0x505   :  { %v395_v54 = vpop.permute.xlu0 %394 }
 0x506   :  { %v278_v37 = vadd.s32 1, %v277_v36 }
 0x508   :  { %vm279_vm10 = vcmp.eq.s32.totalorder %v1587_v21, %v278_v37 }
 0x509   :  { %v1238_v39 = vsel %vm279_vm10, 1.0, %v1499_v3 }
 0x50a   :  { %v292_v40 = vsel %vm46_vm1, %v1238_v39, %v290_v38 }
 0x50b   :  { %1240 = vmatmul.mubr.msk.f32.vlgmr.msra.gmra.mrb[2].mxu1 %vm49_vm2, %v292_v40 }
 0x50c   :  { %1404 = vmatpush3.bf16.msra.mxu1 %v1629_v53  ;;  %1317 = vmatprep.mubr.msk.f32.mxu1 %vm1504_vm3, %v1499_v3 }
 0x50d   :  { %1405 = vmatprep.subr.bf16.mxu1 %v1503_v50 }
 0x510   :  { %1407 = vmatpush3.bf16.msra.mxu1 %v1643_v57 }
 0x511   :  { %1409 = vmatprep.subr.bf16.mxu1 %v1541_v4 }
 0x5de   :  { %v364_v41 = vpop.f32.mrb[2].mxu1 }
 0x5df   :  { %v366_v42 = vpop.f32.mrb[3].mxu1 }
 0x5e0   :  { %v371_v43 = vcombine.low %v364_v41, %v366_v42 }
 0x5e2   :  { %v378_v45 = vrot.slane %v371_v43, %v1610_v34 }
 0x5e4   :  { %v380_v46 = vadd.f32 %v1239_v44, %v378_v45 }
 0x5e6   :  { %v1241_v47 = vmul.f32 -1.442695, %v380_v46  ;;  %1467 = vtanh.f32 %v380_v46 }
 0x5e8   :  { %1469 = vpow2.f32 %v1241_v47 }
 0x5f0   :  { %v1468_v48 = vpop.eup %1467 }
 0x5f1   :  { %389 = vrot.lane.b32.xlu1 %v1468_v48, %s1501_s22  ;;  %v1245_v48 = vld [vmem:[%s1828_s0 + $0x8] sm:$0xf] }
 0x5f2   :  { %v1470_v49 = vpop.eup %1469 }
 0x5f3   :  { %v384_v51 = vadd.f32 1.0, %v1470_v49 }
 0x5f5   :  { %1471 = vrcp.f32 %v384_v51 }
 0x5ff   :  { %v1472_v52 = vpop.eup %1471 }
 0x600   :  { %v397_v55 = vmul.f32 %v1472_v52, %v395_v54  ;;  %v410_v1 = vrot.slane %v1472_v52, 2 }
 0x602   :  { %399 = vrot.lane.b32.xlu1 %v397_v55, %s1502_s23  ;;  %v417_v5 = vsub.f32 1.0, %v410_v1 }
 0x606   :  { %419 = vrot.lane.b32.xlu1 %v380_v46, %s1502_s23 }
 0x663   :  { %v390_v56 = vpop.permute.xlu1 %389 }
 0x664   :  { %v392_v58 = vmul.f32 %v1472_v52, %v390_v56 }
 0x674   :  { %v400_v59 = vpop.permute.xlu1 %399 }
 0x675   :  { %v402_v60 = vadd.f32 %v400_v59, %v392_v58 }
 0x677   :  { %1473 = vtanh.f32 %v402_v60 }
 0x678   :  { %v420_v0 = vpop.permute.xlu1 %419 }
 0x679   :  { %v421_v2 = vrot.slane %v420_v0, 2 }
 0x67b   :  { %v423_v11 = vmul.f32 %v421_v2, %v417_v5 }
 0x681   :  { %v1474_v61 = vpop.eup %1473 }
 0x682   :  { %405 = vrot.lane.b32.xlu0 %v1474_v61, %s1502_s23 }
 0x6f4   :  { %v406_v62 = vpop.permute.xlu0 %405 }
 0x6f5   :  { %v408_v63 = vmul.f32 %v1472_v52, %v406_v62 }
 0x6f7   :  { %413 = vrot.lane.b32.xlu0 %v408_v63, %s1505_s2 }
 0x769   :  { %v414_v7 = vpop.permute.xlu0 %413 }
 0x76a   :  { %v416_v12 = vmul.f32 %v414_v7, %v410_v1 }
 0x76c   :  { %v424_v13 = vadd.f32 %v423_v11, %v416_v12 }
 0x76e   :  { %1307 = vmatmul.mubr.msk.f32.vlgmr.msra.gmra.mrb[2].mxu0 %vm46_vm1, %v424_v13  ;;  %v531_v24 = vrot.slane %v424_v13, %v1610_v34 }
 0x76f   :  { %1389 = vmatpush1.bf16.msra.mxu0 %v1552_v8  ;;  %605 = vmatprep.mubr.f32.mxu0 %v1499_v3 }
 0x770   :  { %1391 = vmatprep.subr.bf16.mxu0 %v1554_v9 }
 0x773   :  { %1393 = vmatpush1.bf16.msra.mxu0 %v1570_v15 }
 0x774   :  { %1395 = vmatprep.subr.bf16.mxu0 %v1573_v16 }
 0x777   :  { %1397 = vmatpush1.bf16.msra.mxu0 %v1590_v22 }
 0x778   :  { %1399 = vmatprep.subr.bf16.mxu0 %v1593_v23 }
 0x77b   :  { %1401 = vmatpush1.bf16.msra.mxu0 %v1603_v26 }
 0x77c   :  { %1424 = vmatprep.subr.bf16.mxu0 %v1503_v50 }
 0x841   :  { %v494_v14 = vpop.f32.mrb[2].mxu0 }
 0x842   :  { %v495_v17 = vadd.f32 %v1669_v6, %v494_v14  ;;  %v1308_v18 = vpop.f32.mrb[3].mxu0 }
 0x844   :  { %1243 = vst [vmem:[%s1831_s4 + $0x2] sm:$0x3] %v495_v17  ;;  %v500_v19 = vsel %vm1671_vm6, %v495_v17, -1e+30 }
 0x845   :  { %v501_v20 = vsel %vm257_vm7, %v500_v19, -inf }
 0x846   :  { %502 = vmax.xlane.f32.xlu1 %v501_v20 }
 0x857   :  { %532 = vrot.lane.b32.xlu1 %v531_v24, %s1505_s2 }
 0x8d3   :  { %v503_v25 = vpop.xlane.xlu1 %502 }
 0x8d4   :  { %vm504_vm11 = vcmp.ge.f32.partialorder %v500_v19, %v503_v25 }
 0x8d5   :  { %v505_v27 = vsel %vm504_vm11, %v1587_v21, 128 }
 0x8d6   :  { %v506_v28 = vsel %vm257_vm7, %v505_v27, 2147483647 }
 0x8d7   :  { %v508_v29 = vshra.s32 %v506_v28, 16  ;;  %v507_v31 = vand.u32 65535, %v506_v28  ;;  %v533_v42 = vpop.permute.xlu1 %532 }
 0x8d9   :  { %v510_v30 = vcvt.s32.f32 %v508_v29  ;;  %v509_v33 = vcvt.s32.f32 %v507_v31 }
 0x8db   :  { %511 = vmin.xlane.f32.xlu0 %v510_v30 }
 0x968   :  { %v512_v32 = vpop.xlane.xlu0 %511 }
 0x969   :  { %vm513_vm12 = vcmp.eq.f32.partialorder %v510_v30, %v512_v32  ;;  %v518_v36 = vcvt.f32.s32 %v512_v32 }
 0x96a   :  { %v514_v35 = vsel %vm513_vm12, %v509_v33, inf }
 0x96b   :  { %515 = vmin.xlane.f32.xlu0 %v514_v35  ;;  %v519_v38 = vshll.u32 %v518_v36, 16 }
 0x981   :  { %637 = vrot.lane.b32.xlu0 %v402_v60, %s1505_s2 }
 0x9f8   :  { %v516_v37 = vpop.xlane.xlu0 %515 }
 0x9f9   :  { %v517_v39 = vcvt.f32.s32 %v516_v37 }
 0x9fb   :  { %v520_v40 = vadd.s32 %v519_v38, %v517_v39 }
 0x9fc   :  { %v638_v58 = vpop.permute.xlu0 %637 }
 0x9fd   :  { %v521_v41 = vadd.s32 1, %v520_v40 }
 0x9ff   :  { %vm522_vm13 = vcmp.eq.s32.totalorder %v1587_v21, %v521_v41 }
 0xa00   :  { %v1244_v43 = vsel %vm522_vm13, 1.0, %v1499_v3 }
 0xa01   :  { %v535_v44 = vsel %vm46_vm1, %v1244_v43, %v533_v42 }
 0xa02   :  { %1246 = vmatmul.mubr.msk.f32.vlgmr.msra.gmra.mrb[4].mxu0 %vm49_vm2, %v535_v44 }
 0xa03   :  { %1426 = vmatpush3.bf16.msra.mxu0 %v1629_v53  ;;  %1328 = vmatprep.mubr.msk.f32.mxu0 %vm1504_vm3, %v1499_v3 }
 0xa04   :  { %1427 = vmatprep.subr.bf16.mxu0 %v1503_v50 }
 0xa07   :  { %1429 = vmatpush3.bf16.msra.mxu0 %v1643_v57 }
 0xa08   :  { %1431 = vmatprep.subr.bf16.mxu0 %v1541_v4 }
 0xad5   :  { %v607_v45 = vpop.f32.mrb[4].mxu0 }
 0xad6   :  { %v609_v46 = vpop.f32.mrb[5].mxu0 }
 0xad7   :  { %v614_v47 = vcombine.low %v607_v45, %v609_v46 }
 0xad9   :  { %v621_v49 = vrot.slane %v614_v47, %v1610_v34 }
 0xadb   :  { %v623_v51 = vadd.f32 %v1245_v48, %v621_v49 }
 0xadd   :  { %v1247_v52 = vmul.f32 -1.442695, %v623_v51  ;;  %1475 = vtanh.f32 %v623_v51 }
 0xadf   :  { %1477 = vpow2.f32 %v1247_v52  ;;  %v1251_v52 = vld [vmem:[%s1828_s0 + $0xc] sm:$0xf] }
 0xae7   :  { %v1476_v54 = vpop.eup %1475 }
 0xae8   :  { %632 = vrot.lane.b32.xlu1 %v1476_v54, %s1501_s22 }
 0xae9   :  { %v1478_v55 = vpop.eup %1477 }
 0xaea   :  { %v627_v56 = vadd.f32 1.0, %v1478_v55 }
 0xaec   :  { %1479 = vrcp.f32 %v627_v56 }
 0xaf6   :  { %v1480_v4 = vpop.eup %1479 }
 0xaf7   :  { %v640_v59 = vmul.f32 %v1480_v4, %v638_v58  ;;  %v653_v7 = vrot.slane %v1480_v4, 2 }
 0xaf9   :  { %642 = vrot.lane.b32.xlu1 %v640_v59, %s1502_s23  ;;  %v660_v12 = vsub.f32 1.0, %v653_v7 }
 0xafd   :  { %662 = vrot.lane.b32.xlu1 %v623_v51, %s1502_s23 }
 0xb5a   :  { %v633_v60 = vpop.permute.xlu1 %632 }
 0xb5b   :  { %v635_v61 = vmul.f32 %v1480_v4, %v633_v60 }
 0xb6b   :  { %v643_v62 = vpop.permute.xlu1 %642 }
 0xb6c   :  { %v645_v63 = vadd.f32 %v643_v62, %v635_v61 }
 0xb6e   :  { %1481 = vtanh.f32 %v645_v63 }
 0xb6f   :  { %v663_v5 = vpop.permute.xlu1 %662 }
 0xb70   :  { %v664_v11 = vrot.slane %v663_v5, 2 }
 0xb72   :  { %v666_v14 = vmul.f32 %v664_v11, %v660_v12 }
 0xb78   :  { %v1482_v0 = vpop.eup %1481 }
 0xb79   :  { %648 = vrot.lane.b32.xlu0 %v1482_v0, %s1502_s23 }
 0xbeb   :  { %v649_v1 = vpop.permute.xlu0 %648 }
 0xbec   :  { %v651_v2 = vmul.f32 %v1480_v4, %v649_v1 }
 0xbee   :  { %656 = vrot.lane.b32.xlu0 %v651_v2, %s1505_s2 }
 0xc60   :  { %v657_v13 = vpop.permute.xlu0 %656 }
 0xc61   :  { %v659_v17 = vmul.f32 %v657_v13, %v653_v7 }
 0xc63   :  { %v667_v18 = vadd.f32 %v666_v14, %v659_v17 }
 0xc65   :  { %1318 = vmatmul.mubr.msk.f32.vlgmr.msra.gmra.mrb[4].mxu1 %vm46_vm1, %v667_v18  ;;  %v774_v28 = vrot.slane %v667_v18, %v1610_v34 }
 0xc66   :  { %1411 = vmatpush1.bf16.msra.mxu1 %v1552_v8  ;;  %848 = vmatprep.mubr.f32.mxu1 %v1499_v3 }
 0xc67   :  { %1413 = vmatprep.subr.bf16.mxu1 %v1554_v9 }
 0xc6a   :  { %1415 = vmatpush1.bf16.msra.mxu1 %v1570_v15 }
 0xc6b   :  { %1417 = vmatprep.subr.bf16.mxu1 %v1573_v16 }
 0xc6e   :  { %1419 = vmatpush1.bf16.msra.mxu1 %v1590_v22 }
 0xc6f   :  { %1421 = vmatprep.subr.bf16.mxu1 %v1593_v23 }
 0xc72   :  { %1423 = vmatpush1.bf16.msra.mxu1 %v1603_v26 }
 0xc73   :  { %1446 = vmatprep.subr.bf16.mxu1 %v1503_v50 }
 0xd38   :  { %v737_v19 = vpop.f32.mrb[4].mxu1 }
 0xd39   :  { %v738_v20 = vadd.f32 %v1669_v6, %v737_v19  ;;  %v1319_v24 = vpop.f32.mrb[5].mxu1 }
 0xd3b   :  { %1249 = vst [vmem:[%s1831_s4 + $0x4] sm:$0x3] %v738_v20  ;;  %v743_v25 = vsel %vm1671_vm6, %v738_v20, -1e+30 }
 0xd3c   :  { %v744_v27 = vsel %vm257_vm7, %v743_v25, -inf }
 0xd3d   :  { %745 = vmax.xlane.f32.xlu1 %v744_v27 }
 0xd4e   :  { %775 = vrot.lane.b32.xlu1 %v774_v28, %s1505_s2 }
 0xdca   :  { %v746_v29 = vpop.xlane.xlu1 %745 }
 0xdcb   :  { %vm747_vm14 = vcmp.ge.f32.partialorder %v743_v25, %v746_v29 }
 0xdcc   :  { %v748_v30 = vsel %vm747_vm14, %v1587_v21, 128 }
 0xdcd   :  { %v749_v31 = vsel %vm257_vm7, %v748_v30, 2147483647 }
 0xdce   :  { %v751_v32 = vshra.s32 %v749_v31, 16  ;;  %v750_v35 = vand.u32 65535, %v749_v31  ;;  %v776_v45 = vpop.permute.xlu1 %775 }
 0xdd0   :  { %v753_v33 = vcvt.s32.f32 %v751_v32  ;;  %v752_v37 = vcvt.s32.f32 %v750_v35 }
 0xdd2   :  { %754 = vmin.xlane.f32.xlu0 %v753_v33 }
 0xe5f   :  { %v755_v36 = vpop.xlane.xlu0 %754 }
 0xe60   :  { %vm756_vm15 = vcmp.eq.f32.partialorder %v753_v33, %v755_v36  ;;  %v761_v39 = vcvt.f32.s32 %v755_v36 }
 0xe61   :  { %v757_v38 = vsel %vm756_vm15, %v752_v37, inf }
 0xe62   :  { %758 = vmin.xlane.f32.xlu0 %v757_v38  ;;  %v762_v41 = vshll.u32 %v761_v39, 16 }
 0xe78   :  { %880 = vrot.lane.b32.xlu0 %v645_v63, %s1505_s2 }
 0xeef   :  { %v759_v40 = vpop.xlane.xlu0 %758 }
 0xef0   :  { %v760_v42 = vcvt.f32.s32 %v759_v40 }
 0xef2   :  { %v763_v43 = vadd.s32 %v762_v41, %v760_v42 }
 0xef3   :  { %v881_v58 = vpop.permute.xlu0 %880 }
 0xef4   :  { %v764_v44 = vadd.s32 1, %v763_v43  ;;  %v1257_v43 = vld [vmem:[%s1828_s0 + $0x10] sm:$0xf] }
 0xef6   :  { %vm765_vm0 = vcmp.eq.s32.totalorder %v1587_v21, %v764_v44 }
 0xef7   :  { %v1250_v46 = vsel %vm765_vm0, 1.0, %v1499_v3 }
 0xef8   :  { %v778_v47 = vsel %vm46_vm1, %v1250_v46, %v776_v45 }
 0xef9   :  { %1252 = vmatmul.mubr.msk.f32.vlgmr.msra.gmra.mrb[6].mxu1 %vm49_vm2, %v778_v47 }
 0xefa   :  { %1448 = vmatpush3.bf16.msra.mxu1 %v1629_v53  ;;  %1339 = vmatprep.mubr.msk.f32.mxu1 %vm1504_vm3, %v1499_v3 }
 0xefb   :  { %1449 = vmatprep.subr.bf16.mxu1 %v1503_v50 }
 0xefe   :  { %1451 = vmatpush3.bf16.msra.mxu1 %v1643_v57 }
 0xfcc   :  { %v850_v48 = vpop.f32.mrb[6].mxu1 }
 0xfcd   :  { %v852_v49 = vpop.f32.mrb[7].mxu1 }
 0xfce   :  { %v857_v51 = vcombine.low %v850_v48, %v852_v49 }
 0xfd0   :  { %v864_v54 = vrot.slane %v857_v51, %v1610_v34 }
 0xfd2   :  { %v866_v55 = vadd.f32 %v1251_v52, %v864_v54 }
 0xfd4   :  { %v1253_v56 = vmul.f32 -1.442695, %v866_v55  ;;  %1483 = vtanh.f32 %v866_v55 }
 0xfd6   :  { %1485 = vpow2.f32 %v1253_v56 }
 0xfde   :  { %v1484_v53 = vpop.eup %1483 }
 0xfdf   :  { %875 = vrot.lane.b32.xlu1 %v1484_v53, %s1501_s22 }
 0xfe0   :  { %v1486_v4 = vpop.eup %1485 }
 0xfe1   :  { %v870_v50 = vadd.f32 1.0, %v1486_v4 }
 0xfe3   :  { %1487 = vrcp.f32 %v870_v50 }
 0xfed   :  { %v1488_v57 = vpop.eup %1487 }
 0xfee   :  { %v883_v59 = vmul.f32 %v1488_v57, %v881_v58  ;;  %v896_v7 = vrot.slane %v1488_v57, 2 }
 0xff0   :  { %885 = vrot.lane.b32.xlu1 %v883_v59, %s1502_s23  ;;  %v903_v12 = vsub.f32 1.0, %v896_v7 }
 0xff4   :  { %905 = vrot.lane.b32.xlu1 %v866_v55, %s1502_s23 }
0x1051   :  { %v876_v60 = vpop.permute.xlu1 %875 }
0x1052   :  { %v878_v61 = vmul.f32 %v1488_v57, %v876_v60 }
0x1062   :  { %v886_v62 = vpop.permute.xlu1 %885 }
0x1063   :  { %v888_v63 = vadd.f32 %v886_v62, %v878_v61 }
0x1065   :  { %1489 = vtanh.f32 %v888_v63 }
0x1066   :  { %v906_v5 = vpop.permute.xlu1 %905 }
0x1067   :  { %v907_v11 = vrot.slane %v906_v5, 2 }
0x1069   :  { %v909_v14 = vmul.f32 %v907_v11, %v903_v12 }
0x106f   :  { %v1490_v0 = vpop.eup %1489 }
0x1070   :  { %891 = vrot.lane.b32.xlu0 %v1490_v0, %s1502_s23 }
0x10e2   :  { %v892_v1 = vpop.permute.xlu0 %891 }
0x10e3   :  { %v894_v2 = vmul.f32 %v1488_v57, %v892_v1 }
0x10e5   :  { %899 = vrot.lane.b32.xlu0 %v894_v2, %s1505_s2 }
0x1157   :  { %v900_v13 = vpop.permute.xlu0 %899 }
0x1158   :  { %v902_v17 = vmul.f32 %v900_v13, %v896_v7 }
0x115a   :  { %v910_v18 = vadd.f32 %v909_v14, %v902_v17 }
0x115c   :  { %1329 = vmatmul.mubr.msk.f32.vlgmr.msra.gmra.mrb[6].mxu0 %vm46_vm1, %v910_v18 }
0x115d   :  { %1433 = vmatpush1.bf16.msra.mxu0 %v1552_v8  ;;  %1091 = vmatprep.mubr.f32.mxu0 %v1499_v3 }
0x115e   :  { %1435 = vmatprep.subr.bf16.mxu0 %v1554_v9 }
0x1161   :  { %1437 = vmatpush1.bf16.msra.mxu0 %v1570_v15  ;;  %v1017_v15 = vrot.slane %v910_v18, %v1610_v34 }
0x1162   :  { %1439 = vmatprep.subr.bf16.mxu0 %v1573_v16 }
0x1165   :  { %1441 = vmatpush1.bf16.msra.mxu0 %v1590_v22 }
0x1166   :  { %1443 = vmatprep.subr.bf16.mxu0 %v1593_v23 }
0x1169   :  { %1445 = vmatpush1.bf16.msra.mxu0 %v1603_v26 }
0x122f   :  { %v980_v19 = vpop.f32.mrb[6].mxu0 }
0x1230   :  { %v981_v20 = vadd.f32 %v1669_v6, %v980_v19  ;;  %v1330_v24 = vpop.f32.mrb[7].mxu0 }
0x1232   :  { %1255 = vst [vmem:[%s1831_s4 + $0x6] sm:$0x3] %v981_v20  ;;  %v986_v8 = vsel %vm1671_vm6, %v981_v20, -1e+30 }
0x1233   :  { %v987_v9 = vsel %vm257_vm7, %v986_v8, -inf }
0x1234   :  { %988 = vmax.xlane.f32.xlu1 %v987_v9 }
0x1245   :  { %1018 = vrot.lane.b32.xlu1 %v1017_v15, %s1505_s2 }
0x12c1   :  { %v989_v16 = vpop.xlane.xlu1 %988 }
0x12c2   :  { %vm990_vm3 = vcmp.ge.f32.partialorder %v986_v8, %v989_v16 }
0x12c3   :  { %v991_v22 = vsel %vm990_vm3, %v1587_v21, 128 }
0x12c4   :  { %v992_v23 = vsel %vm257_vm7, %v991_v22, 2147483647 }
0x12c5   :  { %v994_v26 = vshra.s32 %v992_v23, 16  ;;  %v993_v27 = vand.u32 65535, %v992_v23  ;;  %v1019_v37 = vpop.permute.xlu1 %1018 }
0x12c7   :  { %v996_v25 = vcvt.s32.f32 %v994_v26  ;;  %v995_v10 = vcvt.s32.f32 %v993_v27 }
0x12c9   :  { %997 = vmin.xlane.f32.xlu0 %v996_v25 }
0x1356   :  { %v998_v28 = vpop.xlane.xlu0 %997 }
0x1357   :  { %vm999_vm4 = vcmp.eq.f32.partialorder %v996_v25, %v998_v28  ;;  %v1004_v30 = vcvt.f32.s32 %v998_v28 }
0x1358   :  { %v1000_v29 = vsel %vm999_vm4, %v995_v10, inf }
0x1359   :  { %1001 = vmin.xlane.f32.xlu0 %v1000_v29  ;;  %v1005_v32 = vshll.u32 %v1004_v30, 16 }
0x136f   :  { %1123 = vrot.lane.b32.xlu0 %v888_v63, %s1505_s2 }
0x13e6   :  { %v1002_v31 = vpop.xlane.xlu0 %1001 }
0x13e7   :  { %v1003_v33 = vcvt.f32.s32 %v1002_v31 }
0x13e9   :  { %v1006_v35 = vadd.s32 %v1005_v32, %v1003_v33 }
0x13ea   :  { %v1124_v49 = vpop.permute.xlu0 %1123 }
0x13eb   :  { %v1007_v36 = vadd.s32 1, %v1006_v35 }
0x13ed   :  { %vm1008_vm5 = vcmp.eq.s32.totalorder %v1587_v21, %v1007_v36 }
0x13ee   :  { %v1256_v38 = vsel %vm1008_vm5, 1.0, %v1499_v3 }
0x13ef   :  { %v1021_v39 = vsel %vm46_vm1, %v1256_v38, %v1019_v37 }
0x13f0   :  { %1258 = vmatmul.mubr.msk.f32.vlgmr.msra.gmra.mrb[8].mxu0 %vm49_vm2, %v1021_v39 }
0x14c3   :  { %v1093_v40 = vpop.f32.mrb[8].mxu0 }
0x14c4   :  { %v1095_v41 = vpop.f32.mrb[9].mxu0 }
0x14c5   :  { %v1100_v42 = vcombine.low %v1093_v40, %v1095_v41 }
0x14c7   :  { %v1107_v44 = vrot.slane %v1100_v42, %v1610_v34 }
0x14c9   :  { %v1109_v45 = vadd.f32 %v1257_v43, %v1107_v44 }
0x14cb   :  { %v1259_v46 = vmul.f32 -1.442695, %v1109_v45  ;;  %1491 = vtanh.f32 %v1109_v45 }
0x14cd   :  { %1493 = vpow2.f32 %v1259_v46 }
0x14d5   :  { %v1492_v21 = vpop.eup %1491 }
0x14d6   :  { %1118 = vrot.lane.b32.xlu1 %v1492_v21, %s1501_s22 }
0x14d7   :  { %v1494_v3 = vpop.eup %1493 }
0x14d8   :  { %v1113_v47 = vadd.f32 1.0, %v1494_v3 }
0x14da   :  { %1495 = vrcp.f32 %v1113_v47 }
0x14e4   :  { %v1496_v48 = vpop.eup %1495 }
0x14e5   :  { %v1126_v51 = vmul.f32 %v1496_v48, %v1124_v49  ;;  %v1139_v57 = vrot.slane %v1496_v48, 2 }
0x14e7   :  { %1128 = vrot.lane.b32.xlu1 %v1126_v51, %s1502_s23  ;;  %v1146_v59 = vsub.f32 1.0, %v1139_v57 }
0x14eb   :  { %1148 = vrot.lane.b32.xlu1 %v1109_v45, %s1502_s23 }
0x1548   :  { %v1119_v52 = vpop.permute.xlu1 %1118 }
0x1549   :  { %v1121_v54 = vmul.f32 %v1496_v48, %v1119_v52 }
0x1559   :  { %v1129_v34 = vpop.permute.xlu1 %1128 }
0x155a   :  { %v1131_v55 = vadd.f32 %v1129_v34, %v1121_v54 }
0x155c   :  { %1497 = vtanh.f32 %v1131_v55 }
0x155d   :  { %v1149_v50 = vpop.permute.xlu1 %1148 }
0x155e   :  { %v1150_v58 = vrot.slane %v1149_v50, 2 }
0x1560   :  { %v1152_v61 = vmul.f32 %v1150_v58, %v1146_v59 }
0x1566   :  { %v1498_v56 = vpop.eup %1497 }
0x1567   :  { %1134 = vrot.lane.b32.xlu0 %v1498_v56, %s1502_s23 }
0x15d9   :  { %v1135_v53 = vpop.permute.xlu0 %1134 }
0x15da   :  { %v1137_v4 = vmul.f32 %v1496_v48, %v1135_v53 }
0x15dc   :  { %1142 = vrot.lane.b32.xlu0 %v1137_v4, %s1505_s2 }
0x164e   :  { %v1143_v60 = vpop.permute.xlu0 %1142 }
0x164f   :  { %v1145_v62 = vmul.f32 %v1143_v60, %v1139_v57 }
0x1651   :  { %v1153_v63 = vadd.f32 %v1152_v61, %v1145_v62 }
0x1653   :  { %1340 = vmatmul.mubr.msk.f32.vlgmr.msra.gmra.mrb[8].mxu1 %vm46_vm1, %v1153_v63 }
0x1726   :  { %v1223_v0 = vpop.f32.mrb[8].mxu1 }
0x1727   :  { %v1224_v1 = vadd.f32 %v1669_v6, %v1223_v0  ;;  %v1341_v2 = vpop.f32.mrb[9].mxu1 }
0x1729   :  { %1261 = vst [vmem:[%s1831_s4 + $0x8] sm:$0x3] %v1224_v1 }

// kernel: lstm_context_forward.13
= control target key start
LH: loop header
LB: loop body
LE: loop exit
PB: predicated region body
PF: predicated region fallthrough
CT: control target
= control target key end

     0   :  { %v192_v0 = vmov 0.0   ;;  %vm193_vm0 = vmmov 0   ;;  %vm45_vm1 = vcmask 261120   ;;  %s248_s3 = inlined_call_operand.vmem [shape: bf16[32,128], index: 3, kind: input, shape index: {}]   ;;  %s249_s2 = inlined_call_operand.vmem [shape: bf16[32,128], index: 2, kind: input, shape index: {}]   ;;  %s250_s1 = inlined_call_operand.vmem [shape: f32[8,32], index: 1, kind: input, shape index: {}]   ;;  %s251_s0 = inlined_call_operand.vmem [shape: f32[8,32], index: 0, kind: input, shape index: {}]   ;;  %s252_s4 = inlined_call_operand.vmem [shape: f32[1,128], index: 4, kind: input, shape index: {}]   ;;  %s253_s5 = inlined_call_operand.vmem [shape: f32[8,128], index: 5, kind: output, shape index: {}]  }
   0x1   :  { %170 = vmatprep.subr.bf16.mxu0 %v192_v0  ;;  %178 = vmatprep.subr.bf16.mxu1 %v192_v0  ;;  %v188_v1 = vld [vmem:[%s248_s3] sm:$0xff]   ;;  %v190_v3 = vld [vmem:[%s248_s3 + $0x8] sm:$0xff]  }
   0x2   :  { %v189_v2 = vld [vmem:[%s249_s2] sm:$0xff]   ;;  %174 = vmatprep.mubr.msk.bf16.mxu0 %vm193_vm0, %v192_v0  ;;  %182 = vmatprep.mubr.msk.bf16.mxu1 %vm193_vm0, %v192_v0  ;;  %v191_v4 = vld [vmem:[%s249_s2 + $0x8] sm:$0xff]  }
   0x3   :  { %171 = vmatpush3.bf16.msra.mxu0 %v188_v1  ;;  %179 = vmatpush3.bf16.msra.mxu1 %v189_v2  ;;  %v27_v5 = vld [vmem:[%s250_s1] sm:$0xff] }
   0x4   :  { %172 = vmatprep.subr.bf16.mxu0 %v192_v0  ;;  %180 = vmatprep.subr.bf16.mxu1 %v192_v0  ;;  %v21_v6 = vld [vmem:[%s251_s0] sm:$0xff]  ;;  %v28_v7 = vpack.c.bf16 %v27_v5, %v27_v5 }
   0x5   :  { %v22_v8 = vpack.c.bf16 %v21_v6, %v21_v6  ;;  %v163_v11 = vld [vmem:[%s252_s4] ss:$0 sm:$0xff] }
   0x7   :  { %173 = vmatpush3.bf16.msra.mxu0 %v190_v3  ;;  %181 = vmatpush3.bf16.msra.mxu1 %v191_v4 }
   0xa   :  { %175 = vmatmul.mubr.msk.bf16.vlgmr.msra.gmra.mrb[0].mxu0 %vm45_vm1, %v28_v7  ;;  %183 = vmatmul.mubr.msk.bf16.vlgmr.msra.gmra.mrb[0].mxu1 %vm45_vm1, %v22_v8 }
  0xdd   :  { %v83_v9 = vpop.f32.mrb[0].mxu0  ;;  %v138_v10 = vpop.f32.mrb[0].mxu1 }
  0xde   :  { %v176_v12 = vpop.f32.mrb[1].mxu0  ;;  %v139_v13 = vadd.f32 %v138_v10, %v83_v9  ;;  %v184_v14 = vpop.f32.mrb[1].mxu1 }
  0xdf   :  { %v86_v15 = vpop.f32.mrb[2].mxu0  ;;  %v141_v16 = vpop.f32.mrb[2].mxu1 }
  0xe0   :  { %v177_v17 = vpop.f32.mrb[3].mxu0  ;;  %v151_v18 = vadd.f32 %v163_v11, %v139_v13  ;;  %v185_v19 = vpop.f32.mrb[3].mxu1 }
  0xe2   :  { %152 = vst [vmem:[%s253_s5] sm:$0xff] %v151_v18 }

// kernel: lstm_context_forward.11
= control target key start
LH: loop header
LB: loop body
LE: loop exit
PB: predicated region body
PF: predicated region fallthrough
CT: control target
= control target key end

     0   :  { %v427_v1 = vmov 0   ;;  %vm83_vm0 = vcmask 523264   ;;  %vm148_vm1 = vcmask 261120   ;;  %v336_v39 = vlaneseq  ;;  %s570_s4 = inlined_call_operand.vmem [shape: bf16[64,256], index: 4, kind: input, shape index: {}]   ;;  %s571_s5 = inlined_call_operand.vmem [shape: bf16[128,256], index: 5, kind: input, shape index: {}]   ;;  %s572_s1 = inlined_call_operand.vmem [shape: f32[8,64], index: 1, kind: input, shape index: {}]   ;;  %s573_s3 = inlined_call_operand.vmem [shape: bf16[32,256], index: 3, kind: input, shape index: {}]   ;;  %s574_s0 = inlined_call_operand.vmem [shape: f32[8,32], index: 0, kind: input, shape index: {}]   ;;  %s575_s2 = inlined_call_operand.vmem [shape: f32[8,128], index: 2, kind: input, shape index: {}]   ;;  %s576_s6 = inlined_call_operand.vmem [shape: f32[1,256], index: 6, kind: input, shape index: {}]   ;;  %s577_s7 = inlined_call_operand.vmem [shape: f32[8,256], index: 7, kind: output, shape index: {}]  }
   0x1   :  { %v385_v0 = vld [vmem:[%s570_s4 + $0x4] ss:$8 sps:$4 sm:$0xff]   ;;  %119 = vmatprep.mubr.bf16.mxu0 %v427_v1  ;;  %323 = vmatprep.mubr.bf16.mxu1 %v427_v1  ;;  %v389_v3 = vld [vmem:[%s570_s4] ss:$8 sps:$4 sm:$0xff]   ;;  %v391_v5 = vld [vmem:[%s570_s4 + $0x14] ss:$8 sps:$4 sm:$0xff]  }
   0x2   :  { %v387_v2 = vld [vmem:[%s571_s5 + $0x4] ss:$8 sps:$4 sm:$0xff]   ;;  %87 = vmatprep.subr.bf16.mxu0 %v385_v0  ;;  %v390_v4 = vld [vmem:[%s571_s5] ss:$8 sps:$4 sm:$0xff]   ;;  %v393_v6 = vld [vmem:[%s571_s5 + $0x14] ss:$8 sps:$4 sm:$0xff]  }
   0x3   :  { %291 = vmatprep.subr.bf16.mxu1 %v387_v2  ;;  %88 = vmatpush1.bf16.msra.mxu0 %v389_v3  ;;  %v395_v7 = vld [vmem:[%s570_s4 + $0x10] ss:$8 sps:$4 sm:$0xff]   ;;  %v397_v9 = vld [vmem:[%s570_s4 + $0x24] ss:$8 sps:$4 sm:$0xff]   ;;  %v401_v11 = vld [vmem:[%s570_s4 + $0x20] ss:$8 sps:$4 sm:$0xff]  }
   0x4   :  { %292 = vmatpush1.bf16.msra.mxu1 %v390_v4  ;;  %89 = vmatprep.subr.bf16.mxu0 %v391_v5  ;;  %v396_v8 = vld [vmem:[%s571_s5 + $0x10] ss:$8 sps:$4 sm:$0xff]   ;;  %v399_v10 = vld [vmem:[%s571_s5 + $0x24] ss:$8 sps:$4 sm:$0xff]   ;;  %v402_v12 = vld [vmem:[%s571_s5 + $0x20] ss:$8 sps:$4 sm:$0xff]  }
   0x5   :  { %293 = vmatprep.subr.bf16.mxu1 %v393_v6  ;;  %v403_v13 = vld [vmem:[%s570_s4 + $0x34] ss:$8 sps:$4 sm:$0xff]   ;;  %v407_v15 = vld [vmem:[%s570_s4 + $0x30] ss:$8 sps:$4 sm:$0xff]   ;;  %v33_v17 = vld [vmem:[%s572_s1] sm:$0xff]  ;;  %v337_v40 = vshrl.u32 %v336_v39, 7 }
   0x6   :  { %v405_v14 = vld [vmem:[%s571_s5 + $0x34] ss:$8 sps:$4 sm:$0xff]   ;;  %v408_v16 = vld [vmem:[%s571_s5 + $0x30] ss:$8 sps:$4 sm:$0xff]   ;;  %v411_v18 = vld [vmem:[%s573_s3 + $0x4] ss:$8 sps:$4 sm:$0xff]   ;;  %v34_v20 = vpack.c.bf16 %v33_v17, %v33_v17 }
   0x7   :  { %90 = vmatpush1.bf16.msra.mxu0 %v395_v7  ;;  %v412_v19 = vld [vmem:[%s571_s5 + $0x44] ss:$8 sps:$4 sm:$0xff]   ;;  %v409_v21 = vld [vmem:[%s573_s3] ss:$8 sps:$4 sm:$0xff]   ;;  %v417_v23 = vld [vmem:[%s573_s3 + $0x14] ss:$8 sps:$4 sm:$0xff]  }
   0x8   :  { %294 = vmatpush1.bf16.msra.mxu1 %v396_v8  ;;  %91 = vmatprep.subr.bf16.mxu0 %v397_v9  ;;  %v414_v22 = vld [vmem:[%s571_s5 + $0x40] ss:$8 sps:$4 sm:$0xff]   ;;  %v418_v24 = vld [vmem:[%s571_s5 + $0x54] ss:$8 sps:$4 sm:$0xff]   ;;  %v415_v25 = vld [vmem:[%s573_s3 + $0x10] ss:$8 sps:$4 sm:$0xff]  }
   0x9   :  { %295 = vmatprep.subr.bf16.mxu1 %v399_v10  ;;  %v420_v26 = vld [vmem:[%s571_s5 + $0x50] ss:$8 sps:$4 sm:$0xff]   ;;  %v27_v27 = vld [vmem:[%s574_s0] sm:$0xff]  ;;  %v424_v31 = vld [vmem:[%s571_s5 + $0x74] ss:$8 sps:$4 sm:$0xff]   ;;  %v338_v47 = vsub.s32 0, %v337_v40 }
   0xa   :  { %v421_v28 = vld [vmem:[%s571_s5 + $0x64] ss:$8 sps:$4 sm:$0xff]   ;;  %v28_v29 = vpack.c.bf16 %v27_v27, %v27_v27  ;;  %v423_v30 = vld [vmem:[%s571_s5 + $0x60] ss:$8 sps:$4 sm:$0xff]   ;;  %v426_v32 = vld [vmem:[%s571_s5 + $0x70] ss:$8 sps:$4 sm:$0xff]  }
   0xb   :  { %92 = vmatpush1.bf16.msra.mxu0 %v401_v11  ;;  %v193_v33 = vld [vmem:[%s575_s2] sm:$0xff]  ;;  %v342_v49 = vsub.s32 1, %v337_v40 }
   0xc   :  { %296 = vmatpush1.bf16.msra.mxu1 %v402_v12  ;;  %93 = vmatprep.subr.bf16.mxu0 %v403_v13  ;;  %v194_v34 = vpack.c.bf16 %v193_v33, %v193_v33  ;;  %v334_v48 = vld [vmem:[%s576_s6] sm:$0x3] }
   0xd   :  { %297 = vmatprep.subr.bf16.mxu1 %v405_v14  ;;  %v339_v50 = vrot.slane %v334_v48, %v338_v47  ;;  %v343_v52 = vrot.slane %v334_v48, %v342_v49 }
   0xf   :  { %94 = vmatpush1.bf16.msra.mxu0 %v407_v15 }
  0x10   :  { %298 = vmatpush1.bf16.msra.mxu1 %v408_v16  ;;  %152 = vmatprep.subr.bf16.mxu0 %v411_v18 }
  0x11   :  { %299 = vmatprep.subr.bf16.mxu1 %v412_v19 }
  0x12   :  { %362 = vmatmul.mubr.msk.bf16.vlgmr.msra.gmra.mrb[0].mxu0 %vm83_vm0, %v34_v20 }
  0x13   :  { %153 = vmatpush1.bf16.msra.mxu0 %v409_v21  ;;  %184 = vmatprep.mubr.bf16.mxu0 %v427_v1 }
  0x14   :  { %300 = vmatpush1.bf16.msra.mxu1 %v414_v22  ;;  %154 = vmatprep.subr.bf16.mxu0 %v417_v23 }
  0x15   :  { %301 = vmatprep.subr.bf16.mxu1 %v418_v24 }
  0x17   :  { %155 = vmatpush1.bf16.msra.mxu0 %v415_v25 }
  0x18   :  { %302 = vmatpush1.bf16.msra.mxu1 %v420_v26 }
  0x19   :  { %303 = vmatprep.subr.bf16.mxu1 %v421_v28 }
  0x1a   :  { %367 = vmatmul.mubr.msk.bf16.vlgmr.msra.gmra.mrb[4].mxu0 %vm148_vm1, %v28_v29 }
  0x1c   :  { %304 = vmatpush1.bf16.msra.mxu1 %v423_v30 }
  0x1d   :  { %305 = vmatprep.subr.bf16.mxu1 %v424_v31 }
  0x20   :  { %306 = vmatpush1.bf16.msra.mxu1 %v426_v32 }
  0x23   :  { %324 = vmatmul.mubr.bf16.vlgmr.msra.gmra.mrb[0].mxu1 %v194_v34 }
  0xe5   :  { %v121_v35 = vpop.f32.mrb[0].mxu0 }
  0xe6   :  { %v123_v36 = vpop.f32.mrb[1].mxu0 }
  0xe7   :  { %v125_v37 = vpop.f32.mrb[2].mxu0 }
  0xe8   :  { %v126_v38 = vpop.f32.mrb[3].mxu0 }
  0xed   :  { %v186_v41 = vpop.f32.mrb[4].mxu0 }
  0xee   :  { %v187_v42 = vadd.f32 %v186_v41, %v121_v35  ;;  %v188_v43 = vpop.f32.mrb[5].mxu0 }
  0xef   :  { %v189_v44 = vadd.f32 %v188_v43, %v123_v36  ;;  %v190_v45 = vpop.f32.mrb[6].mxu0 }
  0xf0   :  { %v191_v46 = vpop.f32.mrb[7].mxu0 }
  0xf6   :  { %v325_v51 = vpop.f32.mrb[0].mxu1 }
  0xf7   :  { %v332_v53 = vadd.f32 %v325_v51, %v187_v42  ;;  %v327_v54 = vpop.f32.mrb[1].mxu1 }
  0xf8   :  { %v333_v55 = vadd.f32 %v327_v54, %v189_v44  ;;  %v329_v56 = vpop.f32.mrb[2].mxu1 }
  0xf9   :  { %v346_v57 = vadd.f32 %v339_v50, %v332_v53  ;;  %v330_v58 = vpop.f32.mrb[3].mxu1 }
  0xfa   :  { %v347_v59 = vadd.f32 %v343_v52, %v333_v55 }
  0xfb   :  { %348 = vst [vmem:[%s577_s7] sm:$0xff] %v346_v57 }
  0xfc   :  { %349 = vst [vmem:[%s577_s7 + $0x8] sm:$0xff] %v347_v59 }

</bundles_post_ra>
